<compile_context>
chip_gen: v7x
topology: tpu7x:2x2x1
jax: 0.10.0
libtpu: 0.0.40
codegen_flags: <defaults>
</compile_context>

<pallas_src>
import jax
import jax.numpy as jnp
from jax.experimental import pallas as pl
from jax.experimental.pallas import tpu as pltpu


K_PAD = 3584   # fc1 contraction dim 3136 zero-padded to a multiple of 128*?
               # (3584 = 4 * 896, 896 = 7 * 128)


# ----------------------------------------------------------------------------
# Pallas kernel 1: fused (X @ W + b) + ReLU  (used for the three convs).
# ----------------------------------------------------------------------------
def _matmul_bias_relu_kernel(x_ref, w_ref, b_ref, o_ref):
    acc = jnp.dot(x_ref[...], w_ref[...], preferred_element_type=jnp.float32)
    acc = jnp.maximum(acc + b_ref[...], 0.0)
    o_ref[...] = acc.astype(o_ref.dtype)


# ----------------------------------------------------------------------------
# Pallas kernel 2: fused fc head — K-tiled fc1 (+bias,ReLU) then fc2 + softmax.
# Grid is over fc1's K dimension ("arbitrary"); acc_ref is the f32 accumulator.
# ----------------------------------------------------------------------------
def _fc_head_kernel(x_ref, w1_ref, b1_ref, w2_ref, b2_ref, o_ref, acc_ref):
    k = pl.program_id(0)

    @pl.when(k == 0)
    def _():
        acc_ref[...] = jnp.zeros_like(acc_ref)

    acc_ref[...] += jnp.dot(x_ref[...], w1_ref[...],
                            preferred_element_type=jnp.float32)

    @pl.when(k == pl.num_programs(0) - 1)
    def _():
        h = jnp.maximum(acc_ref[...] + b1_ref[...], 0.0)          # f32 (M, 512)
        logits = jnp.dot(h.astype(w2_ref.dtype), w2_ref[...],
                         preferred_element_type=jnp.float32) + b2_ref[...]
        logits = logits - jnp.max(logits, axis=-1, keepdims=True)
        e = jnp.exp(logits)
        o_ref[...] = (e / jnp.sum(e, axis=-1, keepdims=True)).astype(o_ref.dtype)


# ----------------------------------------------------------------------------
# Tiling helpers.
# ----------------------------------------------------------------------------
def _pick_tm(m):
    """Return (tm, m_padded). Single block for small M; otherwise a divisor of
    M that is a multiple of 8; otherwise pad M to a multiple of 256."""
    if m <= 512:
        return m, m
    for tm in (512, 400, 384, 320, 256, 200, 192, 128, 120, 112, 104,
               64, 56, 48, 40, 32, 24, 16, 8):
        if m % tm == 0:
            return tm, m
    tm = 256
    return tm, ((m + tm - 1) // tm) * tm


def _pick_k_tile(kp):
    for t in (1024, 896, 768, 640, 512, 384, 256, 128):
        if kp % t == 0:
            return t
    return kp


# ----------------------------------------------------------------------------
# Wrappers around pallas_call.
# ----------------------------------------------------------------------------
def conv_matmul_relu(patches, w, bias):
    """relu(patches @ w + bias); patches (M, K) bf16, w (K, N) bf16, bias (1, N) f32."""
    m, k = patches.shape
    n = w.shape[1]
    tm, m_pad = _pick_tm(m)
    if m_pad != m:
        patches = jnp.pad(patches, ((0, m_pad - m), (0, 0)))
    out = pl.pallas_call(
        _matmul_bias_relu_kernel,
        out_shape=jax.ShapeDtypeStruct((m_pad, n), jnp.bfloat16),
        grid_spec=pltpu.PrefetchScalarGridSpec(
            num_scalar_prefetch=0,
            grid=(m_pad // tm,),
            in_specs=[
                pl.BlockSpec((tm, k), lambda i: (i, 0)),
                pl.BlockSpec((k, n), lambda i: (0, 0)),
                pl.BlockSpec((1, n), lambda i: (0, 0)),
            ],
            out_specs=pl.BlockSpec((tm, n), lambda i: (i, 0)),
        ),
        compiler_params=pltpu.CompilerParams(
            dimension_semantics=("parallel",)),
        cost_estimate=pl.CostEstimate(
            flops=2 * m_pad * k * n,
            transcendentals=0,
            bytes_accessed=2 * (m_pad * k + k * n + m_pad * n) + 4 * n),
    )(patches, w, bias)
    if m_pad != m:
        out = out[:m]
    return out


def fc_head(x_flat, w1, b1, w2, b2):
    """softmax(relu(x @ w1 + b1) @ w2 + b2), fc1 K-tiled. x_flat (M, K_PAD) bf16."""
    m, kp = x_flat.shape
    n1 = w1.shape[1]
    a = w2.shape[1]
    kt = _pick_k_tile(kp)
    return pl.pallas_call(
        _fc_head_kernel,
        out_shape=jax.ShapeDtypeStruct((m, a), jnp.float32),
        grid_spec=pltpu.PrefetchScalarGridSpec(
            num_scalar_prefetch=0,
            grid=(kp // kt,),
            in_specs=[
                pl.BlockSpec((m, kt), lambda k: (0, k)),
                pl.BlockSpec((kt, n1), lambda k: (k, 0)),
                pl.BlockSpec((1, n1), lambda k: (0, 0)),
                pl.BlockSpec((n1, a), lambda k: (0, 0)),
                pl.BlockSpec((1, a), lambda k: (0, 0)),
            ],
            out_specs=pl.BlockSpec((m, a), lambda k: (0, 0)),
            scratch_shapes=[pltpu.VMEM((m, n1), jnp.float32)],
        ),
        compiler_params=pltpu.CompilerParams(
            dimension_semantics=("arbitrary",)),
        cost_estimate=pl.CostEstimate(
            flops=2 * m * kp * n1 + 2 * m * n1 * a,
            transcendentals=m * a,
            bytes_accessed=2 * (m * kp + kp * n1 + n1 * a)
                           + 4 * (n1 + a + m * a)),
    )(x_flat, w1, b1, w2, b2)


# ----------------------------------------------------------------------------
# im2col on channels-last activations (XLA glue: slices + stack, no transpose).
# Patch column order is (kh, kw, c) — matched by the weight prep below.
# ----------------------------------------------------------------------------
def _im2col_nhwc(x, kh, kw, stride):
    b, h, w, c = x.shape
    oh = (h - kh) // stride + 1
    ow = (w - kw) // stride + 1
    cols = []
    for i in range(kh):
        for j in range(kw):
            cols.append(x[:, i:i + stride * oh:stride, j:j + stride * ow:stride, :])
    patches = jnp.stack(cols, axis=3)                 # (B, OH, OW, KH*KW, C)
    return patches.reshape(b * oh * ow, kh * kw * c), oh, ow


# ----------------------------------------------------------------------------
# One-time parameter preparation: permute to channels-last matmul layouts,
# absorb the NCHW-flatten order into fc1_w, zero-pad fc1 K, cast to bf16.
# ----------------------------------------------------------------------------
def prepare_params(params, k_pad=K_PAD):
    def conv_w(w):  # torch (O, C, KH, KW) -> (KH*KW*C, O), bf16
        o, c, kh, kw = w.shape
        return w.transpose(2, 3, 1, 0).reshape(kh * kw * c, o).astype(jnp.bfloat16)

    c3 = params["conv3_w"].shape[0]          # 64
    k_fc, n_fc = params["fc1_w"].shape       # 3136, 512
    side = int(round((k_fc // c3) ** 0.5))   # 7
    # torch flatten order is (c, h, w); our channels-last flatten is (h, w, c).
    fc1_w = params["fc1_w"].reshape(c3, side, side, n_fc).transpose(1, 2, 0, 3)
    fc1_w = fc1_w.reshape(k_fc, n_fc)
    fc1_w = jnp.pad(fc1_w, ((0, k_pad - k_fc), (0, 0))).astype(jnp.bfloat16)

    return {
        "w1": conv_w(params["conv1_w"]), "b1": params["conv1_b"].reshape(1, -1),
        "w2": conv_w(params["conv2_w"]), "b2": params["conv2_b"].reshape(1, -1),
        "w3": conv_w(params["conv3_w"]), "b3": params["conv3_b"].reshape(1, -1),
        "fc1_w": fc1_w, "fc1_b": params["fc1_b"].reshape(1, -1),
        "fc2_w": params["fc2_w"].astype(jnp.bfloat16),
        "fc2_b": params["fc2_b"].reshape(1, -1),
    }


# ----------------------------------------------------------------------------
# Full forward pass (equivalent of PPOAtariActor.forward), channels-last.
# ----------------------------------------------------------------------------
def ppo_atari_actor_forward(prep, state):
    if state.ndim == 3:
        state = state[None]
    bsz = state.shape[0]
    x = jnp.transpose(state, (0, 2, 3, 1)).astype(jnp.bfloat16)   # NCHW -> NHWC once

    p1, oh1, ow1 = _im2col_nhwc(x, 8, 8, 4)
    h1 = conv_matmul_relu(p1, prep["w1"], prep["b1"])
    h1 = h1.reshape(bsz, oh1, ow1, h1.shape[1])

    p2, oh2, ow2 = _im2col_nhwc(h1, 4, 4, 2)
    h2 = conv_matmul_relu(p2, prep["w2"], prep["b2"])
    h2 = h2.reshape(bsz, oh2, ow2, h2.shape[1])

    p3, oh3, ow3 = _im2col_nhwc(h2, 3, 3, 1)
    h3 = conv_matmul_relu(p3, prep["w3"], prep["b3"])             # (B*7*7, 64)

    flat = h3.reshape(bsz, oh3 * ow3 * h3.shape[1])               # (B, 3136), (h,w,c) order
    k_pad = prep["fc1_w"].shape[0]
    flat = jnp.pad(flat, ((0, 0), (0, k_pad - flat.shape[1])))
    return fc_head(flat, prep["fc1_w"], prep["fc1_b"], prep["fc2_w"], prep["fc2_b"])
# TODO(synk): get_dist/action/evaluate (Categorical sampling, log_prob, entropy)
# are host-side distribution utilities, not part of forward(); not kernelized.


# ----------------------------------------------------------------------------
# Pure-JAX reference (PyTorch-faithful NCHW layout, same bf16/f32 numerics).
# ----------------------------------------------------------------------------
def reference_forward(params, state):
    if state.ndim == 3:
        state = state[None]
    x = state
    for w, b, s in ((params["conv1_w"], params["conv1_b"], 4),
                    (params["conv2_w"], params["conv2_b"], 2),
                    (params["conv3_w"], params["conv3_b"], 1)):
        x = jax.lax.conv_general_dilated(
            x.astype(jnp.bfloat16), w.astype(jnp.bfloat16), (s, s), "VALID",
            dimension_numbers=("NCHW", "OIHW", "NCHW"),
            preferred_element_type=jnp.float32)
        x = jax.nn.relu(x + b[None, :, None, None])
    x = x.reshape(x.shape[0], -1)
    x = jax.nn.relu(jnp.dot(x.astype(jnp.bfloat16),
                            params["fc1_w"].astype(jnp.bfloat16),
                            preferred_element_type=jnp.float32) + params["fc1_b"])
    logits = jnp.dot(x.astype(jnp.bfloat16),
                     params["fc2_w"].astype(jnp.bfloat16),
                     preferred_element_type=jnp.float32) + params["fc2_b"]
    return jax.nn.softmax(logits, axis=-1)


# ----------------------------------------------------------------------------
# Deterministic parameter init (shapes from the module's __init__).
# ----------------------------------------------------------------------------
def init_params(key, num_channels, action_dim):
    ks = jax.random.split(key, 12)

    def scaled_normal(k, shape, fan_in):
        return (jax.random.normal(k, shape, jnp.float32)
                * jnp.sqrt(2.0 / fan_in)).astype(jnp.float32)

    params = {
        "conv1_w": scaled_normal(ks[0], (32, num_channels, 8, 8), num_channels * 64),
        "conv1_b": 0.01 * jax.random.normal(ks[5], (32,), jnp.float32),
        "conv2_w": scaled_normal(ks[1], (64, 32, 4, 4), 32 * 16),
        "conv2_b": 0.01 * jax.random.normal(ks[6], (64,), jnp.float32),
        "conv3_w": scaled_normal(ks[2], (64, 64, 3, 3), 64 * 9),
        "conv3_b": 0.01 * jax.random.normal(ks[7], (64,), jnp.float32),
        "fc1_w": scaled_normal(ks[3], (7 * 7 * 64, 512), 7 * 7 * 64),
        "fc1_b": 0.01 * jax.random.normal(ks[8], (512,), jnp.float32),
    }
    # final layer: orthogonal init with gain 0.01 (as in orthogonal_init(..., 0.01))
    a = jax.random.normal(ks[4], (512, action_dim), jnp.float32)
    q, _ = jnp.linalg.qr(a)
    params["fc2_w"] = (0.01 * q).astype(jnp.float32)
    params["fc2_b"] = 0.01 * jax.random.normal(ks[9], (action_dim,), jnp.float32)
    return params


if __name__ == "__main__":
    num_channels, action_dim = 4, 6
    batch = 2
    key = jax.random.PRNGKey(0)
    pkey, xkey = jax.random.split(key)

    params = init_params(pkey, num_channels, action_dim)
    prep = prepare_params(params)
    # 84x84 spatial is required by the hardcoded Linear(7*7*64, 512).
    state = jax.random.uniform(xkey, (batch, num_channels, 84, 84), jnp.float32)

    forward = jax.jit(ppo_atari_actor_forward)
    probs = jax.block_until_ready(forward(prep, state))
    ref = jax.block_until_ready(reference_forward(params, state))

    assert probs.shape == (batch, action_dim), probs.shape
    assert jnp.allclose(jnp.sum(probs, axis=-1), 1.0, atol=1e-5)
    assert jnp.allclose(probs, ref, rtol=1e-2, atol=1e-3), (
        float(jnp.max(jnp.abs(probs - ref))))
    print("KERNEL_OK")
</pallas_src>

<mosaic_0001>
module attributes {stable_mosaic.version = 11 : i64} {
  func.func @_matmul_bias_relu_kernel(%arg0: i32, %arg1: memref<400x256xbf16, #tpu.memory_space<vmem>>, %arg2: memref<256x32xbf16, #tpu.memory_space<vmem>>, %arg3: memref<1x32xf32, #tpu.memory_space<vmem>>, %arg4: memref<400x32xbf16, #tpu.memory_space<vmem>>) attributes {dimension_semantics = [#tpu.dimension_semantics<parallel>], iteration_bounds = array<i64: 2>, scalar_prefetch = 0 : i64, scratch_operands = 0 : i64, tpu.core_type = #tpu.core_type<tc>, window_params = [{transform_indices = @transform_0, window_bounds = array<i64: 400, 256>}, {pipeline_mode = #tpu.pipeline_mode<synchronous>, transform_indices = @transform_1, window_bounds = array<i64: 256, 32>}, {pipeline_mode = #tpu.pipeline_mode<synchronous>, transform_indices = @transform_2, window_bounds = array<i64: 1, 32>}, {transform_indices = @transform_3, window_bounds = array<i64: 400, 32>}]} {
    %c0 = arith.constant 0 : index
    %c0_0 = arith.constant 0 : index
    %0 = vector.load %arg1[%c0, %c0_0] : memref<400x256xbf16, #tpu.memory_space<vmem>>, vector<400x256xbf16>
    %c0_1 = arith.constant 0 : index
    %c0_2 = arith.constant 0 : index
    %1 = vector.load %arg2[%c0_1, %c0_2] : memref<256x32xbf16, #tpu.memory_space<vmem>>, vector<256x32xbf16>
    %cst = arith.constant dense<0.000000e+00> : vector<400x32xf32>
    %2 = tpu.matmul %0, %1, %cst {dimension_numbers = #tpu.dot_dimension_numbers<[1], [0], [0], [1], [0, 0, 1, 1], [], []>} : vector<400x256xbf16>, vector<256x32xbf16>, vector<400x32xf32> -> vector<400x32xf32>
    %c0_3 = arith.constant 0 : index
    %c0_4 = arith.constant 0 : index
    %3 = vector.load %arg3[%c0_3, %c0_4] : memref<1x32xf32, #tpu.memory_space<vmem>>, vector<1x32xf32>
    %4 = vector.broadcast %3 : vector<1x32xf32> to vector<400x32xf32>
    %5 = arith.addf %2, %4 : vector<400x32xf32>
    %cst_5 = arith.constant 0.000000e+00 : f32
    %6 = vector.broadcast %cst_5 : f32 to vector<400x32xf32>
    %7 = arith.maximumf %5, %6 : vector<400x32xf32>
    %8 = arith.truncf %7 : vector<400x32xf32> to vector<400x32xbf16>
    %c0_6 = arith.constant 0 : index
    %c0_7 = arith.constant 0 : index
    %9 = vector.load %arg4[%c0_6, %c0_7] : memref<400x32xbf16, #tpu.memory_space<vmem>>, vector<400x32xbf16>
    tpu.vector_store %arg4[%c0_6, %c0_7], %8 {strides = array<i32>} : memref<400x32xbf16, #tpu.memory_space<vmem>>, vector<400x32xbf16>,
    return
  }
  func.func @transform_0(%arg0: i32) -> (i32, i32) {
    %c0_i32 = arith.constant 0 : i32
    %c0_i32_0 = arith.constant 0 : i32
    return %arg0, %c0_i32 : i32, i32
  }
  func.func @transform_1(%arg0: i32) -> (i32, i32) {
    %c0_i32 = arith.constant 0 : i32
    %c0_i32_0 = arith.constant 0 : i32
    %c0_i32_1 = arith.constant 0 : i32
    return %c0_i32, %c0_i32_0 : i32, i32
  }
  func.func @transform_2(%arg0: i32) -> (i32, i32) {
    %c0_i32 = arith.constant 0 : i32
    %c0_i32_0 = arith.constant 0 : i32
    %c0_i32_1 = arith.constant 0 : i32
    return %c0_i32, %c0_i32_0 : i32, i32
  }
  func.func @transform_3(%arg0: i32) -> (i32, i32) {
    %c0_i32 = arith.constant 0 : i32
    %c0_i32_0 = arith.constant 0 : i32
    return %arg0, %c0_i32 : i32, i32
  }
}

module attributes {stable_mosaic.version = 11 : i64} {
  func.func @_matmul_bias_relu_kernel(%arg0: i32, %arg1: memref<162x512xbf16, #tpu.memory_space<vmem>>, %arg2: memref<512x64xbf16, #tpu.memory_space<vmem>>, %arg3: memref<1x64xf32, #tpu.memory_space<vmem>>, %arg4: memref<162x64xbf16, #tpu.memory_space<vmem>>) attributes {dimension_semantics = [#tpu.dimension_semantics<parallel>], iteration_bounds = array<i64: 1>, scalar_prefetch = 0 : i64, scratch_operands = 0 : i64, tpu.core_type = #tpu.core_type<tc>, window_params = [{transform_indices = @transform_0, window_bounds = array<i64: 162, 512>}, {pipeline_mode = #tpu.pipeline_mode<synchronous>, transform_indices = @transform_1, window_bounds = array<i64: 512, 64>}, {pipeline_mode = #tpu.pipeline_mode<synchronous>, transform_indices = @transform_2, window_bounds = array<i64: 1, 64>}, {transform_indices = @transform_3, window_bounds = array<i64: 162, 64>}]} {
    %c0 = arith.constant 0 : index
    %c0_0 = arith.constant 0 : index
    %0 = vector.load %arg1[%c0, %c0_0] : memref<162x512xbf16, #tpu.memory_space<vmem>>, vector<162x512xbf16>
    %c0_1 = arith.constant 0 : index
    %c0_2 = arith.constant 0 : index
    %1 = vector.load %arg2[%c0_1, %c0_2] : memref<512x64xbf16, #tpu.memory_space<vmem>>, vector<512x64xbf16>
    %cst = arith.constant dense<0.000000e+00> : vector<162x64xf32>
    %2 = tpu.matmul %0, %1, %cst {dimension_numbers = #tpu.dot_dimension_numbers<[1], [0], [0], [1], [0, 0, 1, 1], [], []>} : vector<162x512xbf16>, vector<512x64xbf16>, vector<162x64xf32> -> vector<162x64xf32>
    %c0_3 = arith.constant 0 : index
    %c0_4 = arith.constant 0 : index
    %3 = vector.load %arg3[%c0_3, %c0_4] : memref<1x64xf32, #tpu.memory_space<vmem>>, vector<1x64xf32>
    %4 = vector.broadcast %3 : vector<1x64xf32> to vector<162x64xf32>
    %5 = arith.addf %2, %4 : vector<162x64xf32>
    %cst_5 = arith.constant 0.000000e+00 : f32
    %6 = vector.broadcast %cst_5 : f32 to vector<162x64xf32>
    %7 = arith.maximumf %5, %6 : vector<162x64xf32>
    %8 = arith.truncf %7 : vector<162x64xf32> to vector<162x64xbf16>
    %c0_6 = arith.constant 0 : index
    %c0_7 = arith.constant 0 : index
    %9 = vector.load %arg4[%c0_6, %c0_7] : memref<162x64xbf16, #tpu.memory_space<vmem>>, vector<162x64xbf16>
    tpu.vector_store %arg4[%c0_6, %c0_7], %8 {strides = array<i32>} : memref<162x64xbf16, #tpu.memory_space<vmem>>, vector<162x64xbf16>,
    return
  }
  func.func @transform_0(%arg0: i32) -> (i32, i32) {
    %c0_i32 = arith.constant 0 : i32
    %c0_i32_0 = arith.constant 0 : i32
    return %arg0, %c0_i32 : i32, i32
  }
  func.func @transform_1(%arg0: i32) -> (i32, i32) {
    %c0_i32 = arith.constant 0 : i32
    %c0_i32_0 = arith.constant 0 : i32
    %c0_i32_1 = arith.constant 0 : i32
    return %c0_i32, %c0_i32_0 : i32, i32
  }
  func.func @transform_2(%arg0: i32) -> (i32, i32) {
    %c0_i32 = arith.constant 0 : i32
    %c0_i32_0 = arith.constant 0 : i32
    %c0_i32_1 = arith.constant 0 : i32
    return %c0_i32, %c0_i32_0 : i32, i32
  }
  func.func @transform_3(%arg0: i32) -> (i32, i32) {
    %c0_i32 = arith.constant 0 : i32
    %c0_i32_0 = arith.constant 0 : i32
    return %arg0, %c0_i32 : i32, i32
  }
}

module attributes {stable_mosaic.version = 11 : i64} {
  func.func @_matmul_bias_relu_kernel(%arg0: i32, %arg1: memref<98x576xbf16, #tpu.memory_space<vmem>>, %arg2: memref<576x64xbf16, #tpu.memory_space<vmem>>, %arg3: memref<1x64xf32, #tpu.memory_space<vmem>>, %arg4: memref<98x64xbf16, #tpu.memory_space<vmem>>) attributes {dimension_semantics = [#tpu.dimension_semantics<parallel>], iteration_bounds = array<i64: 1>, scalar_prefetch = 0 : i64, scratch_operands = 0 : i64, tpu.core_type = #tpu.core_type<tc>, window_params = [{transform_indices = @transform_0, window_bounds = array<i64: 98, 576>}, {pipeline_mode = #tpu.pipeline_mode<synchronous>, transform_indices = @transform_1, window_bounds = array<i64: 576, 64>}, {pipeline_mode = #tpu.pipeline_mode<synchronous>, transform_indices = @transform_2, window_bounds = array<i64: 1, 64>}, {transform_indices = @transform_3, window_bounds = array<i64: 98, 64>}]} {
    %c0 = arith.constant 0 : index
    %c0_0 = arith.constant 0 : index
    %0 = vector.load %arg1[%c0, %c0_0] : memref<98x576xbf16, #tpu.memory_space<vmem>>, vector<98x576xbf16>
    %c0_1 = arith.constant 0 : index
    %c0_2 = arith.constant 0 : index
    %1 = vector.load %arg2[%c0_1, %c0_2] : memref<576x64xbf16, #tpu.memory_space<vmem>>, vector<576x64xbf16>
    %cst = arith.constant dense<0.000000e+00> : vector<98x64xf32>
    %2 = tpu.matmul %0, %1, %cst {dimension_numbers = #tpu.dot_dimension_numbers<[1], [0], [0], [1], [0, 0, 1, 1], [], []>} : vector<98x576xbf16>, vector<576x64xbf16>, vector<98x64xf32> -> vector<98x64xf32>
    %c0_3 = arith.constant 0 : index
    %c0_4 = arith.constant 0 : index
    %3 = vector.load %arg3[%c0_3, %c0_4] : memref<1x64xf32, #tpu.memory_space<vmem>>, vector<1x64xf32>
    %4 = vector.broadcast %3 : vector<1x64xf32> to vector<98x64xf32>
    %5 = arith.addf %2, %4 : vector<98x64xf32>
    %cst_5 = arith.constant 0.000000e+00 : f32
    %6 = vector.broadcast %cst_5 : f32 to vector<98x64xf32>
    %7 = arith.maximumf %5, %6 : vector<98x64xf32>
    %8 = arith.truncf %7 : vector<98x64xf32> to vector<98x64xbf16>
    %c0_6 = arith.constant 0 : index
    %c0_7 = arith.constant 0 : index
    %9 = vector.load %arg4[%c0_6, %c0_7] : memref<98x64xbf16, #tpu.memory_space<vmem>>, vector<98x64xbf16>
    tpu.vector_store %arg4[%c0_6, %c0_7], %8 {strides = array<i32>} : memref<98x64xbf16, #tpu.memory_space<vmem>>, vector<98x64xbf16>,
    return
  }
  func.func @transform_0(%arg0: i32) -> (i32, i32) {
    %c0_i32 = arith.constant 0 : i32
    %c0_i32_0 = arith.constant 0 : i32
    return %arg0, %c0_i32 : i32, i32
  }
  func.func @transform_1(%arg0: i32) -> (i32, i32) {
    %c0_i32 = arith.constant 0 : i32
    %c0_i32_0 = arith.constant 0 : i32
    %c0_i32_1 = arith.constant 0 : i32
    return %c0_i32, %c0_i32_0 : i32, i32
  }
  func.func @transform_2(%arg0: i32) -> (i32, i32) {
    %c0_i32 = arith.constant 0 : i32
    %c0_i32_0 = arith.constant 0 : i32
    %c0_i32_1 = arith.constant 0 : i32
    return %c0_i32, %c0_i32_0 : i32, i32
  }
  func.func @transform_3(%arg0: i32) -> (i32, i32) {
    %c0_i32 = arith.constant 0 : i32
    %c0_i32_0 = arith.constant 0 : i32
    return %arg0, %c0_i32 : i32, i32
  }
}

module attributes {stable_mosaic.version = 11 : i64} {
  func.func @_fc_head_kernel(%arg0: i32, %arg1: memref<2x896xbf16, #tpu.memory_space<vmem>>, %arg2: memref<896x512xbf16, #tpu.memory_space<vmem>>, %arg3: memref<1x512xf32, #tpu.memory_space<vmem>>, %arg4: memref<512x6xbf16, #tpu.memory_space<vmem>>, %arg5: memref<1x6xf32, #tpu.memory_space<vmem>>, %arg6: memref<2x6xf32, #tpu.memory_space<vmem>>, %arg7: memref<2x512xf32, #tpu.memory_space<vmem>>) attributes {dimension_semantics = [#tpu.dimension_semantics<arbitrary>], iteration_bounds = array<i64: 4>, scalar_prefetch = 0 : i64, scratch_operands = 1 : i64, tpu.core_type = #tpu.core_type<tc>, window_params = [{transform_indices = @transform_0, window_bounds = array<i64: 2, 896>}, {transform_indices = @transform_1, window_bounds = array<i64: 896, 512>}, {pipeline_mode = #tpu.pipeline_mode<synchronous>, transform_indices = @transform_2, window_bounds = array<i64: 1, 512>}, {pipeline_mode = #tpu.pipeline_mode<synchronous>, transform_indices = @transform_3, window_bounds = array<i64: 512, 6>}, {pipeline_mode = #tpu.pipeline_mode<synchronous>, transform_indices = @transform_4, window_bounds = array<i64: 1, 6>}, {pipeline_mode = #tpu.pipeline_mode<synchronous>, transform_indices = @transform_5, window_bounds = array<i64: 2, 6>}]} {
    %c0_i32 = arith.constant 0 : i32
    %0 = arith.cmpi eq, %arg0, %c0_i32 : i32
    %1 = arith.extui %0 : i1 to i32
    %c0_i32_0 = arith.constant 0 : i32
    %2 = arith.cmpi ne, %1, %c0_i32_0 : i32
    scf.if %2 {
      %cst_9 = arith.constant 0.000000e+00 : f32
      %12 = vector.broadcast %cst_9 : f32 to vector<2x512xf32>
      %c0_10 = arith.constant 0 : index
      %c0_11 = arith.constant 0 : index
      %13 = vector.load %arg7[%c0_10, %c0_11] : memref<2x512xf32, #tpu.memory_space<vmem>>, vector<2x512xf32>
      tpu.vector_store %arg7[%c0_10, %c0_11], %12 {strides = array<i32>} : memref<2x512xf32, #tpu.memory_space<vmem>>, vector<2x512xf32>,
    } else {
    }
    %c0 = arith.constant 0 : index
    %c0_1 = arith.constant 0 : index
    %3 = vector.load %arg7[%c0, %c0_1] : memref<2x512xf32, #tpu.memory_space<vmem>>, vector<2x512xf32>
    %c0_2 = arith.constant 0 : index
    %c0_3 = arith.constant 0 : index
    %4 = vector.load %arg1[%c0_2, %c0_3] : memref<2x896xbf16, #tpu.memory_space<vmem>>, vector<2x896xbf16>
    %c0_4 = arith.constant 0 : index
    %c0_5 = arith.constant 0 : index
    %5 = vector.load %arg2[%c0_4, %c0_5] : memref<896x512xbf16, #tpu.memory_space<vmem>>, vector<896x512xbf16>
    %cst = arith.constant dense<0.000000e+00> : vector<2x512xf32>
    %6 = tpu.matmul %4, %5, %cst {dimension_numbers = #tpu.dot_dimension_numbers<[1], [0], [0], [1], [0, 0, 1, 1], [], []>} : vector<2x896xbf16>, vector<896x512xbf16>, vector<2x512xf32> -> vector<2x512xf32>
    %7 = arith.addf %3, %6 : vector<2x512xf32>
    %c0_6 = arith.constant 0 : index
    %c0_7 = arith.constant 0 : index
    %8 = vector.load %arg7[%c0_6, %c0_7] : memref<2x512xf32, #tpu.memory_space<vmem>>, vector<2x512xf32>
    tpu.vector_store %arg7[%c0_6, %c0_7], %7 {strides = array<i32>} : memref<2x512xf32, #tpu.memory_space<vmem>>, vector<2x512xf32>,
    %c3_i32 = arith.constant 3 : i32
    %9 = arith.cmpi eq, %arg0, %c3_i32 : i32
    %10 = arith.extui %9 : i1 to i32
    %c0_i32_8 = arith.constant 0 : i32
    %11 = arith.cmpi ne, %10, %c0_i32_8 : i32
    scf.if %11 {
      %c0_9 = arith.constant 0 : index
      %c0_10 = arith.constant 0 : index
      %12 = vector.load %arg7[%c0_9, %c0_10] : memref<2x512xf32, #tpu.memory_space<vmem>>, vector<2x512xf32>
      %c0_11 = arith.constant 0 : index
      %c0_12 = arith.constant 0 : index
      %13 = vector.load %arg3[%c0_11, %c0_12] : memref<1x512xf32, #tpu.memory_space<vmem>>, vector<1x512xf32>
      %14 = vector.broadcast %13 : vector<1x512xf32> to vector<2x512xf32>
      %15 = arith.addf %12, %14 : vector<2x512xf32>
      %cst_13 = arith.constant 0.000000e+00 : f32
      %16 = vector.broadcast %cst_13 : f32 to vector<2x512xf32>
      %17 = arith.maximumf %15, %16 : vector<2x512xf32>
      %18 = arith.truncf %17 : vector<2x512xf32> to vector<2x512xbf16>
      %c0_14 = arith.constant 0 : index
      %c0_15 = arith.constant 0 : index
      %19 = vector.load %arg4[%c0_14, %c0_15] : memref<512x6xbf16, #tpu.memory_space<vmem>>, vector<512x6xbf16>
      %cst_16 = arith.constant dense<0.000000e+00> : vector<2x6xf32>
      %20 = tpu.matmul %18, %19, %cst_16 {dimension_numbers = #tpu.dot_dimension_numbers<[1], [0], [0], [1], [0, 0, 1, 1], [], []>} : vector<2x512xbf16>, vector<512x6xbf16>, vector<2x6xf32> -> vector<2x6xf32>
      %c0_17 = arith.constant 0 : index
      %c0_18 = arith.constant 0 : index
      %21 = vector.load %arg5[%c0_17, %c0_18] : memref<1x6xf32, #tpu.memory_space<vmem>>, vector<1x6xf32>
      %22 = vector.broadcast %21 : vector<1x6xf32> to vector<2x6xf32>
      %23 = arith.addf %20, %22 : vector<2x6xf32>
      %cst_19 = arith.constant dense<0xFF800000> : vector<2xf32>
      %24 = vector.multi_reduction <maximumf>, %23, %cst_19 [1] : vector<2x6xf32> to vector<2xf32>
      %25 = vector.shape_cast %24 : vector<2xf32> to vector<2x1xf32>
      %26 = vector.broadcast %25 : vector<2x1xf32> to vector<2x6xf32>
      %27 = arith.subf %23, %26 : vector<2x6xf32>
      %28 = math.exp %27 : vector<2x6xf32>
      %cst_20 = arith.constant dense<0.000000e+00> : vector<2xf32>
      %29 = vector.multi_reduction <add>, %28, %cst_20 [1] : vector<2x6xf32> to vector<2xf32>
      %30 = vector.shape_cast %29 : vector<2xf32> to vector<2x1xf32>
      %31 = vector.broadcast %30 : vector<2x1xf32> to vector<2x6xf32>
      %32 = arith.divf %28, %31 : vector<2x6xf32>
      %c0_21 = arith.constant 0 : index
      %c0_22 = arith.constant 0 : index
      %33 = vector.load %arg6[%c0_21, %c0_22] : memref<2x6xf32, #tpu.memory_space<vmem>>, vector<2x6xf32>
      tpu.vector_store %arg6[%c0_21, %c0_22], %32 {strides = array<i32>} : memref<2x6xf32, #tpu.memory_space<vmem>>, vector<2x6xf32>,
    } else {
    }
    return
  }
  func.func @transform_0(%arg0: i32) -> (i32, i32) {
    %c0_i32 = arith.constant 0 : i32
    %c0_i32_0 = arith.constant 0 : i32
    return %c0_i32, %arg0 : i32, i32
  }
  func.func @transform_1(%arg0: i32) -> (i32, i32) {
    %c0_i32 = arith.constant 0 : i32
    %c0_i32_0 = arith.constant 0 : i32
    return %arg0, %c0_i32 : i32, i32
  }
  func.func @transform_2(%arg0: i32) -> (i32, i32) {
    %c0_i32 = arith.constant 0 : i32
    %c0_i32_0 = arith.constant 0 : i32
    %c0_i32_1 = arith.constant 0 : i32
    return %c0_i32, %c0_i32_0 : i32, i32
  }
  func.func @transform_3(%arg0: i32) -> (i32, i32) {
    %c0_i32 = arith.constant 0 : i32
    %c0_i32_0 = arith.constant 0 : i32
    %c0_i32_1 = arith.constant 0 : i32
    return %c0_i32, %c0_i32_0 : i32, i32
  }
  func.func @transform_4(%arg0: i32) -> (i32, i32) {
    %c0_i32 = arith.constant 0 : i32
    %c0_i32_0 = arith.constant 0 : i32
    %c0_i32_1 = arith.constant 0 : i32
    return %c0_i32, %c0_i32_0 : i32, i32
  }
  func.func @transform_5(%arg0: i32) -> (i32, i32) {
    %c0_i32 = arith.constant 0 : i32
    %c0_i32_0 = arith.constant 0 : i32
    %c0_i32_1 = arith.constant 0 : i32
    return %c0_i32, %c0_i32_0 : i32, i32
  }
}

</mosaic_0001>

<bundles_post_ra>
// kernel: ppo_atari_actor_forward.4
= control target key start
LH: loop header
LB: loop body
LE: loop exit
PB: predicated region body
PF: predicated region fallthrough
CT: control target
= control target key end

     0   :  { %s1542_s12 = smov 0   ;;  %s1852_s0 = inlined_call_operand.vmem [shape: bf16[800,256], index: 0, kind: input, shape index: {}]   ;;  %s1853_s1 = inlined_call_operand.vmem [shape: bf16[256,32], index: 1, kind: input, shape index: {}]   ;;  %s1854_s2 = inlined_call_operand.vmem [shape: f32[1,32], index: 2, kind: input, shape index: {}]   ;;  %s1855_s3 = inlined_call_operand.vmem [shape: bf16[800,32], index: 3, kind: output, shape index: {}]  }
   0x1 LB: > { %s1203_s13 = sadd.s32 4294967295, %s1519_s12   ;;  %p1207_p0 = scmp.ge.s32.totalorder %s1519_s12, 1  ;;  %s1519_s12 = sphi %s1542_s12, %s13_s12  }
   0x2   : > { %p139_p1 = scmp.lt.s32.totalorder %s1519_s12, 3 }
   0x4   : > { %p140_p2 = pnand %p1207_p0, %p139_p1 }
   0x5   : > { %v1422_v0 = vld [vmem:[%s1853_s1] sm:$0xff] (!%p140_p2)   ;;  %v1521_v1 = vmov (!%p140_p2), 0   ;;  %s164_s16 = smul.u32 (!%p140_p2), 50, %s1203_s13  ;;  %v1423_v2 = vld [vmem:[%s1853_s1 + $0x8] sm:$0xff] (!%p140_p2)   ;;  %v1424_v3 = vld [vmem:[%s1853_s1 + $0x10] sm:$0xff] (!%p140_p2)   ;;  %vm1096_vm0 = vcmask (!%p140_p2), 257024  }
   0x6   : > { %143 = sbr.rel (%p140_p2) target bundleno = 387 (0x183), region = 32  ;;  %613 = vmatprep.subr.bf16.mxu0 (!%p140_p2), %v1521_v1  ;;  %1381 = vmatprep.subr.bf16.mxu1 (!%p140_p2), %v1521_v1  ;;  %v1425_v4 = vld [vmem:[%s1853_s1 + $0x18] sm:$0xff] (!%p140_p2)   ;;  %v1426_v5 = vld [vmem:[%s1853_s1 + $0x20] sm:$0xff] (!%p140_p2)   ;;  %v1427_v7 = vld [vmem:[%s1853_s1 + $0x28] sm:$0xff] (!%p140_p2)  }
   0x7   : > { %614 = vmatpush1.bf16.msra.mxu0 (!%p140_p2), %v1422_v0  ;;  %1397 = vmatpush1.bf16.msra.mxu1 (!%p140_p2), %v1422_v0  ;;  %p165_p3 = scmp.lt.s32.totalorder (!%p140_p2), %s164_s16, 99  ;;  %v1428_v9 = vld [vmem:[%s1853_s1 + $0x30] sm:$0xff] (!%p140_p2)   ;;  %v1429_v10 = vld [vmem:[%s1853_s1 + $0x38] sm:$0xff] (!%p140_p2)   ;;  %v1430_v11 = vld [vmem:[%s1853_s1 + $0x40] sm:$0xff] (!%p140_p2)  }
   0x8   : > { %615 = vmatprep.subr.bf16.mxu0 (!%p140_p2), %v1521_v1  ;;  %1382 = vmatprep.subr.bf16.mxu1 (!%p140_p2), %v1521_v1  ;;  %v1431_v12 = vld [vmem:[%s1853_s1 + $0x48] sm:$0xff] (!%p140_p2)   ;;  %v1432_v13 = vld [vmem:[%s1853_s1 + $0x50] sm:$0xff] (!%p140_p2)   ;;  %v1433_v14 = vld [vmem:[%s1853_s1 + $0x58] sm:$0xff] (!%p140_p2)  }
   0x9   : > { %v1434_v15 = vld [vmem:[%s1853_s1 + $0x60] sm:$0xff] (!%p140_p2)   ;;  %v1435_v16 = vld [vmem:[%s1853_s1 + $0x68] sm:$0xff] (!%p140_p2)   ;;  %v1436_v17 = vld [vmem:[%s1853_s1 + $0x70] sm:$0xff] (!%p140_p2)  }
   0xa   : > { %v1437_v18 = vld [vmem:[%s1853_s1 + $0x78] sm:$0xff] (!%p140_p2)  }
   0xb   : > { %616 = vmatpush1.bf16.msra.mxu0 (!%p140_p2), %v1423_v2  ;;  %1398 = vmatpush1.bf16.msra.mxu1 (!%p140_p2), %v1423_v2 }
   0xc   : > { %617 = vmatprep.subr.bf16.mxu0 (!%p140_p2), %v1521_v1  ;;  %1383 = vmatprep.subr.bf16.mxu1 (!%p140_p2), %v1521_v1 }
   0xd   : > { %s1857_s16 = smov (!%p165_p3, %s164_s16), 99 }
   0xe   : > { %s1330_s23 = sshll.u32 %s1857_s16, 3  ;;  %s1210_s29 = sshll.u32 %s1857_s16, 2 }
   0xf   : > { %618 = vmatpush1.bf16.msra.mxu0 %v1424_v3  ;;  %1399 = vmatpush1.bf16.msra.mxu1 %v1424_v3  ;;  %s1579_s28 = scalar_lea.vmem %s1852_s0, %s1330_s23  ;;  %v1691_v3 = vld [vmem:[%s1854_s2] ss:$0 sm:$0xff]  ;;  %s1701_s16 = scalar_lea.vmem %s1855_s3, %s1210_s29 }
  0x10   : > { %619 = vmatprep.subr.bf16.mxu0 %v1521_v1  ;;  %1384 = vmatprep.subr.bf16.mxu1 %v1521_v1  ;;  %v1440_v6 = vld [vmem:[%s1579_s28 + $0x4] ss:$8 sps:$4 sm:$0xff]   ;;  %v1443_v8 = vld [vmem:[%s1579_s28 + $0xd4] ss:$8 sps:$4 sm:$0xff]   ;;  %v1438_v19 = vld [vmem:[%s1579_s28] ss:$8 sps:$4 sm:$0xff]  }
  0x11   : > { %645 = vmatprep.mubr.bf16.mxu0 %v1440_v6  ;;  %749 = vmatprep.mubr.bf16.mxu1 %v1443_v8  ;;  %v1441_v20 = vld [vmem:[%s1579_s28 + $0xd0] ss:$8 sps:$4 sm:$0xff]   ;;  %v1444_v21 = vld [vmem:[%s1579_s28 + $0x14] ss:$8 sps:$4 sm:$0xff]   ;;  %v1447_v22 = vld [vmem:[%s1579_s28 + $0xe4] ss:$8 sps:$4 sm:$0xff]  }
  0x12   : > { %v1446_v23 = vld [vmem:[%s1579_s28 + $0x10] ss:$8 sps:$4 sm:$0xff]   ;;  %v1449_v24 = vld [vmem:[%s1579_s28 + $0xe0] ss:$8 sps:$4 sm:$0xff]   ;;  %v1450_v25 = vld [vmem:[%s1579_s28 + $0x24] ss:$8 sps:$4 sm:$0xff]  }
  0x13   : > { %620 = vmatpush1.bf16.msra.mxu0 %v1425_v4  ;;  %1400 = vmatpush1.bf16.msra.mxu1 %v1425_v4  ;;  %v1453_v26 = vld [vmem:[%s1579_s28 + $0xf4] ss:$8 sps:$4 sm:$0xff]   ;;  %v1452_v27 = vld [vmem:[%s1579_s28 + $0x20] ss:$8 sps:$4 sm:$0xff]   ;;  %v1455_v28 = vld [vmem:[%s1579_s28 + $0xf0] ss:$8 sps:$4 sm:$0xff]  }
  0x14   : > { %621 = vmatprep.subr.bf16.mxu0 %v1521_v1  ;;  %1385 = vmatprep.subr.bf16.mxu1 %v1521_v1  ;;  %v1456_v29 = vld [vmem:[%s1579_s28 + $0x34] ss:$8 sps:$4 sm:$0xff]   ;;  %v1459_v30 = vld [vmem:[%s1579_s28 + $0x104] ss:$8 sps:$4 sm:$0xff]   ;;  %v1458_v31 = vld [vmem:[%s1579_s28 + $0x30] ss:$8 sps:$4 sm:$0xff]  }
  0x15   : > { %v1461_v32 = vld [vmem:[%s1579_s28 + $0x100] ss:$8 sps:$4 sm:$0xff]   ;;  %v1462_v33 = vld [vmem:[%s1579_s28 + $0x44] ss:$8 sps:$4 sm:$0xff]   ;;  %v1465_v34 = vld [vmem:[%s1579_s28 + $0x114] ss:$8 sps:$4 sm:$0xff]  }
  0x16   : > { %v1464_v35 = vld [vmem:[%s1579_s28 + $0x40] ss:$8 sps:$4 sm:$0xff]   ;;  %v1467_v36 = vld [vmem:[%s1579_s28 + $0x110] ss:$8 sps:$4 sm:$0xff]   ;;  %v1468_v37 = vld [vmem:[%s1579_s28 + $0x54] ss:$8 sps:$4 sm:$0xff]  }
  0x17   : > { %622 = vmatpush1.bf16.msra.mxu0 %v1426_v5  ;;  %1401 = vmatpush1.bf16.msra.mxu1 %v1426_v5  ;;  %v1471_v38 = vld [vmem:[%s1579_s28 + $0x124] ss:$8 sps:$4 sm:$0xff]   ;;  %v1470_v39 = vld [vmem:[%s1579_s28 + $0x50] ss:$8 sps:$4 sm:$0xff]   ;;  %v1473_v40 = vld [vmem:[%s1579_s28 + $0x120] ss:$8 sps:$4 sm:$0xff]  }
  0x18   : > { %623 = vmatprep.subr.bf16.mxu0 %v1521_v1  ;;  %1386 = vmatprep.subr.bf16.mxu1 %v1521_v1  ;;  %v1474_v41 = vld [vmem:[%s1579_s28 + $0x64] ss:$8 sps:$4 sm:$0xff]   ;;  %v1477_v42 = vld [vmem:[%s1579_s28 + $0x134] ss:$8 sps:$4 sm:$0xff]   ;;  %v1476_v43 = vld [vmem:[%s1579_s28 + $0x60] ss:$8 sps:$4 sm:$0xff]  }
  0x19   : > { %v1479_v44 = vld [vmem:[%s1579_s28 + $0x130] ss:$8 sps:$4 sm:$0xff]   ;;  %v1480_v45 = vld [vmem:[%s1579_s28 + $0x74] ss:$8 sps:$4 sm:$0xff]   ;;  %v1483_v46 = vld [vmem:[%s1579_s28 + $0x144] ss:$8 sps:$4 sm:$0xff]  }
  0x1a   : > { %v1482_v47 = vld [vmem:[%s1579_s28 + $0x70] ss:$8 sps:$4 sm:$0xff]   ;;  %v1485_v48 = vld [vmem:[%s1579_s28 + $0x140] ss:$8 sps:$4 sm:$0xff]   ;;  %v1486_v49 = vld [vmem:[%s1579_s28 + $0x84] ss:$8 sps:$4 sm:$0xff]  }
  0x1b   : > { %624 = vmatpush1.bf16.msra.mxu0 %v1427_v7  ;;  %1402 = vmatpush1.bf16.msra.mxu1 %v1427_v7  ;;  %v1489_v50 = vld [vmem:[%s1579_s28 + $0x154] ss:$8 sps:$4 sm:$0xff]   ;;  %v1488_v51 = vld [vmem:[%s1579_s28 + $0x80] ss:$8 sps:$4 sm:$0xff]   ;;  %v1491_v52 = vld [vmem:[%s1579_s28 + $0x150] ss:$8 sps:$4 sm:$0xff]  }
  0x1c   : > { %625 = vmatprep.subr.bf16.mxu0 %v1521_v1  ;;  %1387 = vmatprep.subr.bf16.mxu1 %v1521_v1  ;;  %v1492_v53 = vld [vmem:[%s1579_s28 + $0x94] ss:$8 sps:$4 sm:$0xff]   ;;  %v1495_v54 = vld [vmem:[%s1579_s28 + $0x164] ss:$8 sps:$4 sm:$0xff]   ;;  %v1494_v55 = vld [vmem:[%s1579_s28 + $0x90] ss:$8 sps:$4 sm:$0xff]  }
  0x1d   : > { %v1497_v56 = vld [vmem:[%s1579_s28 + $0x160] ss:$8 sps:$4 sm:$0xff]   ;;  %v1498_v57 = vld [vmem:[%s1579_s28 + $0xa4] ss:$8 sps:$4 sm:$0xff]   ;;  %v1501_v58 = vld [vmem:[%s1579_s28 + $0x174] ss:$8 sps:$4 sm:$0xff]  }
  0x1e   : > { %v1500_v59 = vld [vmem:[%s1579_s28 + $0xa0] ss:$8 sps:$4 sm:$0xff]   ;;  %v1503_v60 = vld [vmem:[%s1579_s28 + $0x170] ss:$8 sps:$4 sm:$0xff]   ;;  %v1504_v61 = vld [vmem:[%s1579_s28 + $0xb4] ss:$8 sps:$4 sm:$0xff]  }
  0x1f   : > { %626 = vmatpush1.bf16.msra.mxu0 %v1428_v9  ;;  %1403 = vmatpush1.bf16.msra.mxu1 %v1428_v9  ;;  %v1507_v62 = vld [vmem:[%s1579_s28 + $0x184] ss:$8 sps:$4 sm:$0xff]   ;;  %v1506_v63 = vld [vmem:[%s1579_s28 + $0xb0] ss:$8 sps:$4 sm:$0xff]   ;;  %v1509_v0 = vld [vmem:[%s1579_s28 + $0x180] ss:$8 sps:$4 sm:$0xff]  }
  0x20   : > { %627 = vmatprep.subr.bf16.mxu0 %v1521_v1  ;;  %1388 = vmatprep.subr.bf16.mxu1 %v1521_v1  ;;  %v1512_v2 = vld [vmem:[%s1579_s28 + $0xc0] ss:$8 sps:$4 sm:$0xff]  }
  0x23   : > { %628 = vmatpush1.bf16.msra.mxu0 %v1429_v10  ;;  %1404 = vmatpush1.bf16.msra.mxu1 %v1429_v10 }
  0x24   : > { %629 = vmatprep.subr.bf16.mxu0 %v1521_v1  ;;  %1389 = vmatprep.subr.bf16.mxu1 %v1521_v1 }
  0x27   : > { %630 = vmatpush1.bf16.msra.mxu0 %v1430_v11  ;;  %1405 = vmatpush1.bf16.msra.mxu1 %v1430_v11 }
  0x28   : > { %631 = vmatprep.subr.bf16.mxu0 %v1521_v1  ;;  %1390 = vmatprep.subr.bf16.mxu1 %v1521_v1 }
  0x2b   : > { %632 = vmatpush1.bf16.msra.mxu0 %v1431_v12  ;;  %1406 = vmatpush1.bf16.msra.mxu1 %v1431_v12 }
  0x2c   : > { %633 = vmatprep.subr.bf16.mxu0 %v1521_v1  ;;  %1391 = vmatprep.subr.bf16.mxu1 %v1521_v1 }
  0x2f   : > { %634 = vmatpush1.bf16.msra.mxu0 %v1432_v13  ;;  %1407 = vmatpush1.bf16.msra.mxu1 %v1432_v13 }
  0x30   : > { %635 = vmatprep.subr.bf16.mxu0 %v1521_v1  ;;  %1392 = vmatprep.subr.bf16.mxu1 %v1521_v1 }
  0x33   : > { %636 = vmatpush1.bf16.msra.mxu0 %v1433_v14  ;;  %1408 = vmatpush1.bf16.msra.mxu1 %v1433_v14 }
  0x34   : > { %637 = vmatprep.subr.bf16.mxu0 %v1521_v1  ;;  %1393 = vmatprep.subr.bf16.mxu1 %v1521_v1 }
  0x37   : > { %638 = vmatpush1.bf16.msra.mxu0 %v1434_v15  ;;  %1409 = vmatpush1.bf16.msra.mxu1 %v1434_v15 }
  0x38   : > { %639 = vmatprep.subr.bf16.mxu0 %v1521_v1  ;;  %1394 = vmatprep.subr.bf16.mxu1 %v1521_v1 }
  0x3b   : > { %640 = vmatpush1.bf16.msra.mxu0 %v1435_v16  ;;  %1410 = vmatpush1.bf16.msra.mxu1 %v1435_v16 }
  0x3c   : > { %641 = vmatprep.subr.bf16.mxu0 %v1521_v1  ;;  %1395 = vmatprep.subr.bf16.mxu1 %v1521_v1 }
  0x3f   : > { %642 = vmatpush1.bf16.msra.mxu0 %v1436_v17  ;;  %1411 = vmatpush1.bf16.msra.mxu1 %v1436_v17 }
  0x40   : > { %643 = vmatprep.subr.bf16.mxu0 %v1521_v1  ;;  %1396 = vmatprep.subr.bf16.mxu1 %v1521_v1  ;;  %v1510_v1 = vld [vmem:[%s1579_s28 + $0xc4] ss:$8 sps:$4 sm:$0xff]  }
  0x43   : > { %644 = vmatpush1.bf16.msra.mxu0 %v1437_v18  ;;  %1412 = vmatpush1.bf16.msra.mxu1 %v1437_v18 }
  0x46   : > { %646 = vmatmul.mubr.bf16.vlgmr.msra.gmra.mrb[0].mxu0 %v1438_v19  ;;  %750 = vmatmul.mubr.bf16.vlgmr.msra.gmra.mrb[0].mxu1 %v1441_v20 }
  0x47   : > { %653 = vmatprep.mubr.bf16.mxu0 %v1444_v21  ;;  %757 = vmatprep.mubr.bf16.mxu1 %v1447_v22 }
  0x4e   : > { %654 = vmatmul.mubr.bf16.gmra.mrb[4].mxu0 %v1446_v23  ;;  %758 = vmatmul.mubr.bf16.gmra.mrb[4].mxu1 %v1449_v24 }
  0x4f   : > { %661 = vmatprep.mubr.bf16.mxu0 %v1450_v25  ;;  %765 = vmatprep.mubr.bf16.mxu1 %v1453_v26 }
  0x56   : > { %662 = vmatmul.mubr.bf16.gmra.mrb[8].mxu0 %v1452_v27  ;;  %766 = vmatmul.mubr.bf16.gmra.mrb[8].mxu1 %v1455_v28 }
  0x57   : > { %669 = vmatprep.mubr.bf16.mxu0 %v1456_v29  ;;  %773 = vmatprep.mubr.bf16.mxu1 %v1459_v30 }
  0x5e   : > { %670 = vmatmul.mubr.bf16.gmra.mrb[12].mxu0 %v1458_v31  ;;  %774 = vmatmul.mubr.bf16.gmra.mrb[12].mxu1 %v1461_v32 }
  0x5f   : > { %677 = vmatprep.mubr.bf16.mxu0 %v1462_v33  ;;  %781 = vmatprep.mubr.bf16.mxu1 %v1465_v34 }
  0x66   : > { %678 = vmatmul.mubr.bf16.gmra.mrb[16].mxu0 %v1464_v35  ;;  %782 = vmatmul.mubr.bf16.gmra.mrb[16].mxu1 %v1467_v36 }
  0x67   : > { %685 = vmatprep.mubr.bf16.mxu0 %v1468_v37  ;;  %789 = vmatprep.mubr.bf16.mxu1 %v1471_v38 }
  0x6e   : > { %686 = vmatmul.mubr.bf16.gmra.mrb[20].mxu0 %v1470_v39  ;;  %790 = vmatmul.mubr.bf16.gmra.mrb[20].mxu1 %v1473_v40 }
  0x6f   : > { %693 = vmatprep.mubr.bf16.mxu0 %v1474_v41  ;;  %797 = vmatprep.mubr.bf16.mxu1 %v1477_v42 }
  0x76   : > { %694 = vmatmul.mubr.bf16.gmra.mrb[24].mxu0 %v1476_v43  ;;  %798 = vmatmul.mubr.bf16.gmra.mrb[24].mxu1 %v1479_v44 }
  0x77   : > { %701 = vmatprep.mubr.bf16.mxu0 %v1480_v45  ;;  %805 = vmatprep.mubr.bf16.mxu1 %v1483_v46 }
  0x7e   : > { %702 = vmatmul.mubr.bf16.gmra.mrb[28].mxu0 %v1482_v47  ;;  %806 = vmatmul.mubr.bf16.gmra.mrb[28].mxu1 %v1485_v48 }
  0x7f   : > { %709 = vmatprep.mubr.bf16.mxu0 %v1486_v49  ;;  %813 = vmatprep.mubr.bf16.mxu1 %v1489_v50 }
  0x86   : > { %710 = vmatmul.mubr.bf16.gmra.mrb[32].mxu0 %v1488_v51  ;;  %814 = vmatmul.mubr.bf16.gmra.mrb[32].mxu1 %v1491_v52 }
  0x87   : > { %717 = vmatprep.mubr.bf16.mxu0 %v1492_v53  ;;  %821 = vmatprep.mubr.bf16.mxu1 %v1495_v54 }
  0x8e   : > { %718 = vmatmul.mubr.bf16.gmra.mrb[36].mxu0 %v1494_v55  ;;  %822 = vmatmul.mubr.bf16.gmra.mrb[36].mxu1 %v1497_v56 }
  0x8f   : > { %725 = vmatprep.mubr.bf16.mxu0 %v1498_v57  ;;  %829 = vmatprep.mubr.bf16.mxu1 %v1501_v58 }
  0x96   : > { %726 = vmatmul.mubr.bf16.gmra.mrb[40].mxu0 %v1500_v59  ;;  %830 = vmatmul.mubr.bf16.gmra.mrb[40].mxu1 %v1503_v60 }
  0x97   : > { %733 = vmatprep.mubr.bf16.mxu0 %v1504_v61  ;;  %837 = vmatprep.mubr.bf16.mxu1 %v1507_v62 }
  0x9e   : > { %734 = vmatmul.mubr.bf16.gmra.mrb[44].mxu0 %v1506_v63  ;;  %838 = vmatmul.mubr.bf16.gmra.mrb[44].mxu1 %v1509_v0 }
  0x9f   : > { %741 = vmatprep.mubr.bf16.mxu0 %v1510_v1 }
  0xa6   : > { %742 = vmatmul.mubr.bf16.gmra.mrb[48].mxu0 %v1512_v2 }
 0x119   : > { %v647_v4 = vpop.f32.mrb[0].mxu0  ;;  %v751_v5 = vpop.f32.mrb[0].mxu1 }
 0x11a   : > { %v648_v6 = vadd.f32 %v1691_v3, %v647_v4  ;;  %v649_v7 = vpop.f32.mrb[1].mxu0  ;;  %v752_v8 = vadd.f32 %v1691_v3, %v751_v5  ;;  %v753_v9 = vpop.f32.mrb[1].mxu1 }
 0x11b   : > { %v650_v10 = vpop.f32.mrb[2].mxu0  ;;  %v754_v11 = vpop.f32.mrb[2].mxu1 }
 0x11c   : > { %v846_v12 = vmax.f32 %v648_v6, 0.0  ;;  %v651_v13 = vadd.f32 %v1691_v3, %v650_v10  ;;  %v652_v14 = vpop.f32.mrb[3].mxu0  ;;  %v872_v15 = vmax.f32 %v752_v8, 0.0  ;;  %v755_v16 = vadd.f32 %v1691_v3, %v754_v11  ;;  %v756_v17 = vpop.f32.mrb[3].mxu1 }
 0x11e   : > { %v1331_v18 = vpack.c.bf16 %v846_v12, %v846_v12  ;;  %v847_v19 = vmax.f32 %v651_v13, 0.0  ;;  %v1357_v20 = vpack.c.bf16 %v872_v15, %v872_v15  ;;  %v873_v21 = vmax.f32 %v755_v16, 0.0 }
 0x120   : > { %1097 = vst.msk [vmem:[%s1701_s16] sm:$0xf] %vm1096_vm0, %v1331_v18  ;;  %v1332_v22 = vpack.c.bf16 %v847_v19, %v847_v19  ;;  %1123 = vst.msk [vmem:[%s1701_s16 + $0x68] sm:$0xf] %vm1096_vm0, %v1357_v20  ;;  %v1358_v23 = vpack.c.bf16 %v873_v21, %v873_v21 }
 0x121   : > { %v655_v24 = vpop.f32.mrb[4].mxu0  ;;  %v759_v25 = vpop.f32.mrb[4].mxu1 }
 0x122   : > { %1098 = vst.msk [vmem:[%s1701_s16 + $0x4] sm:$0xf] %vm1096_vm0, %v1332_v22  ;;  %1124 = vst.msk [vmem:[%s1701_s16 + $0x6c] sm:$0xf] %vm1096_vm0, %v1358_v23  ;;  %v656_v26 = vadd.f32 %v1691_v3, %v655_v24  ;;  %v657_v27 = vpop.f32.mrb[5].mxu0  ;;  %v760_v28 = vadd.f32 %v1691_v3, %v759_v25  ;;  %v761_v29 = vpop.f32.mrb[5].mxu1 }
 0x123   : > { %v658_v30 = vpop.f32.mrb[6].mxu0  ;;  %v762_v31 = vpop.f32.mrb[6].mxu1 }
 0x124   : > { %v848_v32 = vmax.f32 %v656_v26, 0.0  ;;  %v659_v33 = vadd.f32 %v1691_v3, %v658_v30  ;;  %v660_v34 = vpop.f32.mrb[7].mxu0  ;;  %v874_v35 = vmax.f32 %v760_v28, 0.0  ;;  %v763_v36 = vadd.f32 %v1691_v3, %v762_v31  ;;  %v764_v37 = vpop.f32.mrb[7].mxu1 }
 0x126   : > { %v1333_v38 = vpack.c.bf16 %v848_v32, %v848_v32  ;;  %v849_v39 = vmax.f32 %v659_v33, 0.0  ;;  %v1359_v40 = vpack.c.bf16 %v874_v35, %v874_v35  ;;  %v875_v41 = vmax.f32 %v763_v36, 0.0 }
 0x128   : > { %1099 = vst.msk [vmem:[%s1701_s16 + $0x8] sm:$0xf] %vm1096_vm0, %v1333_v38  ;;  %v1334_v42 = vpack.c.bf16 %v849_v39, %v849_v39  ;;  %1125 = vst.msk [vmem:[%s1701_s16 + $0x70] sm:$0xf] %vm1096_vm0, %v1359_v40  ;;  %v1360_v43 = vpack.c.bf16 %v875_v41, %v875_v41 }
 0x129   : > { %v663_v44 = vpop.f32.mrb[8].mxu0  ;;  %v767_v45 = vpop.f32.mrb[8].mxu1 }
 0x12a   : > { %1100 = vst.msk [vmem:[%s1701_s16 + $0xc] sm:$0xf] %vm1096_vm0, %v1334_v42  ;;  %1126 = vst.msk [vmem:[%s1701_s16 + $0x74] sm:$0xf] %vm1096_vm0, %v1360_v43  ;;  %v664_v46 = vadd.f32 %v1691_v3, %v663_v44  ;;  %v665_v47 = vpop.f32.mrb[9].mxu0  ;;  %v768_v48 = vadd.f32 %v1691_v3, %v767_v45  ;;  %v769_v49 = vpop.f32.mrb[9].mxu1 }
 0x12b   : > { %v666_v50 = vpop.f32.mrb[10].mxu0  ;;  %v770_v51 = vpop.f32.mrb[10].mxu1 }
 0x12c   : > { %v850_v52 = vmax.f32 %v664_v46, 0.0  ;;  %v667_v53 = vadd.f32 %v1691_v3, %v666_v50  ;;  %v668_v54 = vpop.f32.mrb[11].mxu0  ;;  %v876_v55 = vmax.f32 %v768_v48, 0.0  ;;  %v771_v56 = vadd.f32 %v1691_v3, %v770_v51  ;;  %v772_v57 = vpop.f32.mrb[11].mxu1 }
 0x12e   : > { %v1335_v58 = vpack.c.bf16 %v850_v52, %v850_v52  ;;  %v851_v59 = vmax.f32 %v667_v53, 0.0  ;;  %v1361_v60 = vpack.c.bf16 %v876_v55, %v876_v55  ;;  %v877_v61 = vmax.f32 %v771_v56, 0.0 }
 0x130   : > { %1101 = vst.msk [vmem:[%s1701_s16 + $0x10] sm:$0xf] %vm1096_vm0, %v1335_v58  ;;  %v1336_v62 = vpack.c.bf16 %v851_v59, %v851_v59  ;;  %1127 = vst.msk [vmem:[%s1701_s16 + $0x78] sm:$0xf] %vm1096_vm0, %v1361_v60  ;;  %v1362_v63 = vpack.c.bf16 %v877_v61, %v877_v61 }
 0x131   : > { %v671_v0 = vpop.f32.mrb[12].mxu0  ;;  %v775_v1 = vpop.f32.mrb[12].mxu1 }
 0x132   : > { %1102 = vst.msk [vmem:[%s1701_s16 + $0x14] sm:$0xf] %vm1096_vm0, %v1336_v62  ;;  %1128 = vst.msk [vmem:[%s1701_s16 + $0x7c] sm:$0xf] %vm1096_vm0, %v1362_v63  ;;  %v672_v2 = vadd.f32 %v1691_v3, %v671_v0  ;;  %v673_v4 = vpop.f32.mrb[13].mxu0  ;;  %v776_v5 = vadd.f32 %v1691_v3, %v775_v1  ;;  %v777_v6 = vpop.f32.mrb[13].mxu1 }
 0x133   : > { %v674_v7 = vpop.f32.mrb[14].mxu0  ;;  %v778_v8 = vpop.f32.mrb[14].mxu1 }
 0x134   : > { %v852_v9 = vmax.f32 %v672_v2, 0.0  ;;  %v675_v10 = vadd.f32 %v1691_v3, %v674_v7  ;;  %v676_v11 = vpop.f32.mrb[15].mxu0  ;;  %v878_v12 = vmax.f32 %v776_v5, 0.0  ;;  %v779_v13 = vadd.f32 %v1691_v3, %v778_v8  ;;  %v780_v14 = vpop.f32.mrb[15].mxu1 }
 0x136   : > { %v1337_v15 = vpack.c.bf16 %v852_v9, %v852_v9  ;;  %v853_v16 = vmax.f32 %v675_v10, 0.0  ;;  %v1363_v17 = vpack.c.bf16 %v878_v12, %v878_v12  ;;  %v879_v18 = vmax.f32 %v779_v13, 0.0 }
 0x138   : > { %1103 = vst.msk [vmem:[%s1701_s16 + $0x18] sm:$0xf] %vm1096_vm0, %v1337_v15  ;;  %v1338_v19 = vpack.c.bf16 %v853_v16, %v853_v16  ;;  %1129 = vst.msk [vmem:[%s1701_s16 + $0x80] sm:$0xf] %vm1096_vm0, %v1363_v17  ;;  %v1364_v20 = vpack.c.bf16 %v879_v18, %v879_v18 }
 0x139   : > { %v679_v21 = vpop.f32.mrb[16].mxu0  ;;  %v783_v22 = vpop.f32.mrb[16].mxu1 }
 0x13a   : > { %1104 = vst.msk [vmem:[%s1701_s16 + $0x1c] sm:$0xf] %vm1096_vm0, %v1338_v19  ;;  %1130 = vst.msk [vmem:[%s1701_s16 + $0x84] sm:$0xf] %vm1096_vm0, %v1364_v20  ;;  %v680_v23 = vadd.f32 %v1691_v3, %v679_v21  ;;  %v681_v24 = vpop.f32.mrb[17].mxu0  ;;  %v784_v25 = vadd.f32 %v1691_v3, %v783_v22  ;;  %v785_v26 = vpop.f32.mrb[17].mxu1 }
 0x13b   : > { %v682_v27 = vpop.f32.mrb[18].mxu0  ;;  %v786_v28 = vpop.f32.mrb[18].mxu1 }
 0x13c   : > { %v854_v29 = vmax.f32 %v680_v23, 0.0  ;;  %v683_v30 = vadd.f32 %v1691_v3, %v682_v27  ;;  %v684_v31 = vpop.f32.mrb[19].mxu0  ;;  %v880_v32 = vmax.f32 %v784_v25, 0.0  ;;  %v787_v33 = vadd.f32 %v1691_v3, %v786_v28  ;;  %v788_v34 = vpop.f32.mrb[19].mxu1 }
 0x13e   : > { %v1339_v35 = vpack.c.bf16 %v854_v29, %v854_v29  ;;  %v855_v36 = vmax.f32 %v683_v30, 0.0  ;;  %v1365_v37 = vpack.c.bf16 %v880_v32, %v880_v32  ;;  %v881_v38 = vmax.f32 %v787_v33, 0.0 }
 0x140   : > { %1105 = vst.msk [vmem:[%s1701_s16 + $0x20] sm:$0xf] %vm1096_vm0, %v1339_v35  ;;  %v1340_v39 = vpack.c.bf16 %v855_v36, %v855_v36  ;;  %1131 = vst.msk [vmem:[%s1701_s16 + $0x88] sm:$0xf] %vm1096_vm0, %v1365_v37  ;;  %v1366_v40 = vpack.c.bf16 %v881_v38, %v881_v38 }
 0x141   : > { %v687_v41 = vpop.f32.mrb[20].mxu0  ;;  %v791_v42 = vpop.f32.mrb[20].mxu1 }
 0x142   : > { %1106 = vst.msk [vmem:[%s1701_s16 + $0x24] sm:$0xf] %vm1096_vm0, %v1340_v39  ;;  %1132 = vst.msk [vmem:[%s1701_s16 + $0x8c] sm:$0xf] %vm1096_vm0, %v1366_v40  ;;  %v688_v43 = vadd.f32 %v1691_v3, %v687_v41  ;;  %v689_v44 = vpop.f32.mrb[21].mxu0  ;;  %v792_v45 = vadd.f32 %v1691_v3, %v791_v42  ;;  %v793_v46 = vpop.f32.mrb[21].mxu1 }
 0x143   : > { %v690_v47 = vpop.f32.mrb[22].mxu0  ;;  %v794_v48 = vpop.f32.mrb[22].mxu1 }
 0x144   : > { %v856_v49 = vmax.f32 %v688_v43, 0.0  ;;  %v691_v50 = vadd.f32 %v1691_v3, %v690_v47  ;;  %v692_v51 = vpop.f32.mrb[23].mxu0  ;;  %v882_v52 = vmax.f32 %v792_v45, 0.0  ;;  %v795_v53 = vadd.f32 %v1691_v3, %v794_v48  ;;  %v796_v54 = vpop.f32.mrb[23].mxu1 }
 0x146   : > { %v1341_v55 = vpack.c.bf16 %v856_v49, %v856_v49  ;;  %v857_v56 = vmax.f32 %v691_v50, 0.0  ;;  %v1367_v57 = vpack.c.bf16 %v882_v52, %v882_v52  ;;  %v883_v58 = vmax.f32 %v795_v53, 0.0 }
 0x148   : > { %1107 = vst.msk [vmem:[%s1701_s16 + $0x28] sm:$0xf] %vm1096_vm0, %v1341_v55  ;;  %v1342_v59 = vpack.c.bf16 %v857_v56, %v857_v56  ;;  %1133 = vst.msk [vmem:[%s1701_s16 + $0x90] sm:$0xf] %vm1096_vm0, %v1367_v57  ;;  %v1368_v60 = vpack.c.bf16 %v883_v58, %v883_v58 }
 0x149   : > { %v695_v61 = vpop.f32.mrb[24].mxu0  ;;  %v799_v62 = vpop.f32.mrb[24].mxu1 }
 0x14a   : > { %1108 = vst.msk [vmem:[%s1701_s16 + $0x2c] sm:$0xf] %vm1096_vm0, %v1342_v59  ;;  %1134 = vst.msk [vmem:[%s1701_s16 + $0x94] sm:$0xf] %vm1096_vm0, %v1368_v60  ;;  %v696_v63 = vadd.f32 %v1691_v3, %v695_v61  ;;  %v697_v0 = vpop.f32.mrb[25].mxu0  ;;  %v800_v1 = vadd.f32 %v1691_v3, %v799_v62  ;;  %v801_v2 = vpop.f32.mrb[25].mxu1 }
 0x14b   : > { %v698_v4 = vpop.f32.mrb[26].mxu0  ;;  %v802_v5 = vpop.f32.mrb[26].mxu1 }
 0x14c   : > { %v858_v6 = vmax.f32 %v696_v63, 0.0  ;;  %v699_v7 = vadd.f32 %v1691_v3, %v698_v4  ;;  %v700_v8 = vpop.f32.mrb[27].mxu0  ;;  %v884_v9 = vmax.f32 %v800_v1, 0.0  ;;  %v803_v10 = vadd.f32 %v1691_v3, %v802_v5  ;;  %v804_v11 = vpop.f32.mrb[27].mxu1 }
 0x14e   : > { %v1343_v12 = vpack.c.bf16 %v858_v6, %v858_v6  ;;  %v859_v13 = vmax.f32 %v699_v7, 0.0  ;;  %v1369_v14 = vpack.c.bf16 %v884_v9, %v884_v9  ;;  %v885_v15 = vmax.f32 %v803_v10, 0.0 }
 0x150   : > { %1109 = vst.msk [vmem:[%s1701_s16 + $0x30] sm:$0xf] %vm1096_vm0, %v1343_v12  ;;  %v1344_v16 = vpack.c.bf16 %v859_v13, %v859_v13  ;;  %1135 = vst.msk [vmem:[%s1701_s16 + $0x98] sm:$0xf] %vm1096_vm0, %v1369_v14  ;;  %v1370_v17 = vpack.c.bf16 %v885_v15, %v885_v15 }
 0x151   : > { %v703_v18 = vpop.f32.mrb[28].mxu0  ;;  %v807_v19 = vpop.f32.mrb[28].mxu1 }
 0x152   : > { %1110 = vst.msk [vmem:[%s1701_s16 + $0x34] sm:$0xf] %vm1096_vm0, %v1344_v16  ;;  %1136 = vst.msk [vmem:[%s1701_s16 + $0x9c] sm:$0xf] %vm1096_vm0, %v1370_v17  ;;  %v704_v20 = vadd.f32 %v1691_v3, %v703_v18  ;;  %v705_v21 = vpop.f32.mrb[29].mxu0  ;;  %v808_v22 = vadd.f32 %v1691_v3, %v807_v19  ;;  %v809_v23 = vpop.f32.mrb[29].mxu1 }
 0x153   : > { %v706_v24 = vpop.f32.mrb[30].mxu0  ;;  %v810_v25 = vpop.f32.mrb[30].mxu1 }
 0x154   : > { %v860_v26 = vmax.f32 %v704_v20, 0.0  ;;  %v707_v27 = vadd.f32 %v1691_v3, %v706_v24  ;;  %v708_v28 = vpop.f32.mrb[31].mxu0  ;;  %v886_v29 = vmax.f32 %v808_v22, 0.0  ;;  %v811_v30 = vadd.f32 %v1691_v3, %v810_v25  ;;  %v812_v31 = vpop.f32.mrb[31].mxu1 }
 0x156   : > { %v1345_v32 = vpack.c.bf16 %v860_v26, %v860_v26  ;;  %v861_v33 = vmax.f32 %v707_v27, 0.0  ;;  %v1371_v34 = vpack.c.bf16 %v886_v29, %v886_v29  ;;  %v887_v35 = vmax.f32 %v811_v30, 0.0 }
 0x158   : > { %1111 = vst.msk [vmem:[%s1701_s16 + $0x38] sm:$0xf] %vm1096_vm0, %v1345_v32  ;;  %v1346_v36 = vpack.c.bf16 %v861_v33, %v861_v33  ;;  %1137 = vst.msk [vmem:[%s1701_s16 + $0xa0] sm:$0xf] %vm1096_vm0, %v1371_v34  ;;  %v1372_v37 = vpack.c.bf16 %v887_v35, %v887_v35 }
 0x159   : > { %v711_v38 = vpop.f32.mrb[32].mxu0  ;;  %v815_v39 = vpop.f32.mrb[32].mxu1 }
 0x15a   : > { %1112 = vst.msk [vmem:[%s1701_s16 + $0x3c] sm:$0xf] %vm1096_vm0, %v1346_v36  ;;  %1138 = vst.msk [vmem:[%s1701_s16 + $0xa4] sm:$0xf] %vm1096_vm0, %v1372_v37  ;;  %v712_v40 = vadd.f32 %v1691_v3, %v711_v38  ;;  %v713_v41 = vpop.f32.mrb[33].mxu0  ;;  %v816_v42 = vadd.f32 %v1691_v3, %v815_v39  ;;  %v817_v43 = vpop.f32.mrb[33].mxu1 }
 0x15b   : > { %v714_v44 = vpop.f32.mrb[34].mxu0  ;;  %v818_v45 = vpop.f32.mrb[34].mxu1 }
 0x15c   : > { %v862_v46 = vmax.f32 %v712_v40, 0.0  ;;  %v715_v47 = vadd.f32 %v1691_v3, %v714_v44  ;;  %v716_v48 = vpop.f32.mrb[35].mxu0  ;;  %v888_v49 = vmax.f32 %v816_v42, 0.0  ;;  %v819_v50 = vadd.f32 %v1691_v3, %v818_v45  ;;  %v820_v51 = vpop.f32.mrb[35].mxu1 }
 0x15e   : > { %v1347_v52 = vpack.c.bf16 %v862_v46, %v862_v46  ;;  %v863_v53 = vmax.f32 %v715_v47, 0.0  ;;  %v1373_v54 = vpack.c.bf16 %v888_v49, %v888_v49  ;;  %v889_v55 = vmax.f32 %v819_v50, 0.0 }
 0x160   : > { %1113 = vst.msk [vmem:[%s1701_s16 + $0x40] sm:$0xf] %vm1096_vm0, %v1347_v52  ;;  %v1348_v56 = vpack.c.bf16 %v863_v53, %v863_v53  ;;  %1139 = vst.msk [vmem:[%s1701_s16 + $0xa8] sm:$0xf] %vm1096_vm0, %v1373_v54  ;;  %v1374_v57 = vpack.c.bf16 %v889_v55, %v889_v55 }
 0x161   : > { %v719_v58 = vpop.f32.mrb[36].mxu0  ;;  %v823_v59 = vpop.f32.mrb[36].mxu1 }
 0x162   : > { %1114 = vst.msk [vmem:[%s1701_s16 + $0x44] sm:$0xf] %vm1096_vm0, %v1348_v56  ;;  %1140 = vst.msk [vmem:[%s1701_s16 + $0xac] sm:$0xf] %vm1096_vm0, %v1374_v57  ;;  %v720_v60 = vadd.f32 %v1691_v3, %v719_v58  ;;  %v721_v61 = vpop.f32.mrb[37].mxu0  ;;  %v824_v62 = vadd.f32 %v1691_v3, %v823_v59  ;;  %v825_v63 = vpop.f32.mrb[37].mxu1 }
 0x163   : > { %v722_v0 = vpop.f32.mrb[38].mxu0  ;;  %v826_v1 = vpop.f32.mrb[38].mxu1 }
 0x164   : > { %v864_v2 = vmax.f32 %v720_v60, 0.0  ;;  %v723_v4 = vadd.f32 %v1691_v3, %v722_v0  ;;  %v724_v5 = vpop.f32.mrb[39].mxu0  ;;  %v890_v6 = vmax.f32 %v824_v62, 0.0  ;;  %v827_v7 = vadd.f32 %v1691_v3, %v826_v1  ;;  %v828_v8 = vpop.f32.mrb[39].mxu1 }
 0x166   : > { %v1349_v9 = vpack.c.bf16 %v864_v2, %v864_v2  ;;  %v865_v10 = vmax.f32 %v723_v4, 0.0  ;;  %v1375_v11 = vpack.c.bf16 %v890_v6, %v890_v6  ;;  %v891_v12 = vmax.f32 %v827_v7, 0.0 }
 0x168   : > { %1115 = vst.msk [vmem:[%s1701_s16 + $0x48] sm:$0xf] %vm1096_vm0, %v1349_v9  ;;  %v1350_v13 = vpack.c.bf16 %v865_v10, %v865_v10  ;;  %1141 = vst.msk [vmem:[%s1701_s16 + $0xb0] sm:$0xf] %vm1096_vm0, %v1375_v11  ;;  %v1376_v14 = vpack.c.bf16 %v891_v12, %v891_v12 }
 0x169   : > { %v727_v15 = vpop.f32.mrb[40].mxu0  ;;  %v831_v16 = vpop.f32.mrb[40].mxu1 }
 0x16a   : > { %1116 = vst.msk [vmem:[%s1701_s16 + $0x4c] sm:$0xf] %vm1096_vm0, %v1350_v13  ;;  %1142 = vst.msk [vmem:[%s1701_s16 + $0xb4] sm:$0xf] %vm1096_vm0, %v1376_v14  ;;  %v728_v17 = vadd.f32 %v1691_v3, %v727_v15  ;;  %v729_v18 = vpop.f32.mrb[41].mxu0  ;;  %v832_v19 = vadd.f32 %v1691_v3, %v831_v16  ;;  %v833_v20 = vpop.f32.mrb[41].mxu1 }
 0x16b   : > { %v730_v21 = vpop.f32.mrb[42].mxu0  ;;  %v834_v22 = vpop.f32.mrb[42].mxu1 }
 0x16c   : > { %v866_v23 = vmax.f32 %v728_v17, 0.0  ;;  %v731_v24 = vadd.f32 %v1691_v3, %v730_v21  ;;  %v732_v25 = vpop.f32.mrb[43].mxu0  ;;  %v892_v26 = vmax.f32 %v832_v19, 0.0  ;;  %v835_v27 = vadd.f32 %v1691_v3, %v834_v22  ;;  %v836_v28 = vpop.f32.mrb[43].mxu1 }
 0x16e   : > { %v1351_v29 = vpack.c.bf16 %v866_v23, %v866_v23  ;;  %v867_v30 = vmax.f32 %v731_v24, 0.0  ;;  %v1377_v31 = vpack.c.bf16 %v892_v26, %v892_v26  ;;  %v893_v32 = vmax.f32 %v835_v27, 0.0 }
 0x170   : > { %1117 = vst.msk [vmem:[%s1701_s16 + $0x50] sm:$0xf] %vm1096_vm0, %v1351_v29  ;;  %v1352_v33 = vpack.c.bf16 %v867_v30, %v867_v30  ;;  %1143 = vst.msk [vmem:[%s1701_s16 + $0xb8] sm:$0xf] %vm1096_vm0, %v1377_v31  ;;  %v1378_v34 = vpack.c.bf16 %v893_v32, %v893_v32 }
 0x171   : > { %v735_v35 = vpop.f32.mrb[44].mxu0  ;;  %v839_v36 = vpop.f32.mrb[44].mxu1 }
 0x172   : > { %1118 = vst.msk [vmem:[%s1701_s16 + $0x54] sm:$0xf] %vm1096_vm0, %v1352_v33  ;;  %1144 = vst.msk [vmem:[%s1701_s16 + $0xbc] sm:$0xf] %vm1096_vm0, %v1378_v34  ;;  %v736_v37 = vadd.f32 %v1691_v3, %v735_v35  ;;  %v737_v38 = vpop.f32.mrb[45].mxu0  ;;  %v840_v39 = vadd.f32 %v1691_v3, %v839_v36  ;;  %v841_v40 = vpop.f32.mrb[45].mxu1 }
 0x173   : > { %v738_v41 = vpop.f32.mrb[46].mxu0  ;;  %v842_v42 = vpop.f32.mrb[46].mxu1 }
 0x174   : > { %v868_v43 = vmax.f32 %v736_v37, 0.0  ;;  %v739_v44 = vadd.f32 %v1691_v3, %v738_v41  ;;  %v740_v45 = vpop.f32.mrb[47].mxu0  ;;  %v894_v46 = vmax.f32 %v840_v39, 0.0  ;;  %v843_v47 = vadd.f32 %v1691_v3, %v842_v42  ;;  %v844_v48 = vpop.f32.mrb[47].mxu1 }
 0x176   : > { %v1353_v49 = vpack.c.bf16 %v868_v43, %v868_v43  ;;  %v869_v50 = vmax.f32 %v739_v44, 0.0  ;;  %v1379_v51 = vpack.c.bf16 %v894_v46, %v894_v46  ;;  %v895_v52 = vmax.f32 %v843_v47, 0.0 }
 0x178   : > { %1119 = vst.msk [vmem:[%s1701_s16 + $0x58] sm:$0xf] %vm1096_vm0, %v1353_v49  ;;  %v1354_v53 = vpack.c.bf16 %v869_v50, %v869_v50  ;;  %1145 = vst.msk [vmem:[%s1701_s16 + $0xc0] sm:$0xf] %vm1096_vm0, %v1379_v51  ;;  %v1380_v54 = vpack.c.bf16 %v895_v52, %v895_v52 }
 0x179   : > { %v743_v55 = vpop.f32.mrb[48].mxu0 }
 0x17a   : > { %1120 = vst.msk [vmem:[%s1701_s16 + $0x5c] sm:$0xf] %vm1096_vm0, %v1354_v53  ;;  %1146 = vst.msk [vmem:[%s1701_s16 + $0xc4] sm:$0xf] %vm1096_vm0, %v1380_v54  ;;  %v744_v56 = vadd.f32 %v1691_v3, %v743_v55  ;;  %v745_v57 = vpop.f32.mrb[49].mxu0 }
 0x17b   : > { %v746_v58 = vpop.f32.mrb[50].mxu0 }
 0x17c   : > { %v870_v59 = vmax.f32 %v744_v56, 0.0  ;;  %v747_v60 = vadd.f32 %v1691_v3, %v746_v58  ;;  %v748_v61 = vpop.f32.mrb[51].mxu0 }
 0x17e   : > { %v1355_v62 = vpack.c.bf16 %v870_v59, %v870_v59  ;;  %v871_v63 = vmax.f32 %v747_v60, 0.0 }
 0x180   : > { %1121 = vst.msk [vmem:[%s1701_s16 + $0x60] sm:$0xf] %vm1096_vm0, %v1355_v62  ;;  %v1356_v0 = vpack.c.bf16 %v871_v63, %v871_v63 }
 0x182   : > { %1122 = vst.msk [vmem:[%s1701_s16 + $0x64] sm:$0xf] %vm1096_vm0, %v1356_v0 }
 0x183 PF: > { %s13_s12 = sadd.s32 1, %s1519_s12  }
 0x184   : > { %p10_p4 = scmp.ge.s32.totalorder %s13_s12, 4  }
 0x186   :  { %12 = sbr.rel (!%p10_p4) target bundleno = 1 (0x1), region = 62 }

// kernel: ppo_atari_actor_forward.5
= control target key start
LH: loop header
LB: loop body
LE: loop exit
PB: predicated region body
PF: predicated region fallthrough
CT: control target
= control target key end

     0   :  { %vm880_vm0 = vcmask 519168   ;;  %vm901_vm1 = vcmask 516096   ;;  %s1637_s1 = inlined_call_operand.vmem [shape: bf16[512,64], index: 1, kind: input, shape index: {}]   ;;  %s1638_s0 = inlined_call_operand.vmem [shape: bf16[162,512], index: 0, kind: input, shape index: {}]   ;;  %s1639_s2 = inlined_call_operand.vmem [shape: f32[1,64], index: 2, kind: input, shape index: {}]   ;;  %s1640_s3 = inlined_call_operand.vmem [shape: bf16[162,64], index: 3, kind: output, shape index: {}]  }
   0x1   :  { %v1190_v0 = vld [vmem:[%s1637_s1 + $0x40] sm:$0xff]   ;;  %v1194_v4 = vld [vmem:[%s1637_s1 + $0x48] sm:$0xff]   ;;  %v1198_v8 = vld [vmem:[%s1637_s1 + $0x50] sm:$0xff]  }
   0x2   :  { %v1191_v1 = vld [vmem:[%s1637_s1 + $0xc0] sm:$0xff]   ;;  %1026 = vmatprep.subr.bf16.mxu0 %v1190_v0  ;;  %v1195_v5 = vld [vmem:[%s1637_s1 + $0xc8] sm:$0xff]   ;;  %v1199_v9 = vld [vmem:[%s1637_s1 + $0xd0] sm:$0xff]  }
   0x3   :  { %v1192_v2 = vld [vmem:[%s1637_s1] sm:$0xff]   ;;  %1108 = vmatprep.subr.bf16.mxu1 %v1191_v1  ;;  %v1196_v6 = vld [vmem:[%s1637_s1 + $0x8] sm:$0xff]   ;;  %v1200_v10 = vld [vmem:[%s1637_s1 + $0x10] sm:$0xff]  }
   0x4   :  { %v1193_v3 = vld [vmem:[%s1637_s1 + $0x80] sm:$0xff]   ;;  %1027 = vmatpush3.bf16.msra.mxu0 %v1192_v2  ;;  %v1197_v7 = vld [vmem:[%s1637_s1 + $0x88] sm:$0xff]   ;;  %v1201_v11 = vld [vmem:[%s1637_s1 + $0x90] sm:$0xff]  }
   0x5   :  { %1109 = vmatpush3.bf16.msra.mxu1 %v1193_v3  ;;  %1028 = vmatprep.subr.bf16.mxu0 %v1194_v4  ;;  %v1202_v12 = vld [vmem:[%s1637_s1 + $0x58] sm:$0xff]   ;;  %v1206_v16 = vld [vmem:[%s1637_s1 + $0x60] sm:$0xff]   ;;  %v1210_v20 = vld [vmem:[%s1637_s1 + $0x68] sm:$0xff]  }
   0x6   :  { %1110 = vmatprep.subr.bf16.mxu1 %v1195_v5  ;;  %v1203_v13 = vld [vmem:[%s1637_s1 + $0xd8] sm:$0xff]   ;;  %v1207_v17 = vld [vmem:[%s1637_s1 + $0xe0] sm:$0xff]   ;;  %v1211_v21 = vld [vmem:[%s1637_s1 + $0xe8] sm:$0xff]  }
   0x7   :  { %v1204_v14 = vld [vmem:[%s1637_s1 + $0x18] sm:$0xff]   ;;  %v1208_v18 = vld [vmem:[%s1637_s1 + $0x20] sm:$0xff]   ;;  %v1212_v22 = vld [vmem:[%s1637_s1 + $0x28] sm:$0xff]  }
   0x8   :  { %1029 = vmatpush3.bf16.msra.mxu0 %v1196_v6  ;;  %v1205_v15 = vld [vmem:[%s1637_s1 + $0x98] sm:$0xff]   ;;  %v1209_v19 = vld [vmem:[%s1637_s1 + $0xa0] sm:$0xff]   ;;  %v1213_v23 = vld [vmem:[%s1637_s1 + $0xa8] sm:$0xff]  }
   0x9   :  { %1111 = vmatpush3.bf16.msra.mxu1 %v1197_v7  ;;  %1030 = vmatprep.subr.bf16.mxu0 %v1198_v8  ;;  %v1214_v24 = vld [vmem:[%s1637_s1 + $0x70] sm:$0xff]   ;;  %v1218_v28 = vld [vmem:[%s1637_s1 + $0x78] sm:$0xff]   ;;  %v55_v6 = vld [vmem:[%s1638_s0 + $0x140] sm:$0x11] }
   0xa   :  { %1112 = vmatprep.subr.bf16.mxu1 %v1199_v9  ;;  %v1215_v25 = vld [vmem:[%s1637_s1 + $0xf0] sm:$0xff]   ;;  %v1219_v29 = vld [vmem:[%s1637_s1 + $0xf8] sm:$0xff]   ;;  %v56_v7 = vld [vmem:[%s1638_s0 + $0x148] sm:$0x11] }
   0xb   :  { %v1216_v26 = vld [vmem:[%s1637_s1 + $0x30] sm:$0xff]   ;;  %v1220_v30 = vld [vmem:[%s1637_s1 + $0x38] sm:$0xff]  }
   0xc   :  { %1031 = vmatpush3.bf16.msra.mxu0 %v1200_v10  ;;  %v1217_v27 = vld [vmem:[%s1637_s1 + $0xb0] sm:$0xff]   ;;  %v1221_v31 = vld [vmem:[%s1637_s1 + $0xb8] sm:$0xff]   ;;  %v949_v10 = vcombine.high %v55_v6, %v55_v6 }
   0xd   :  { %1113 = vmatpush3.bf16.msra.mxu1 %v1201_v11  ;;  %1032 = vmatprep.subr.bf16.mxu0 %v1202_v12  ;;  %v1222_v32 = vld [vmem:[%s1638_s0] ss:$16 sps:$4 sm:$0xff]   ;;  %v1224_v33 = vld [vmem:[%s1638_s0 + $0x4] ss:$16 sps:$4 sm:$0xff]   ;;  %v1225_v34 = vld [vmem:[%s1638_s0 + $0x8] ss:$16 sps:$4 sm:$0xff]   ;;  %v951_v11 = vcombine.high %v56_v7, %v56_v7  ;;  %v948_v12 = vcombine.low %v55_v6, %v55_v6 }
   0xe   :  { %1114 = vmatprep.subr.bf16.mxu1 %v1203_v13  ;;  %v1227_v35 = vld [vmem:[%s1638_s0 + $0xc] ss:$16 sps:$4 sm:$0xff]   ;;  %566 = vmatprep.mubr.bf16.mxu0 %v1224_v33  ;;  %v1228_v36 = vld [vmem:[%s1638_s0 + $0x24] ss:$16 sps:$4 sm:$0xff]   ;;  %v1232_v38 = vld [vmem:[%s1638_s0 + $0x20] ss:$16 sps:$4 sm:$0xff]   ;;  %v950_v13 = vcombine.low %v56_v7, %v56_v7 }
   0xf   :  { %686 = vmatprep.mubr.bf16.mxu1 %v1227_v35  ;;  %v1230_v37 = vld [vmem:[%s1638_s0 + $0x2c] ss:$16 sps:$4 sm:$0xff]   ;;  %v1233_v39 = vld [vmem:[%s1638_s0 + $0x28] ss:$16 sps:$4 sm:$0xff]   ;;  %v1234_v40 = vld [vmem:[%s1638_s0 + $0x44] ss:$16 sps:$4 sm:$0xff]  }
  0x10   :  { %1033 = vmatpush3.bf16.msra.mxu0 %v1204_v14  ;;  %v1236_v41 = vld [vmem:[%s1638_s0 + $0x4c] ss:$16 sps:$4 sm:$0xff]   ;;  %v1238_v42 = vld [vmem:[%s1638_s0 + $0x40] ss:$16 sps:$4 sm:$0xff]   ;;  %v1239_v43 = vld [vmem:[%s1638_s0 + $0x48] ss:$16 sps:$4 sm:$0xff]  }
  0x11   :  { %1115 = vmatpush3.bf16.msra.mxu1 %v1205_v15  ;;  %1034 = vmatprep.subr.bf16.mxu0 %v1206_v16  ;;  %v1240_v44 = vld [vmem:[%s1638_s0 + $0x64] ss:$16 sps:$4 sm:$0xff]   ;;  %v1242_v45 = vld [vmem:[%s1638_s0 + $0x6c] ss:$16 sps:$4 sm:$0xff]   ;;  %v1244_v46 = vld [vmem:[%s1638_s0 + $0x60] ss:$16 sps:$4 sm:$0xff]  }
  0x12   :  { %1116 = vmatprep.subr.bf16.mxu1 %v1207_v17  ;;  %v1245_v47 = vld [vmem:[%s1638_s0 + $0x68] ss:$16 sps:$4 sm:$0xff]   ;;  %v1246_v48 = vld [vmem:[%s1638_s0 + $0x84] ss:$16 sps:$4 sm:$0xff]   ;;  %v1248_v49 = vld [vmem:[%s1638_s0 + $0x8c] ss:$16 sps:$4 sm:$0xff]  }
  0x13   :  { %v1250_v50 = vld [vmem:[%s1638_s0 + $0x80] ss:$16 sps:$4 sm:$0xff]   ;;  %v1251_v51 = vld [vmem:[%s1638_s0 + $0x88] ss:$16 sps:$4 sm:$0xff]   ;;  %v1252_v52 = vld [vmem:[%s1638_s0 + $0xa4] ss:$16 sps:$4 sm:$0xff]  }
  0x14   :  { %1035 = vmatpush3.bf16.msra.mxu0 %v1208_v18  ;;  %v1254_v53 = vld [vmem:[%s1638_s0 + $0xac] ss:$16 sps:$4 sm:$0xff]   ;;  %v1256_v54 = vld [vmem:[%s1638_s0 + $0xa0] ss:$16 sps:$4 sm:$0xff]   ;;  %v1257_v55 = vld [vmem:[%s1638_s0 + $0xa8] ss:$16 sps:$4 sm:$0xff]  }
  0x15   :  { %1117 = vmatpush3.bf16.msra.mxu1 %v1209_v19  ;;  %1036 = vmatprep.subr.bf16.mxu0 %v1210_v20  ;;  %v1258_v56 = vld [vmem:[%s1638_s0 + $0xc4] ss:$16 sps:$4 sm:$0xff]   ;;  %v1260_v57 = vld [vmem:[%s1638_s0 + $0xcc] ss:$16 sps:$4 sm:$0xff]   ;;  %v1262_v58 = vld [vmem:[%s1638_s0 + $0xc0] ss:$16 sps:$4 sm:$0xff]  }
  0x16   :  { %1118 = vmatprep.subr.bf16.mxu1 %v1211_v21  ;;  %v1263_v59 = vld [vmem:[%s1638_s0 + $0xc8] ss:$16 sps:$4 sm:$0xff]   ;;  %v1264_v60 = vld [vmem:[%s1638_s0 + $0xe4] ss:$16 sps:$4 sm:$0xff]   ;;  %v1266_v61 = vld [vmem:[%s1638_s0 + $0xec] ss:$16 sps:$4 sm:$0xff]  }
  0x17   :  { %v1268_v62 = vld [vmem:[%s1638_s0 + $0xe0] ss:$16 sps:$4 sm:$0xff]   ;;  %v1269_v63 = vld [vmem:[%s1638_s0 + $0xe8] ss:$16 sps:$4 sm:$0xff]   ;;  %v1270_v0 = vld [vmem:[%s1638_s0 + $0x104] ss:$16 sps:$4 sm:$0xff]  }
  0x18   :  { %1037 = vmatpush3.bf16.msra.mxu0 %v1212_v22  ;;  %v1272_v1 = vld [vmem:[%s1638_s0 + $0x10c] ss:$16 sps:$4 sm:$0xff]   ;;  %v1274_v2 = vld [vmem:[%s1638_s0 + $0x100] ss:$16 sps:$4 sm:$0xff]   ;;  %v1275_v3 = vld [vmem:[%s1638_s0 + $0x108] ss:$16 sps:$4 sm:$0xff]  }
  0x19   :  { %1119 = vmatpush3.bf16.msra.mxu1 %v1213_v23  ;;  %1038 = vmatprep.subr.bf16.mxu0 %v1214_v24  ;;  %v1276_v4 = vld [vmem:[%s1638_s0 + $0x124] ss:$16 sps:$4 sm:$0xff]   ;;  %v1278_v5 = vld [vmem:[%s1638_s0 + $0x12c] ss:$16 sps:$4 sm:$0xff]   ;;  %v1280_v8 = vld [vmem:[%s1638_s0 + $0x120] ss:$16 sps:$4 sm:$0xff]  }
  0x1a   :  { %1120 = vmatprep.subr.bf16.mxu1 %v1215_v25  ;;  %v1281_v9 = vld [vmem:[%s1638_s0 + $0x128] ss:$16 sps:$4 sm:$0xff]   ;;  %v1531_v16 = vld [vmem:[%s1639_s2] ss:$0 sm:$0xff] }
  0x1c   :  { %1039 = vmatpush3.bf16.msra.mxu0 %v1216_v26 }
  0x1d   :  { %1121 = vmatpush3.bf16.msra.mxu1 %v1217_v27  ;;  %1040 = vmatprep.subr.bf16.mxu0 %v1218_v28 }
  0x1e   :  { %1122 = vmatprep.subr.bf16.mxu1 %v1219_v29 }
  0x20   :  { %1041 = vmatpush3.bf16.msra.mxu0 %v1220_v30 }
  0x21   :  { %1123 = vmatpush3.bf16.msra.mxu1 %v1221_v31 }
  0x23   :  { %567 = vmatmul.mubr.bf16.vlgmr.msra.gmra.mrb[0].mxu0 %v1222_v32 }
  0x24   :  { %687 = vmatmul.mubr.bf16.vlgmr.msra.gmra.mrb[0].mxu1 %v1225_v34  ;;  %574 = vmatprep.mubr.bf16.mxu0 %v1228_v36 }
  0x25   :  { %694 = vmatprep.mubr.bf16.mxu1 %v1230_v37 }
  0x2b   :  { %575 = vmatmul.mubr.bf16.gmra.mrb[4].mxu0 %v1232_v38 }
  0x2c   :  { %695 = vmatmul.mubr.bf16.gmra.mrb[4].mxu1 %v1233_v39  ;;  %582 = vmatprep.mubr.bf16.mxu0 %v1234_v40 }
  0x2d   :  { %702 = vmatprep.mubr.bf16.mxu1 %v1236_v41 }
  0x33   :  { %583 = vmatmul.mubr.bf16.gmra.mrb[8].mxu0 %v1238_v42 }
  0x34   :  { %703 = vmatmul.mubr.bf16.gmra.mrb[8].mxu1 %v1239_v43  ;;  %590 = vmatprep.mubr.bf16.mxu0 %v1240_v44 }
  0x35   :  { %710 = vmatprep.mubr.bf16.mxu1 %v1242_v45 }
  0x3b   :  { %591 = vmatmul.mubr.bf16.gmra.mrb[12].mxu0 %v1244_v46 }
  0x3c   :  { %711 = vmatmul.mubr.bf16.gmra.mrb[12].mxu1 %v1245_v47  ;;  %598 = vmatprep.mubr.bf16.mxu0 %v1246_v48 }
  0x3d   :  { %718 = vmatprep.mubr.bf16.mxu1 %v1248_v49 }
  0x43   :  { %599 = vmatmul.mubr.bf16.gmra.mrb[16].mxu0 %v1250_v50 }
  0x44   :  { %719 = vmatmul.mubr.bf16.gmra.mrb[16].mxu1 %v1251_v51  ;;  %606 = vmatprep.mubr.bf16.mxu0 %v1252_v52 }
  0x45   :  { %726 = vmatprep.mubr.bf16.mxu1 %v1254_v53 }
  0x4b   :  { %607 = vmatmul.mubr.bf16.gmra.mrb[20].mxu0 %v1256_v54 }
  0x4c   :  { %727 = vmatmul.mubr.bf16.gmra.mrb[20].mxu1 %v1257_v55  ;;  %614 = vmatprep.mubr.bf16.mxu0 %v1258_v56 }
  0x4d   :  { %734 = vmatprep.mubr.bf16.mxu1 %v1260_v57 }
  0x53   :  { %615 = vmatmul.mubr.bf16.gmra.mrb[24].mxu0 %v1262_v58 }
  0x54   :  { %735 = vmatmul.mubr.bf16.gmra.mrb[24].mxu1 %v1263_v59  ;;  %622 = vmatprep.mubr.bf16.mxu0 %v1264_v60 }
  0x55   :  { %742 = vmatprep.mubr.bf16.mxu1 %v1266_v61 }
  0x5b   :  { %623 = vmatmul.mubr.bf16.gmra.mrb[28].mxu0 %v1268_v62 }
  0x5c   :  { %743 = vmatmul.mubr.bf16.gmra.mrb[28].mxu1 %v1269_v63  ;;  %630 = vmatprep.mubr.bf16.mxu0 %v1270_v0 }
  0x5d   :  { %750 = vmatprep.mubr.bf16.mxu1 %v1272_v1 }
  0x63   :  { %631 = vmatmul.mubr.bf16.gmra.mrb[32].mxu0 %v1274_v2 }
  0x64   :  { %751 = vmatmul.mubr.bf16.gmra.mrb[32].mxu1 %v1275_v3  ;;  %638 = vmatprep.mubr.bf16.mxu0 %v1276_v4 }
  0x65   :  { %758 = vmatprep.mubr.bf16.mxu1 %v1278_v5 }
  0x6b   :  { %639 = vmatmul.mubr.bf16.gmra.mrb[36].mxu0 %v1280_v8 }
  0x6c   :  { %759 = vmatmul.mubr.bf16.gmra.mrb[36].mxu1 %v1281_v9  ;;  %646 = vmatprep.mubr.bf16.mxu0 %v949_v10 }
  0x6d   :  { %766 = vmatprep.mubr.bf16.mxu1 %v951_v11 }
  0x73   :  { %647 = vmatmul.mubr.bf16.gmra.mrb[40].mxu0 %v948_v12 }
  0x74   :  { %767 = vmatmul.mubr.bf16.gmra.mrb[40].mxu1 %v950_v13 }
  0xf6   :  { %v1042_v14 = vpop.f32.mrb[0].mxu0 }
  0xf7   :  { %v1124_v15 = vpop.f32.mrb[0].mxu1  ;;  %v1043_v17 = vpop.f32.mrb[1].mxu0 }
  0xf8   :  { %v1044_v18 = vadd.f32 %v1043_v17, %v1042_v14  ;;  %v1125_v19 = vpop.f32.mrb[1].mxu1  ;;  %v1045_v20 = vpop.f32.mrb[2].mxu0 }
  0xf9   :  { %v1126_v21 = vadd.f32 %v1125_v19, %v1124_v15  ;;  %v1127_v22 = vpop.f32.mrb[2].mxu1  ;;  %v1046_v23 = vpop.f32.mrb[3].mxu0 }
  0xfa   :  { %v569_v24 = vadd.f32 %v1044_v18, %v1531_v16  ;;  %v1047_v25 = vadd.f32 %v1046_v23, %v1045_v20  ;;  %v1128_v26 = vpop.f32.mrb[3].mxu1 }
  0xfb   :  { %v1129_v27 = vadd.f32 %v1128_v26, %v1127_v22 }
  0xfc   :  { %v689_v28 = vadd.f32 %v1126_v21, %v569_v24  ;;  %v572_v29 = vadd.f32 %v1047_v25, %v1531_v16 }
  0xfe   :  { %v774_v30 = vmax.f32 %v689_v28, 0.0  ;;  %v692_v31 = vadd.f32 %v1129_v27, %v572_v29  ;;  %v1048_v32 = vpop.f32.mrb[4].mxu0 }
  0xff   :  { %v1130_v33 = vpop.f32.mrb[4].mxu1  ;;  %v1049_v34 = vpop.f32.mrb[5].mxu0 }
 0x100   :  { %v1005_v35 = vpack.c.bf16 %v774_v30, %v774_v30  ;;  %v775_v36 = vmax.f32 %v692_v31, 0.0  ;;  %v1050_v37 = vadd.f32 %v1049_v34, %v1048_v32  ;;  %v1131_v38 = vpop.f32.mrb[5].mxu1  ;;  %v1051_v39 = vpop.f32.mrb[6].mxu0 }
 0x101   :  { %v1132_v40 = vadd.f32 %v1131_v38, %v1130_v33  ;;  %v1133_v41 = vpop.f32.mrb[6].mxu1  ;;  %v1052_v42 = vpop.f32.mrb[7].mxu0 }
 0x102   :  { %881 = vst.msk [vmem:[%s1640_s3] sm:$0xf] %vm880_vm0, %v1005_v35  ;;  %v1006_v43 = vpack.c.bf16 %v775_v36, %v775_v36  ;;  %v577_v44 = vadd.f32 %v1050_v37, %v1531_v16  ;;  %v1053_v45 = vadd.f32 %v1052_v42, %v1051_v39  ;;  %v1134_v46 = vpop.f32.mrb[7].mxu1 }
 0x103   :  { %v1135_v47 = vadd.f32 %v1134_v46, %v1133_v41 }
 0x104   :  { %882 = vst.msk [vmem:[%s1640_s3 + $0x4] sm:$0xf] %vm880_vm0, %v1006_v43  ;;  %v697_v48 = vadd.f32 %v1132_v40, %v577_v44  ;;  %v580_v49 = vadd.f32 %v1053_v45, %v1531_v16 }
 0x106   :  { %v776_v50 = vmax.f32 %v697_v48, 0.0  ;;  %v700_v51 = vadd.f32 %v1135_v47, %v580_v49  ;;  %v1054_v52 = vpop.f32.mrb[8].mxu0 }
 0x107   :  { %v1136_v53 = vpop.f32.mrb[8].mxu1  ;;  %v1055_v54 = vpop.f32.mrb[9].mxu0 }
 0x108   :  { %v1007_v55 = vpack.c.bf16 %v776_v50, %v776_v50  ;;  %v777_v56 = vmax.f32 %v700_v51, 0.0  ;;  %v1056_v57 = vadd.f32 %v1055_v54, %v1054_v52  ;;  %v1137_v58 = vpop.f32.mrb[9].mxu1  ;;  %v1057_v59 = vpop.f32.mrb[10].mxu0 }
 0x109   :  { %v1138_v60 = vadd.f32 %v1137_v58, %v1136_v53  ;;  %v1139_v61 = vpop.f32.mrb[10].mxu1  ;;  %v1058_v62 = vpop.f32.mrb[11].mxu0 }
 0x10a   :  { %883 = vst.msk [vmem:[%s1640_s3 + $0x8] sm:$0xf] %vm880_vm0, %v1007_v55  ;;  %v1008_v63 = vpack.c.bf16 %v777_v56, %v777_v56  ;;  %v585_v0 = vadd.f32 %v1056_v57, %v1531_v16  ;;  %v1059_v1 = vadd.f32 %v1058_v62, %v1057_v59  ;;  %v1140_v2 = vpop.f32.mrb[11].mxu1 }
 0x10b   :  { %v1141_v3 = vadd.f32 %v1140_v2, %v1139_v61 }
 0x10c   :  { %884 = vst.msk [vmem:[%s1640_s3 + $0xc] sm:$0xf] %vm880_vm0, %v1008_v63  ;;  %v705_v4 = vadd.f32 %v1138_v60, %v585_v0  ;;  %v588_v5 = vadd.f32 %v1059_v1, %v1531_v16 }
 0x10e   :  { %v778_v6 = vmax.f32 %v705_v4, 0.0  ;;  %v708_v7 = vadd.f32 %v1141_v3, %v588_v5  ;;  %v1060_v8 = vpop.f32.mrb[12].mxu0 }
 0x10f   :  { %v1142_v9 = vpop.f32.mrb[12].mxu1  ;;  %v1061_v10 = vpop.f32.mrb[13].mxu0 }
 0x110   :  { %v1009_v11 = vpack.c.bf16 %v778_v6, %v778_v6  ;;  %v779_v12 = vmax.f32 %v708_v7, 0.0  ;;  %v1062_v13 = vadd.f32 %v1061_v10, %v1060_v8  ;;  %v1143_v14 = vpop.f32.mrb[13].mxu1  ;;  %v1063_v15 = vpop.f32.mrb[14].mxu0 }
 0x111   :  { %v1144_v17 = vadd.f32 %v1143_v14, %v1142_v9  ;;  %v1145_v18 = vpop.f32.mrb[14].mxu1  ;;  %v1064_v19 = vpop.f32.mrb[15].mxu0 }
 0x112   :  { %885 = vst.msk [vmem:[%s1640_s3 + $0x10] sm:$0xf] %vm880_vm0, %v1009_v11  ;;  %v1010_v20 = vpack.c.bf16 %v779_v12, %v779_v12  ;;  %v593_v21 = vadd.f32 %v1062_v13, %v1531_v16  ;;  %v1065_v22 = vadd.f32 %v1064_v19, %v1063_v15  ;;  %v1146_v23 = vpop.f32.mrb[15].mxu1 }
 0x113   :  { %v1147_v24 = vadd.f32 %v1146_v23, %v1145_v18 }
 0x114   :  { %886 = vst.msk [vmem:[%s1640_s3 + $0x14] sm:$0xf] %vm880_vm0, %v1010_v20  ;;  %v713_v25 = vadd.f32 %v1144_v17, %v593_v21  ;;  %v596_v26 = vadd.f32 %v1065_v22, %v1531_v16 }
 0x116   :  { %v780_v27 = vmax.f32 %v713_v25, 0.0  ;;  %v716_v28 = vadd.f32 %v1147_v24, %v596_v26  ;;  %v1066_v29 = vpop.f32.mrb[16].mxu0 }
 0x117   :  { %v1148_v30 = vpop.f32.mrb[16].mxu1  ;;  %v1067_v31 = vpop.f32.mrb[17].mxu0 }
 0x118   :  { %v1011_v32 = vpack.c.bf16 %v780_v27, %v780_v27  ;;  %v781_v33 = vmax.f32 %v716_v28, 0.0  ;;  %v1068_v34 = vadd.f32 %v1067_v31, %v1066_v29  ;;  %v1149_v35 = vpop.f32.mrb[17].mxu1  ;;  %v1069_v36 = vpop.f32.mrb[18].mxu0 }
 0x119   :  { %v1150_v37 = vadd.f32 %v1149_v35, %v1148_v30  ;;  %v1151_v38 = vpop.f32.mrb[18].mxu1  ;;  %v1070_v39 = vpop.f32.mrb[19].mxu0 }
 0x11a   :  { %887 = vst.msk [vmem:[%s1640_s3 + $0x18] sm:$0xf] %vm880_vm0, %v1011_v32  ;;  %v1012_v40 = vpack.c.bf16 %v781_v33, %v781_v33  ;;  %v601_v41 = vadd.f32 %v1068_v34, %v1531_v16  ;;  %v1071_v42 = vadd.f32 %v1070_v39, %v1069_v36  ;;  %v1152_v43 = vpop.f32.mrb[19].mxu1 }
 0x11b   :  { %v1153_v44 = vadd.f32 %v1152_v43, %v1151_v38 }
 0x11c   :  { %888 = vst.msk [vmem:[%s1640_s3 + $0x1c] sm:$0xf] %vm880_vm0, %v1012_v40  ;;  %v721_v45 = vadd.f32 %v1150_v37, %v601_v41  ;;  %v604_v46 = vadd.f32 %v1071_v42, %v1531_v16 }
 0x11e   :  { %v782_v47 = vmax.f32 %v721_v45, 0.0  ;;  %v724_v48 = vadd.f32 %v1153_v44, %v604_v46  ;;  %v1072_v49 = vpop.f32.mrb[20].mxu0 }
 0x11f   :  { %v1154_v50 = vpop.f32.mrb[20].mxu1  ;;  %v1073_v51 = vpop.f32.mrb[21].mxu0 }
 0x120   :  { %v1013_v52 = vpack.c.bf16 %v782_v47, %v782_v47  ;;  %v783_v53 = vmax.f32 %v724_v48, 0.0  ;;  %v1074_v54 = vadd.f32 %v1073_v51, %v1072_v49  ;;  %v1155_v55 = vpop.f32.mrb[21].mxu1  ;;  %v1075_v56 = vpop.f32.mrb[22].mxu0 }
 0x121   :  { %v1156_v57 = vadd.f32 %v1155_v55, %v1154_v50  ;;  %v1157_v58 = vpop.f32.mrb[22].mxu1  ;;  %v1076_v59 = vpop.f32.mrb[23].mxu0 }
 0x122   :  { %889 = vst.msk [vmem:[%s1640_s3 + $0x20] sm:$0xf] %vm880_vm0, %v1013_v52  ;;  %v1014_v60 = vpack.c.bf16 %v783_v53, %v783_v53  ;;  %v609_v61 = vadd.f32 %v1074_v54, %v1531_v16  ;;  %v1077_v62 = vadd.f32 %v1076_v59, %v1075_v56  ;;  %v1158_v63 = vpop.f32.mrb[23].mxu1 }
 0x123   :  { %v1159_v0 = vadd.f32 %v1158_v63, %v1157_v58 }
 0x124   :  { %890 = vst.msk [vmem:[%s1640_s3 + $0x24] sm:$0xf] %vm880_vm0, %v1014_v60  ;;  %v729_v1 = vadd.f32 %v1156_v57, %v609_v61  ;;  %v612_v2 = vadd.f32 %v1077_v62, %v1531_v16 }
 0x126   :  { %v784_v3 = vmax.f32 %v729_v1, 0.0  ;;  %v732_v4 = vadd.f32 %v1159_v0, %v612_v2  ;;  %v1078_v5 = vpop.f32.mrb[24].mxu0 }
 0x127   :  { %v1160_v6 = vpop.f32.mrb[24].mxu1  ;;  %v1079_v7 = vpop.f32.mrb[25].mxu0 }
 0x128   :  { %v1015_v8 = vpack.c.bf16 %v784_v3, %v784_v3  ;;  %v785_v9 = vmax.f32 %v732_v4, 0.0  ;;  %v1080_v10 = vadd.f32 %v1079_v7, %v1078_v5  ;;  %v1161_v11 = vpop.f32.mrb[25].mxu1  ;;  %v1081_v12 = vpop.f32.mrb[26].mxu0 }
 0x129   :  { %v1162_v13 = vadd.f32 %v1161_v11, %v1160_v6  ;;  %v1163_v14 = vpop.f32.mrb[26].mxu1  ;;  %v1082_v15 = vpop.f32.mrb[27].mxu0 }
 0x12a   :  { %891 = vst.msk [vmem:[%s1640_s3 + $0x28] sm:$0xf] %vm880_vm0, %v1015_v8  ;;  %v1016_v17 = vpack.c.bf16 %v785_v9, %v785_v9  ;;  %v617_v18 = vadd.f32 %v1080_v10, %v1531_v16  ;;  %v1083_v19 = vadd.f32 %v1082_v15, %v1081_v12  ;;  %v1164_v20 = vpop.f32.mrb[27].mxu1 }
 0x12b   :  { %v1165_v21 = vadd.f32 %v1164_v20, %v1163_v14 }
 0x12c   :  { %892 = vst.msk [vmem:[%s1640_s3 + $0x2c] sm:$0xf] %vm880_vm0, %v1016_v17  ;;  %v737_v22 = vadd.f32 %v1162_v13, %v617_v18  ;;  %v620_v23 = vadd.f32 %v1083_v19, %v1531_v16 }
 0x12e   :  { %v786_v24 = vmax.f32 %v737_v22, 0.0  ;;  %v740_v25 = vadd.f32 %v1165_v21, %v620_v23  ;;  %v1084_v26 = vpop.f32.mrb[28].mxu0 }
 0x12f   :  { %v1166_v27 = vpop.f32.mrb[28].mxu1  ;;  %v1085_v28 = vpop.f32.mrb[29].mxu0 }
 0x130   :  { %v1017_v29 = vpack.c.bf16 %v786_v24, %v786_v24  ;;  %v787_v30 = vmax.f32 %v740_v25, 0.0  ;;  %v1086_v31 = vadd.f32 %v1085_v28, %v1084_v26  ;;  %v1167_v32 = vpop.f32.mrb[29].mxu1  ;;  %v1087_v33 = vpop.f32.mrb[30].mxu0 }
 0x131   :  { %v1168_v34 = vadd.f32 %v1167_v32, %v1166_v27  ;;  %v1169_v35 = vpop.f32.mrb[30].mxu1  ;;  %v1088_v36 = vpop.f32.mrb[31].mxu0 }
 0x132   :  { %893 = vst.msk [vmem:[%s1640_s3 + $0x30] sm:$0xf] %vm880_vm0, %v1017_v29  ;;  %v1018_v37 = vpack.c.bf16 %v787_v30, %v787_v30  ;;  %v625_v38 = vadd.f32 %v1086_v31, %v1531_v16  ;;  %v1089_v39 = vadd.f32 %v1088_v36, %v1087_v33  ;;  %v1170_v40 = vpop.f32.mrb[31].mxu1 }
 0x133   :  { %v1171_v41 = vadd.f32 %v1170_v40, %v1169_v35 }
 0x134   :  { %894 = vst.msk [vmem:[%s1640_s3 + $0x34] sm:$0xf] %vm880_vm0, %v1018_v37  ;;  %v745_v42 = vadd.f32 %v1168_v34, %v625_v38  ;;  %v628_v43 = vadd.f32 %v1089_v39, %v1531_v16 }
 0x136   :  { %v788_v44 = vmax.f32 %v745_v42, 0.0  ;;  %v748_v45 = vadd.f32 %v1171_v41, %v628_v43  ;;  %v1090_v46 = vpop.f32.mrb[32].mxu0 }
 0x137   :  { %v1172_v47 = vpop.f32.mrb[32].mxu1  ;;  %v1091_v48 = vpop.f32.mrb[33].mxu0 }
 0x138   :  { %v1019_v49 = vpack.c.bf16 %v788_v44, %v788_v44  ;;  %v789_v50 = vmax.f32 %v748_v45, 0.0  ;;  %v1092_v51 = vadd.f32 %v1091_v48, %v1090_v46  ;;  %v1173_v52 = vpop.f32.mrb[33].mxu1  ;;  %v1093_v53 = vpop.f32.mrb[34].mxu0 }
 0x139   :  { %v1174_v54 = vadd.f32 %v1173_v52, %v1172_v47  ;;  %v1175_v55 = vpop.f32.mrb[34].mxu1  ;;  %v1094_v56 = vpop.f32.mrb[35].mxu0 }
 0x13a   :  { %895 = vst.msk [vmem:[%s1640_s3 + $0x38] sm:$0xf] %vm880_vm0, %v1019_v49  ;;  %v1020_v57 = vpack.c.bf16 %v789_v50, %v789_v50  ;;  %v633_v58 = vadd.f32 %v1092_v51, %v1531_v16  ;;  %v1095_v59 = vadd.f32 %v1094_v56, %v1093_v53  ;;  %v1176_v60 = vpop.f32.mrb[35].mxu1 }
 0x13b   :  { %v1177_v61 = vadd.f32 %v1176_v60, %v1175_v55 }
 0x13c   :  { %896 = vst.msk [vmem:[%s1640_s3 + $0x3c] sm:$0xf] %vm880_vm0, %v1020_v57  ;;  %v753_v62 = vadd.f32 %v1174_v54, %v633_v58  ;;  %v636_v63 = vadd.f32 %v1095_v59, %v1531_v16 }
 0x13e   :  { %v790_v0 = vmax.f32 %v753_v62, 0.0  ;;  %v756_v1 = vadd.f32 %v1177_v61, %v636_v63  ;;  %v1096_v2 = vpop.f32.mrb[36].mxu0 }
 0x13f   :  { %v1178_v3 = vpop.f32.mrb[36].mxu1  ;;  %v1097_v4 = vpop.f32.mrb[37].mxu0 }
 0x140   :  { %v1021_v5 = vpack.c.bf16 %v790_v0, %v790_v0  ;;  %v791_v6 = vmax.f32 %v756_v1, 0.0  ;;  %v1098_v7 = vadd.f32 %v1097_v4, %v1096_v2  ;;  %v1179_v8 = vpop.f32.mrb[37].mxu1  ;;  %v1099_v9 = vpop.f32.mrb[38].mxu0 }
 0x141   :  { %v1180_v10 = vadd.f32 %v1179_v8, %v1178_v3  ;;  %v1181_v11 = vpop.f32.mrb[38].mxu1  ;;  %v1100_v12 = vpop.f32.mrb[39].mxu0 }
 0x142   :  { %897 = vst.msk [vmem:[%s1640_s3 + $0x40] sm:$0xf] %vm880_vm0, %v1021_v5  ;;  %v1022_v13 = vpack.c.bf16 %v791_v6, %v791_v6  ;;  %v641_v14 = vadd.f32 %v1098_v7, %v1531_v16  ;;  %v1101_v15 = vadd.f32 %v1100_v12, %v1099_v9  ;;  %v1182_v17 = vpop.f32.mrb[39].mxu1 }
 0x143   :  { %v1183_v18 = vadd.f32 %v1182_v17, %v1181_v11 }
 0x144   :  { %898 = vst.msk [vmem:[%s1640_s3 + $0x44] sm:$0xf] %vm880_vm0, %v1022_v13  ;;  %v761_v19 = vadd.f32 %v1180_v10, %v641_v14  ;;  %v644_v20 = vadd.f32 %v1101_v15, %v1531_v16 }
 0x146   :  { %v792_v21 = vmax.f32 %v761_v19, 0.0  ;;  %v764_v22 = vadd.f32 %v1183_v18, %v644_v20  ;;  %v1102_v23 = vpop.f32.mrb[40].mxu0 }
 0x147   :  { %v1184_v24 = vpop.f32.mrb[40].mxu1  ;;  %v1103_v25 = vpop.f32.mrb[41].mxu0 }
 0x148   :  { %v1023_v26 = vpack.c.bf16 %v792_v21, %v792_v21  ;;  %v793_v27 = vmax.f32 %v764_v22, 0.0  ;;  %v1104_v28 = vadd.f32 %v1103_v25, %v1102_v23  ;;  %v1185_v29 = vpop.f32.mrb[41].mxu1  ;;  %v1105_v30 = vpop.f32.mrb[42].mxu0 }
 0x149   :  { %v1186_v31 = vadd.f32 %v1185_v29, %v1184_v24  ;;  %v1187_v32 = vpop.f32.mrb[42].mxu1  ;;  %v1106_v33 = vpop.f32.mrb[43].mxu0 }
 0x14a   :  { %899 = vst.msk [vmem:[%s1640_s3 + $0x48] sm:$0xf] %vm880_vm0, %v1023_v26  ;;  %v1024_v34 = vpack.c.bf16 %v793_v27, %v793_v27  ;;  %v649_v35 = vadd.f32 %v1104_v28, %v1531_v16  ;;  %v1188_v36 = vpop.f32.mrb[43].mxu1 }
 0x14c   :  { %900 = vst.msk [vmem:[%s1640_s3 + $0x4c] sm:$0xf] %vm880_vm0, %v1024_v34  ;;  %v769_v37 = vadd.f32 %v1186_v31, %v649_v35 }
 0x14e   :  { %v794_v38 = vmax.f32 %v769_v37, 0.0 }
 0x150   :  { %v1025_v39 = vpack.c.bf16 %v794_v38, %v794_v38 }
 0x152   :  { %902 = vst.msk [vmem:[%s1640_s3 + $0x50] sm:$0x1] %vm901_vm1, %v1025_v39 }

// kernel: ppo_atari_actor_forward.6
= control target key start
LH: loop header
LB: loop body
LE: loop exit
PB: predicated region body
PF: predicated region fallthrough
CT: control target
= control target key end

     0   :  { %v1248_v34 = vmov 0.0   ;;  %vm1249_vm0 = vmmov 0   ;;  %vm516_vm1 = vcmask 523264   ;;  %vm868_vm2 = vcmask 519168   ;;  %s1599_s1 = inlined_call_operand.vmem [shape: bf16[576,64], index: 1, kind: input, shape index: {}]   ;;  %s1600_s0 = inlined_call_operand.vmem [shape: bf16[98,576], index: 0, kind: input, shape index: {}]   ;;  %s1601_s2 = inlined_call_operand.vmem [shape: f32[1,64], index: 2, kind: input, shape index: {}]   ;;  %s1602_s3 = inlined_call_operand.vmem [shape: bf16[98,64], index: 3, kind: output, shape index: {}]  }
   0x1   :  { %v1165_v0 = vld [vmem:[%s1599_s1 + $0x40] sm:$0xff]   ;;  %v1169_v4 = vld [vmem:[%s1599_s1 + $0x48] sm:$0xff]   ;;  %v1173_v8 = vld [vmem:[%s1599_s1 + $0x50] sm:$0xff]   ;;  %vm881_vm3 = vcmask 516096  }
   0x2   :  { %v1166_v1 = vld [vmem:[%s1599_s1 + $0xc0] sm:$0xff]   ;;  %992 = vmatprep.subr.bf16.mxu0 %v1165_v0  ;;  %v1170_v5 = vld [vmem:[%s1599_s1 + $0xc8] sm:$0xff]   ;;  %v1174_v9 = vld [vmem:[%s1599_s1 + $0xd0] sm:$0xff]  }
   0x3   :  { %v1167_v2 = vld [vmem:[%s1599_s1] sm:$0xff]   ;;  %1050 = vmatprep.subr.bf16.mxu1 %v1166_v1  ;;  %v1171_v6 = vld [vmem:[%s1599_s1 + $0x8] sm:$0xff]   ;;  %v1175_v10 = vld [vmem:[%s1599_s1 + $0x10] sm:$0xff]  }
   0x4   :  { %v1168_v3 = vld [vmem:[%s1599_s1 + $0x80] sm:$0xff]   ;;  %993 = vmatpush3.bf16.msra.mxu0 %v1167_v2  ;;  %v1172_v7 = vld [vmem:[%s1599_s1 + $0x88] sm:$0xff]   ;;  %v1176_v11 = vld [vmem:[%s1599_s1 + $0x90] sm:$0xff]  }
   0x5   :  { %1051 = vmatpush3.bf16.msra.mxu1 %v1168_v3  ;;  %994 = vmatprep.subr.bf16.mxu0 %v1169_v4  ;;  %v1177_v12 = vld [vmem:[%s1599_s1 + $0x58] sm:$0xff]   ;;  %v1181_v16 = vld [vmem:[%s1599_s1 + $0x60] sm:$0xff]   ;;  %v1185_v20 = vld [vmem:[%s1599_s1 + $0x68] sm:$0xff]  }
   0x6   :  { %1052 = vmatprep.subr.bf16.mxu1 %v1170_v5  ;;  %v1178_v13 = vld [vmem:[%s1599_s1 + $0xd8] sm:$0xff]   ;;  %v1182_v17 = vld [vmem:[%s1599_s1 + $0xe0] sm:$0xff]   ;;  %v1186_v21 = vld [vmem:[%s1599_s1 + $0xe8] sm:$0xff]  }
   0x7   :  { %v1179_v14 = vld [vmem:[%s1599_s1 + $0x18] sm:$0xff]   ;;  %v1183_v18 = vld [vmem:[%s1599_s1 + $0x20] sm:$0xff]   ;;  %v1187_v22 = vld [vmem:[%s1599_s1 + $0x28] sm:$0xff]  }
   0x8   :  { %995 = vmatpush3.bf16.msra.mxu0 %v1171_v6  ;;  %v1180_v15 = vld [vmem:[%s1599_s1 + $0x98] sm:$0xff]   ;;  %v1184_v19 = vld [vmem:[%s1599_s1 + $0xa0] sm:$0xff]   ;;  %v1188_v23 = vld [vmem:[%s1599_s1 + $0xa8] sm:$0xff]  }
   0x9   :  { %1053 = vmatpush3.bf16.msra.mxu1 %v1172_v7  ;;  %996 = vmatprep.subr.bf16.mxu0 %v1173_v8  ;;  %v1189_v24 = vld [vmem:[%s1599_s1 + $0x70] sm:$0xff]   ;;  %v1193_v28 = vld [vmem:[%s1599_s1 + $0x78] sm:$0xff]   ;;  %v1202_v36 = vld [vmem:[%s1600_s0 + $0xc] ss:$20 sps:$4 sm:$0xff]  }
   0xa   :  { %1054 = vmatprep.subr.bf16.mxu1 %v1174_v9  ;;  %v1190_v25 = vld [vmem:[%s1599_s1 + $0xf0] sm:$0xff]   ;;  %v1194_v29 = vld [vmem:[%s1599_s1 + $0xf8] sm:$0xff]   ;;  %v1203_v37 = vld [vmem:[%s1599_s1 + $0x100] sm:$0xff]   ;;  %658 = vmatprep.mubr.bf16.mxu1 %v1202_v36 }
   0xb   :  { %v1191_v26 = vld [vmem:[%s1599_s1 + $0x30] sm:$0xff]   ;;  %v1195_v30 = vld [vmem:[%s1599_s1 + $0x38] sm:$0xff]   ;;  %v1204_v38 = vld [vmem:[%s1600_s0 + $0x2c] ss:$20 sps:$4 sm:$0xff]  }
   0xc   :  { %997 = vmatpush3.bf16.msra.mxu0 %v1175_v10  ;;  %v1192_v27 = vld [vmem:[%s1599_s1 + $0xb0] sm:$0xff]   ;;  %v1196_v31 = vld [vmem:[%s1599_s1 + $0xb8] sm:$0xff]   ;;  %v1214_v43 = vld [vmem:[%s1599_s1 + $0x108] sm:$0xff]  }
   0xd   :  { %1055 = vmatpush3.bf16.msra.mxu1 %v1176_v11  ;;  %998 = vmatprep.subr.bf16.mxu0 %v1177_v12  ;;  %v1197_v32 = vld [vmem:[%s1600_s0] ss:$20 sps:$4 sm:$0xff]   ;;  %v1199_v33 = vld [vmem:[%s1600_s0 + $0x4] ss:$20 sps:$4 sm:$0xff]   ;;  %v1200_v35 = vld [vmem:[%s1600_s0 + $0x8] ss:$20 sps:$4 sm:$0xff]  }
   0xe   :  { %1056 = vmatprep.subr.bf16.mxu1 %v1178_v13  ;;  %570 = vmatprep.mubr.bf16.mxu0 %v1199_v33  ;;  %v1206_v39 = vld [vmem:[%s1600_s0 + $0x34] ss:$20 sps:$4 sm:$0xff]   ;;  %v1209_v41 = vld [vmem:[%s1600_s0 + $0x30] ss:$20 sps:$4 sm:$0xff]   ;;  %v1216_v47 = vld [vmem:[%s1600_s0 + $0x58] ss:$20 sps:$4 sm:$0xff]  }
   0xf   :  { %v1208_v40 = vld [vmem:[%s1600_s0 + $0x28] ss:$20 sps:$4 sm:$0xff]   ;;  %v1223_v45 = vld [vmem:[%s1599_s1 + $0x110] sm:$0xff]   ;;  %v1219_v49 = vld [vmem:[%s1600_s0 + $0x84] ss:$20 sps:$4 sm:$0xff]  }
  0x10   :  { %999 = vmatpush3.bf16.msra.mxu0 %v1179_v14  ;;  %v1210_v42 = vld [vmem:[%s1600_s0 + $0x54] ss:$20 sps:$4 sm:$0xff]   ;;  %v1212_v44 = vld [vmem:[%s1600_s0 + $0x5c] ss:$20 sps:$4 sm:$0xff]   ;;  %v1221_v51 = vld [vmem:[%s1600_s0 + $0x78] ss:$20 sps:$4 sm:$0xff]  }
  0x11   :  { %1057 = vmatpush3.bf16.msra.mxu1 %v1180_v15  ;;  %1000 = vmatprep.subr.bf16.mxu0 %v1181_v16  ;;  %v1215_v46 = vld [vmem:[%s1600_s0 + $0x50] ss:$20 sps:$4 sm:$0xff]   ;;  %v1236_v50 = vld [vmem:[%s1599_s1 + $0x118] sm:$0xff]   ;;  %v1222_v52 = vld [vmem:[%s1600_s0 + $0x80] ss:$20 sps:$4 sm:$0xff]  }
  0x12   :  { %1058 = vmatprep.subr.bf16.mxu1 %v1182_v17  ;;  %v1217_v48 = vld [vmem:[%s1600_s0 + $0x7c] ss:$20 sps:$4 sm:$0xff]   ;;  %v1224_v53 = vld [vmem:[%s1600_s0 + $0xa4] ss:$20 sps:$4 sm:$0xff]   ;;  %v1226_v54 = vld [vmem:[%s1600_s0 + $0xac] ss:$20 sps:$4 sm:$0xff]  }
  0x13   :  { %v1228_v55 = vld [vmem:[%s1600_s0 + $0xa0] ss:$20 sps:$4 sm:$0xff]   ;;  %v1229_v56 = vld [vmem:[%s1600_s0 + $0xa8] ss:$20 sps:$4 sm:$0xff]   ;;  %v1235_v62 = vld [vmem:[%s1600_s0 + $0xd0] ss:$20 sps:$4 sm:$0xff]  }
  0x14   :  { %1001 = vmatpush3.bf16.msra.mxu0 %v1183_v18  ;;  %v1230_v57 = vld [vmem:[%s1600_s0 + $0xcc] ss:$20 sps:$4 sm:$0xff]   ;;  %v1232_v58 = vld [vmem:[%s1600_s0 + $0xd4] ss:$20 sps:$4 sm:$0xff]   ;;  %v52_v60 = vld [vmem:[%s1600_s0 + $0xf8] sm:$0x11] }
  0x15   :  { %1059 = vmatpush3.bf16.msra.mxu1 %v1184_v19  ;;  %1002 = vmatprep.subr.bf16.mxu0 %v1185_v20  ;;  %v51_v59 = vld [vmem:[%s1600_s0 + $0xf0] sm:$0x11]  ;;  %v1234_v61 = vld [vmem:[%s1600_s0 + $0xc8] ss:$20 sps:$4 sm:$0xff]   ;;  %v921_v0 = vcombine.high %v52_v60, %v52_v60  ;;  %v920_v2 = vcombine.low %v52_v60, %v52_v60  ;;  %v1243_v5 = vld [vmem:[%s1600_s0 + $0x38] ss:$20 sps:$4 sm:$0xff]  }
  0x16   :  { %1060 = vmatprep.subr.bf16.mxu1 %v1186_v21  ;;  %v919_v63 = vcombine.high %v51_v59, %v51_v59  ;;  %v918_v1 = vcombine.low %v51_v59, %v51_v59  ;;  %v1241_v3 = vld [vmem:[%s1600_s0 + $0x10] ss:$20 sps:$4 sm:$0xff]   ;;  %v1244_v6 = vld [vmem:[%s1600_s0 + $0xd8] ss:$20 sps:$4 sm:$0xff]   ;;  %v1245_v7 = vld [vmem:[%s1600_s0 + $0x60] ss:$20 sps:$4 sm:$0xff]  }
  0x17   :  { %v1242_v4 = vld [vmem:[%s1600_s0 + $0xb0] ss:$20 sps:$4 sm:$0xff]   ;;  %v1246_v8 = vld [vmem:[%s1600_s0 + $0x100] ss:$0 sps:$4 sm:$0x11]  }
  0x18   :  { %1003 = vmatpush3.bf16.msra.mxu0 %v1187_v22  ;;  %v1247_v9 = vld [vmem:[%s1600_s0 + $0x88] ss:$20 sps:$4 sm:$0xff]   ;;  %v1509_v11 = vld [vmem:[%s1601_s2] ss:$0 sm:$0xff] }
  0x19   :  { %1061 = vmatpush3.bf16.msra.mxu1 %v1188_v23  ;;  %1004 = vmatprep.subr.bf16.mxu0 %v1189_v24 }
  0x1a   :  { %1062 = vmatprep.subr.bf16.mxu1 %v1190_v25 }
  0x1c   :  { %1005 = vmatpush3.bf16.msra.mxu0 %v1191_v26 }
  0x1d   :  { %1063 = vmatpush3.bf16.msra.mxu1 %v1192_v27  ;;  %1006 = vmatprep.subr.bf16.mxu0 %v1193_v28 }
  0x1e   :  { %1064 = vmatprep.subr.bf16.mxu1 %v1194_v29 }
  0x20   :  { %1007 = vmatpush3.bf16.msra.mxu0 %v1195_v30 }
  0x21   :  { %1065 = vmatpush3.bf16.msra.mxu1 %v1196_v31  ;;  %1119 = vmatprep.subr.bf16.mxu0 %v1248_v34 }
  0x22   :  { %1155 = vmatprep.subr.bf16.mxu1 %v1248_v34 }
  0x23   :  { %571 = vmatmul.mubr.bf16.vlgmr.msra.gmra.mrb[0].mxu0 %v1197_v32 }
  0x24   :  { %659 = vmatmul.mubr.bf16.vlgmr.msra.gmra.mrb[0].mxu1 %v1200_v35  ;;  %1120 = vmatpush3.bf16.msra.mxu0 %v1203_v37 }
  0x25   :  { %578 = vmatprep.mubr.bf16.mxu0 %v1204_v38  ;;  %1159 = vmatpush3.bf16.msra.mxu1 %v1203_v37 }
  0x26   :  { %666 = vmatprep.mubr.bf16.mxu1 %v1206_v39  ;;  %1121 = vmatprep.subr.bf16.mxu0 %v1248_v34 }
  0x27   :  { %1156 = vmatprep.subr.bf16.mxu1 %v1248_v34 }
  0x28   :  { %1122 = vmatpush3.bf16.msra.mxu0 %v1214_v43 }
  0x29   :  { %1160 = vmatpush3.bf16.msra.mxu1 %v1214_v43  ;;  %1123 = vmatprep.subr.bf16.mxu0 %v1248_v34 }
  0x2a   :  { %1157 = vmatprep.subr.bf16.mxu1 %v1248_v34 }
  0x2b   :  { %579 = vmatmul.mubr.bf16.gmra.mrb[4].mxu0 %v1208_v40 }
  0x2c   :  { %667 = vmatmul.mubr.bf16.gmra.mrb[4].mxu1 %v1209_v41  ;;  %586 = vmatprep.mubr.bf16.mxu0 %v1210_v42 }
  0x2d   :  { %674 = vmatprep.mubr.bf16.mxu1 %v1212_v44  ;;  %1124 = vmatpush3.bf16.msra.mxu0 %v1223_v45 }
  0x2e   :  { %1161 = vmatpush3.bf16.msra.mxu1 %v1223_v45  ;;  %1125 = vmatprep.subr.bf16.mxu0 %v1248_v34 }
  0x2f   :  { %1158 = vmatprep.subr.bf16.mxu1 %v1248_v34 }
  0x31   :  { %1126 = vmatpush3.bf16.msra.mxu0 %v1236_v50 }
  0x32   :  { %1162 = vmatpush3.bf16.msra.mxu1 %v1236_v50 }
  0x33   :  { %587 = vmatmul.mubr.bf16.gmra.mrb[8].mxu0 %v1215_v46 }
  0x34   :  { %675 = vmatmul.mubr.bf16.gmra.mrb[8].mxu1 %v1216_v47  ;;  %594 = vmatprep.mubr.bf16.mxu0 %v1217_v48 }
  0x35   :  { %682 = vmatprep.mubr.bf16.mxu1 %v1219_v49 }
  0x3b   :  { %595 = vmatmul.mubr.bf16.gmra.mrb[12].mxu0 %v1221_v51 }
  0x3c   :  { %683 = vmatmul.mubr.bf16.gmra.mrb[12].mxu1 %v1222_v52  ;;  %602 = vmatprep.mubr.bf16.mxu0 %v1224_v53 }
  0x3d   :  { %690 = vmatprep.mubr.bf16.mxu1 %v1226_v54 }
  0x43   :  { %603 = vmatmul.mubr.bf16.gmra.mrb[16].mxu0 %v1228_v55 }
  0x44   :  { %691 = vmatmul.mubr.bf16.gmra.mrb[16].mxu1 %v1229_v56  ;;  %610 = vmatprep.mubr.bf16.mxu0 %v1230_v57 }
  0x45   :  { %698 = vmatprep.mubr.bf16.mxu1 %v1232_v58 }
  0x4b   :  { %611 = vmatmul.mubr.bf16.gmra.mrb[20].mxu0 %v1234_v61 }
  0x4c   :  { %699 = vmatmul.mubr.bf16.gmra.mrb[20].mxu1 %v1235_v62  ;;  %618 = vmatprep.mubr.bf16.mxu0 %v919_v63 }
  0x4d   :  { %706 = vmatprep.mubr.bf16.mxu1 %v921_v0 }
  0x53   :  { %619 = vmatmul.mubr.bf16.gmra.mrb[24].mxu0 %v918_v1 }
  0x54   :  { %707 = vmatmul.mubr.bf16.gmra.mrb[24].mxu1 %v920_v2  ;;  %1127 = vmatprep.mubr.msk.bf16.mxu0 %vm1249_vm0, %v1248_v34 }
  0x55   :  { %1143 = vmatprep.mubr.msk.bf16.mxu1 %vm1249_vm0, %v1248_v34 }
  0x5b   :  { %1128 = vmatmul.mubr.msk.bf16.vlgmr.msra.gmra.mrb[28].mxu0 %vm516_vm1, %v1241_v3 }
  0x5c   :  { %1144 = vmatmul.mubr.msk.bf16.vlgmr.msra.gmra.mrb[28].mxu1 %vm516_vm1, %v1242_v4  ;;  %1131 = vmatprep.mubr.msk.bf16.mxu0 %vm1249_vm0, %v1248_v34 }
  0x5d   :  { %1147 = vmatprep.mubr.msk.bf16.mxu1 %vm1249_vm0, %v1248_v34 }
  0x63   :  { %1132 = vmatmul.mubr.msk.bf16.gmra.mrb[32].mxu0 %vm516_vm1, %v1243_v5 }
  0x64   :  { %1148 = vmatmul.mubr.msk.bf16.gmra.mrb[32].mxu1 %vm516_vm1, %v1244_v6  ;;  %1135 = vmatprep.mubr.msk.bf16.mxu0 %vm1249_vm0, %v1248_v34 }
  0x65   :  { %1151 = vmatprep.mubr.msk.bf16.mxu1 %vm1249_vm0, %v1248_v34 }
  0x6b   :  { %1136 = vmatmul.mubr.msk.bf16.gmra.mrb[36].mxu0 %vm516_vm1, %v1245_v7 }
  0x6c   :  { %1152 = vmatmul.mubr.msk.bf16.gmra.mrb[36].mxu1 %vm516_vm1, %v1246_v8  ;;  %1139 = vmatprep.mubr.msk.bf16.mxu0 %vm1249_vm0, %v1248_v34 }
  0x73   :  { %1140 = vmatmul.mubr.msk.bf16.gmra.mrb[40].mxu0 %vm516_vm1, %v1247_v9 }
  0xf6   :  { %v1008_v10 = vpop.f32.mrb[0].mxu0 }
  0xf7   :  { %v1009_v12 = vpop.f32.mrb[1].mxu0  ;;  %v1066_v13 = vpop.f32.mrb[0].mxu1 }
  0xf8   :  { %v1010_v14 = vadd.f32 %v1009_v12, %v1008_v10  ;;  %v1011_v15 = vpop.f32.mrb[2].mxu0  ;;  %v1067_v16 = vpop.f32.mrb[1].mxu1 }
  0xf9   :  { %v1012_v17 = vpop.f32.mrb[3].mxu0  ;;  %v1068_v18 = vadd.f32 %v1067_v16, %v1066_v13  ;;  %v1069_v19 = vpop.f32.mrb[2].mxu1 }
  0xfa   :  { %v573_v20 = vadd.f32 %v1010_v14, %v1509_v11  ;;  %v1013_v21 = vadd.f32 %v1012_v17, %v1011_v15  ;;  %v1070_v22 = vpop.f32.mrb[3].mxu1 }
  0xfb   :  { %v1071_v23 = vadd.f32 %v1070_v22, %v1069_v19 }
  0xfc   :  { %v576_v24 = vadd.f32 %v1013_v21, %v1509_v11  ;;  %v1513_v25 = vadd.f32 %v1068_v18, %v573_v20 }
  0xfe   :  { %v1014_v26 = vpop.f32.mrb[4].mxu0  ;;  %v1515_v27 = vadd.f32 %v1071_v23, %v576_v24 }
  0xff   :  { %v1015_v28 = vpop.f32.mrb[5].mxu0  ;;  %v1072_v29 = vpop.f32.mrb[4].mxu1 }
 0x100   :  { %v1016_v30 = vadd.f32 %v1015_v28, %v1014_v26  ;;  %v1017_v31 = vpop.f32.mrb[6].mxu0  ;;  %v1073_v32 = vpop.f32.mrb[5].mxu1 }
 0x101   :  { %v1018_v33 = vpop.f32.mrb[7].mxu0  ;;  %v1074_v34 = vadd.f32 %v1073_v32, %v1072_v29  ;;  %v1075_v35 = vpop.f32.mrb[6].mxu1 }
 0x102   :  { %v581_v36 = vadd.f32 %v1016_v30, %v1509_v11  ;;  %v1019_v37 = vadd.f32 %v1018_v33, %v1017_v31  ;;  %v1076_v38 = vpop.f32.mrb[7].mxu1 }
 0x103   :  { %v1077_v39 = vadd.f32 %v1076_v38, %v1075_v35 }
 0x104   :  { %v584_v40 = vadd.f32 %v1019_v37, %v1509_v11  ;;  %v1519_v41 = vadd.f32 %v1074_v34, %v581_v36 }
 0x106   :  { %v1020_v42 = vpop.f32.mrb[8].mxu0  ;;  %v1521_v43 = vadd.f32 %v1077_v39, %v584_v40 }
 0x107   :  { %v1021_v44 = vpop.f32.mrb[9].mxu0  ;;  %v1078_v45 = vpop.f32.mrb[8].mxu1 }
 0x108   :  { %v1022_v46 = vadd.f32 %v1021_v44, %v1020_v42  ;;  %v1023_v47 = vpop.f32.mrb[10].mxu0  ;;  %v1079_v48 = vpop.f32.mrb[9].mxu1 }
 0x109   :  { %v1024_v49 = vpop.f32.mrb[11].mxu0  ;;  %v1080_v50 = vadd.f32 %v1079_v48, %v1078_v45  ;;  %v1081_v51 = vpop.f32.mrb[10].mxu1 }
 0x10a   :  { %v589_v52 = vadd.f32 %v1022_v46, %v1509_v11  ;;  %v1025_v53 = vadd.f32 %v1024_v49, %v1023_v47  ;;  %v1082_v54 = vpop.f32.mrb[11].mxu1 }
 0x10b   :  { %v1083_v55 = vadd.f32 %v1082_v54, %v1081_v51 }
 0x10c   :  { %v592_v56 = vadd.f32 %v1025_v53, %v1509_v11  ;;  %v1525_v57 = vadd.f32 %v1080_v50, %v589_v52 }
 0x10e   :  { %v1026_v58 = vpop.f32.mrb[12].mxu0  ;;  %v1527_v59 = vadd.f32 %v1083_v55, %v592_v56 }
 0x10f   :  { %v1027_v60 = vpop.f32.mrb[13].mxu0  ;;  %v1084_v61 = vpop.f32.mrb[12].mxu1 }
 0x110   :  { %v1028_v62 = vadd.f32 %v1027_v60, %v1026_v58  ;;  %v1029_v63 = vpop.f32.mrb[14].mxu0  ;;  %v1085_v0 = vpop.f32.mrb[13].mxu1 }
 0x111   :  { %v1030_v1 = vpop.f32.mrb[15].mxu0  ;;  %v1086_v2 = vadd.f32 %v1085_v0, %v1084_v61  ;;  %v1087_v3 = vpop.f32.mrb[14].mxu1 }
 0x112   :  { %v597_v4 = vadd.f32 %v1028_v62, %v1509_v11  ;;  %v1031_v5 = vadd.f32 %v1030_v1, %v1029_v63  ;;  %v1088_v6 = vpop.f32.mrb[15].mxu1 }
 0x113   :  { %v1089_v7 = vadd.f32 %v1088_v6, %v1087_v3 }
 0x114   :  { %v600_v8 = vadd.f32 %v1031_v5, %v1509_v11  ;;  %v1531_v9 = vadd.f32 %v1086_v2, %v597_v4 }
 0x116   :  { %v1032_v10 = vpop.f32.mrb[16].mxu0  ;;  %v1533_v12 = vadd.f32 %v1089_v7, %v600_v8 }
 0x117   :  { %v1033_v13 = vpop.f32.mrb[17].mxu0  ;;  %v1090_v14 = vpop.f32.mrb[16].mxu1 }
 0x118   :  { %v1034_v15 = vadd.f32 %v1033_v13, %v1032_v10  ;;  %v1035_v16 = vpop.f32.mrb[18].mxu0  ;;  %v1091_v17 = vpop.f32.mrb[17].mxu1 }
 0x119   :  { %v1036_v18 = vpop.f32.mrb[19].mxu0  ;;  %v1092_v19 = vadd.f32 %v1091_v17, %v1090_v14  ;;  %v1093_v20 = vpop.f32.mrb[18].mxu1 }
 0x11a   :  { %v605_v21 = vadd.f32 %v1034_v15, %v1509_v11  ;;  %v1037_v22 = vadd.f32 %v1036_v18, %v1035_v16  ;;  %v1094_v23 = vpop.f32.mrb[19].mxu1 }
 0x11b   :  { %v1095_v24 = vadd.f32 %v1094_v23, %v1093_v20 }
 0x11c   :  { %v608_v26 = vadd.f32 %v1037_v22, %v1509_v11  ;;  %v693_v28 = vadd.f32 %v1092_v19, %v605_v21 }
 0x11e   :  { %v1038_v29 = vpop.f32.mrb[20].mxu0  ;;  %v696_v30 = vadd.f32 %v1095_v24, %v608_v26 }
 0x11f   :  { %v1039_v31 = vpop.f32.mrb[21].mxu0  ;;  %v1096_v32 = vpop.f32.mrb[20].mxu1 }
 0x120   :  { %v1040_v33 = vadd.f32 %v1039_v31, %v1038_v29  ;;  %v1041_v34 = vpop.f32.mrb[22].mxu0  ;;  %v1097_v35 = vpop.f32.mrb[21].mxu1 }
 0x121   :  { %v1042_v36 = vpop.f32.mrb[23].mxu0  ;;  %v1098_v37 = vadd.f32 %v1097_v35, %v1096_v32  ;;  %v1099_v38 = vpop.f32.mrb[22].mxu1 }
 0x122   :  { %v613_v39 = vadd.f32 %v1040_v33, %v1509_v11  ;;  %v1043_v40 = vadd.f32 %v1042_v36, %v1041_v34  ;;  %v1100_v42 = vpop.f32.mrb[23].mxu1 }
 0x123   :  { %v1101_v44 = vadd.f32 %v1100_v42, %v1099_v38 }
 0x124   :  { %v616_v45 = vadd.f32 %v1043_v40, %v1509_v11  ;;  %v701_v46 = vadd.f32 %v1098_v37, %v613_v39 }
 0x126   :  { %v1044_v47 = vpop.f32.mrb[24].mxu0  ;;  %v704_v48 = vadd.f32 %v1101_v44, %v616_v45 }
 0x127   :  { %v1045_v49 = vpop.f32.mrb[25].mxu0  ;;  %v1102_v50 = vpop.f32.mrb[24].mxu1 }
 0x128   :  { %v1046_v51 = vadd.f32 %v1045_v49, %v1044_v47  ;;  %v1047_v52 = vpop.f32.mrb[26].mxu0  ;;  %v1103_v53 = vpop.f32.mrb[25].mxu1 }
 0x129   :  { %v1048_v54 = vpop.f32.mrb[27].mxu0  ;;  %v1104_v55 = vadd.f32 %v1103_v53, %v1102_v50  ;;  %v1105_v56 = vpop.f32.mrb[26].mxu1 }
 0x12a   :  { %v621_v58 = vadd.f32 %v1046_v51, %v1509_v11  ;;  %v1106_v60 = vpop.f32.mrb[27].mxu1 }
 0x12c   :  { %v709_v61 = vadd.f32 %v1104_v55, %v621_v58 }
 0x12e   :  { %v748_v62 = vpop.f32.mrb[28].mxu0 }
 0x12f   :  { %v749_v63 = vadd.f32 %v748_v62, %v1513_v25  ;;  %v780_v0 = vpop.f32.mrb[28].mxu1  ;;  %v1129_v1 = vpop.f32.mrb[29].mxu0 }
 0x130   :  { %v781_v2 = vadd.f32 %v780_v0, %v693_v28  ;;  %v1145_v3 = vpop.f32.mrb[29].mxu1  ;;  %v751_v4 = vpop.f32.mrb[30].mxu0 }
 0x131   :  { %v802_v5 = vmax.f32 %v749_v63, 0.0  ;;  %v752_v6 = vadd.f32 %v751_v4, %v1515_v27  ;;  %v783_v7 = vpop.f32.mrb[30].mxu1  ;;  %v1130_v8 = vpop.f32.mrb[31].mxu0 }
 0x132   :  { %v810_v10 = vmax.f32 %v781_v2, 0.0  ;;  %v784_v13 = vadd.f32 %v783_v7, %v696_v30  ;;  %v1146_v14 = vpop.f32.mrb[31].mxu1 }
 0x133   :  { %v979_v11 = vpack.c.bf16 %v802_v5, %v802_v5  ;;  %v803_v15 = vmax.f32 %v752_v6, 0.0 }
 0x134   :  { %v987_v16 = vpack.c.bf16 %v810_v10, %v810_v10  ;;  %v811_v17 = vmax.f32 %v784_v13, 0.0 }
 0x135   :  { %869 = vst.msk [vmem:[%s1602_s3] sm:$0xf] %vm868_vm2, %v979_v11  ;;  %v980_v25 = vpack.c.bf16 %v803_v15, %v803_v15 }
 0x136   :  { %877 = vst.msk [vmem:[%s1602_s3 + $0x20] sm:$0xf] %vm868_vm2, %v987_v16  ;;  %v988_v27 = vpack.c.bf16 %v811_v17, %v811_v17  ;;  %v756_v18 = vpop.f32.mrb[32].mxu0 }
 0x137   :  { %870 = vst.msk [vmem:[%s1602_s3 + $0x4] sm:$0xf] %vm868_vm2, %v980_v25  ;;  %v757_v19 = vadd.f32 %v756_v18, %v1519_v41  ;;  %v788_v20 = vpop.f32.mrb[32].mxu1  ;;  %v1133_v21 = vpop.f32.mrb[33].mxu0 }
 0x138   :  { %878 = vst.msk [vmem:[%s1602_s3 + $0x24] sm:$0xf] %vm868_vm2, %v988_v27  ;;  %v789_v22 = vadd.f32 %v788_v20, %v701_v46  ;;  %v1149_v23 = vpop.f32.mrb[33].mxu1  ;;  %v759_v24 = vpop.f32.mrb[34].mxu0 }
 0x139   :  { %v804_v26 = vmax.f32 %v757_v19, 0.0  ;;  %v760_v28 = vadd.f32 %v759_v24, %v1521_v43  ;;  %v791_v29 = vpop.f32.mrb[34].mxu1  ;;  %v1134_v30 = vpop.f32.mrb[35].mxu0 }
 0x13a   :  { %v812_v31 = vmax.f32 %v789_v22, 0.0  ;;  %v792_v32 = vadd.f32 %v791_v29, %v704_v48  ;;  %v1150_v33 = vpop.f32.mrb[35].mxu1 }
 0x13b   :  { %v981_v34 = vpack.c.bf16 %v804_v26, %v804_v26  ;;  %v805_v41 = vmax.f32 %v760_v28, 0.0 }
 0x13c   :  { %v989_v35 = vpack.c.bf16 %v812_v31, %v812_v31  ;;  %v813_v36 = vmax.f32 %v792_v32, 0.0 }
 0x13d   :  { %871 = vst.msk [vmem:[%s1602_s3 + $0x8] sm:$0xf] %vm868_vm2, %v981_v34  ;;  %v982_v37 = vpack.c.bf16 %v805_v41, %v805_v41 }
 0x13e   :  { %879 = vst.msk [vmem:[%s1602_s3 + $0x28] sm:$0xf] %vm868_vm2, %v989_v35  ;;  %v990_v43 = vpack.c.bf16 %v813_v36, %v813_v36  ;;  %v764_v38 = vpop.f32.mrb[36].mxu0 }
 0x13f   :  { %872 = vst.msk [vmem:[%s1602_s3 + $0xc] sm:$0xf] %vm868_vm2, %v982_v37  ;;  %v765_v39 = vadd.f32 %v764_v38, %v1525_v57  ;;  %v796_v40 = vpop.f32.mrb[36].mxu1  ;;  %v1137_v42 = vpop.f32.mrb[37].mxu0 }
 0x140   :  { %880 = vst.msk [vmem:[%s1602_s3 + $0x2c] sm:$0xf] %vm868_vm2, %v990_v43  ;;  %v797_v44 = vadd.f32 %v796_v40, %v709_v61  ;;  %v767_v45 = vpop.f32.mrb[38].mxu0  ;;  %v1153_v46 = vpop.f32.mrb[37].mxu1 }
 0x141   :  { %v806_v47 = vmax.f32 %v765_v39, 0.0  ;;  %v768_v48 = vadd.f32 %v767_v45, %v1527_v59  ;;  %v1138_v49 = vpop.f32.mrb[39].mxu0  ;;  %v799_v50 = vpop.f32.mrb[38].mxu1 }
 0x142   :  { %v814_v51 = vmax.f32 %v797_v44, 0.0  ;;  %v1154_v52 = vpop.f32.mrb[39].mxu1 }
 0x143   :  { %v983_v53 = vpack.c.bf16 %v806_v47, %v806_v47  ;;  %v807_v57 = vmax.f32 %v768_v48, 0.0 }
 0x144   :  { %v991_v54 = vpack.c.bf16 %v814_v51, %v814_v51 }
 0x145   :  { %873 = vst.msk [vmem:[%s1602_s3 + $0x10] sm:$0xf] %vm868_vm2, %v983_v53  ;;  %v984_v55 = vpack.c.bf16 %v807_v57, %v807_v57 }
 0x146   :  { %882 = vst.msk [vmem:[%s1602_s3 + $0x30] sm:$0x1] %vm881_vm3, %v991_v54  ;;  %v772_v56 = vpop.f32.mrb[40].mxu0 }
 0x147   :  { %874 = vst.msk [vmem:[%s1602_s3 + $0x14] sm:$0xf] %vm868_vm2, %v984_v55  ;;  %v773_v59 = vadd.f32 %v772_v56, %v1531_v9  ;;  %v1141_v58 = vpop.f32.mrb[41].mxu0 }
 0x148   :  { %v775_v60 = vpop.f32.mrb[42].mxu0 }
 0x149   :  { %v808_v61 = vmax.f32 %v773_v59, 0.0  ;;  %v776_v62 = vadd.f32 %v775_v60, %v1533_v12  ;;  %v1142_v63 = vpop.f32.mrb[43].mxu0 }
 0x14b   :  { %v985_v0 = vpack.c.bf16 %v808_v61, %v808_v61  ;;  %v809_v1 = vmax.f32 %v776_v62, 0.0 }
 0x14d   :  { %875 = vst.msk [vmem:[%s1602_s3 + $0x18] sm:$0xf] %vm868_vm2, %v985_v0  ;;  %v986_v2 = vpack.c.bf16 %v809_v1, %v809_v1 }
 0x14f   :  { %876 = vst.msk [vmem:[%s1602_s3 + $0x1c] sm:$0xf] %vm868_vm2, %v986_v2 }

// kernel: ppo_atari_actor_forward.7
= control target key start
LH: loop header
LB: loop body
LE: loop exit
PB: predicated region body
PF: predicated region fallthrough
CT: control target
= control target key end

     0   :  { %10 = vsyncpa [#allocation4], 0  ;;  %s3278_s18 = smov 0   ;;  %s3700_s0 = inlined_call_operand.vmem [shape: bf16[2,3584], index: 0, kind: input, shape index: {}]   ;;  %s3701_s1 = inlined_call_operand.vmem [shape: bf16[3584,512], index: 1, kind: input, shape index: {}]   ;;  %s3702_s2 = inlined_call_operand.vmem [shape: f32[1,512], index: 2, kind: input, shape index: {}]   ;;  %s3703_s3 = inlined_call_operand.vmem [shape: bf16[512,6], index: 3, kind: input, shape index: {}]   ;;  %s3704_s4 = inlined_call_operand.vmem [shape: f32[1,6], index: 4, kind: input, shape index: {}]   ;;  %s3705_s5 = inlined_call_operand.hbm [shape: f32[2,6], index: 5, kind: output, shape index: {}]  }
   0x1 LB: > { %s3284_s19 = sadd.s32 4294967295, %s3241_s18   ;;  %p2478_p0 = scmp.ge.s32.totalorder %s3241_s18, 1  ;;  %s3241_s18 = sphi %s3278_s18, %s16_s18  }
   0x2   : > { %p195_p1 = scmp.lt.s32.totalorder %s3241_s18, 5 }
   0x4   : > { %p196_p2 = pnand %p2478_p0, %p195_p1 }
   0x5   : > { %s223_s20 = smul.u32 (!%p196_p2), 7, %s3284_s19  ;;  %p2481_p5 = scmp.ne.s32.totalorder (!%p196_p2), %s3284_s19, 0 }
   0x6   : > { %199 = sbr.rel (%p196_p2) target bundleno = 1046 (0x416), region = 40 }
   0x7   : > { %s228_s21 = smul.u32 (!%p196_p2), 112, %s3284_s19  ;;  %p224_p3 = scmp.lt.s32.totalorder (!%p196_p2), %s223_s20, 27 }
   0x9   : > { %p229_p4 = scmp.lt.s32.totalorder (!%p196_p2), %s228_s21, 447 }
   0xd   : > { %s3707_s20 = smov (!%p224_p3, %s223_s20), 27  ;;  %s3709_s21 = smov (!%p229_p4, %s228_s21), 447 }
   0xe   : > { %s226_s24 = scalar_lea.vmem %s3700_s0, %s3707_s20  ;;  %s2744_s25 = sshll.u32 %s3709_s21, 4  ;;  %v3243_v0 = vmov (!%p2481_p5), 0.0  }
   0xf   : > { %s3299_s28 = scalar_lea.vmem %s3701_s1, %s2744_s25  ;;  %239 = sbr.rel (%p2481_p5) target bundleno = 22 (0x16), region = 44  ;;  %240 = vst [vmem:[#allocation2] sm:$0xff] (!%p2481_p5), %v3243_v0 }
  0x16 PF: > { %v2832_v1 = vld [vmem:[%s3299_s28 + $0x4] ss:$16 sps:$4 sm:$0xff]   ;;  %v2834_v2 = vld [vmem:[%s3299_s28 + $0xc] ss:$16 sps:$4 sm:$0xff]   ;;  %v2836_v3 = vld [vmem:[%s3299_s28] ss:$16 sps:$4 sm:$0xff]   ;;  %v472_v39 = vlaneseq }
  0x17   : > { %1643 = vmatprep.subr.bf16.mxu0 %v2832_v1  ;;  %v2837_v4 = vld [vmem:[%s3299_s28 + $0x8] ss:$16 sps:$4 sm:$0xff]   ;;  %1807 = vmatprep.subr.bf16.mxu1 %v2834_v2  ;;  %v2838_v5 = vld [vmem:[%s3299_s28 + $0x24] ss:$16 sps:$4 sm:$0xff]   ;;  %v2840_v6 = vld [vmem:[%s3299_s28 + $0x2c] ss:$16 sps:$4 sm:$0xff]  }
  0x18   : > { %1644 = vmatpush1.bf16.msra.mxu0 %v2836_v3  ;;  %1808 = vmatpush1.bf16.msra.mxu1 %v2837_v4  ;;  %v2842_v7 = vld [vmem:[%s3299_s28 + $0x20] ss:$16 sps:$4 sm:$0xff]   ;;  %v2843_v8 = vld [vmem:[%s3299_s28 + $0x28] ss:$16 sps:$4 sm:$0xff]   ;;  %v2844_v9 = vld [vmem:[%s3299_s28 + $0x44] ss:$16 sps:$4 sm:$0xff]  }
  0x19   : > { %1645 = vmatprep.subr.bf16.mxu0 %v2838_v5  ;;  %1809 = vmatprep.subr.bf16.mxu1 %v2840_v6  ;;  %v2846_v10 = vld [vmem:[%s3299_s28 + $0x4c] ss:$16 sps:$4 sm:$0xff]   ;;  %v2848_v11 = vld [vmem:[%s3299_s28 + $0x40] ss:$16 sps:$4 sm:$0xff]   ;;  %v2849_v12 = vld [vmem:[%s3299_s28 + $0x48] ss:$16 sps:$4 sm:$0xff]  }
  0x1a   : > { %v2850_v13 = vld [vmem:[%s3299_s28 + $0x64] ss:$16 sps:$4 sm:$0xff]   ;;  %v2852_v14 = vld [vmem:[%s3299_s28 + $0x6c] ss:$16 sps:$4 sm:$0xff]   ;;  %v2854_v15 = vld [vmem:[%s3299_s28 + $0x60] ss:$16 sps:$4 sm:$0xff]  }
  0x1b   : > { %v2855_v16 = vld [vmem:[%s3299_s28 + $0x68] ss:$16 sps:$4 sm:$0xff]   ;;  %v2856_v17 = vld [vmem:[%s3299_s28 + $0x84] ss:$16 sps:$4 sm:$0xff]   ;;  %v2858_v18 = vld [vmem:[%s3299_s28 + $0x8c] ss:$16 sps:$4 sm:$0xff]  }
  0x1c   : > { %1646 = vmatpush1.bf16.msra.mxu0 %v2842_v7  ;;  %1810 = vmatpush1.bf16.msra.mxu1 %v2843_v8  ;;  %v2860_v19 = vld [vmem:[%s3299_s28 + $0x80] ss:$16 sps:$4 sm:$0xff]   ;;  %v2861_v20 = vld [vmem:[%s3299_s28 + $0x88] ss:$16 sps:$4 sm:$0xff]   ;;  %v2862_v21 = vld [vmem:[%s3299_s28 + $0xa4] ss:$16 sps:$4 sm:$0xff]  }
  0x1d   : > { %1647 = vmatprep.subr.bf16.mxu0 %v2844_v9  ;;  %1811 = vmatprep.subr.bf16.mxu1 %v2846_v10  ;;  %v2864_v22 = vld [vmem:[%s3299_s28 + $0xac] ss:$16 sps:$4 sm:$0xff]   ;;  %v2866_v23 = vld [vmem:[%s3299_s28 + $0xa0] ss:$16 sps:$4 sm:$0xff]   ;;  %v2867_v24 = vld [vmem:[%s3299_s28 + $0xa8] ss:$16 sps:$4 sm:$0xff]  }
  0x1e   : > { %v2868_v25 = vld [vmem:[%s3299_s28 + $0xc4] ss:$16 sps:$4 sm:$0xff]   ;;  %v2870_v26 = vld [vmem:[%s3299_s28 + $0xcc] ss:$16 sps:$4 sm:$0xff]   ;;  %v2872_v27 = vld [vmem:[%s3299_s28 + $0xc0] ss:$16 sps:$4 sm:$0xff]  }
  0x1f   : > { %v2873_v28 = vld [vmem:[%s3299_s28 + $0xc8] ss:$16 sps:$4 sm:$0xff]   ;;  %v2874_v29 = vld [vmem:[%s3299_s28 + $0xe4] ss:$16 sps:$4 sm:$0xff]   ;;  %v2876_v30 = vld [vmem:[%s3299_s28 + $0xec] ss:$16 sps:$4 sm:$0xff]  }
  0x20   : > { %1648 = vmatpush1.bf16.msra.mxu0 %v2848_v11  ;;  %1812 = vmatpush1.bf16.msra.mxu1 %v2849_v12  ;;  %v2878_v31 = vld [vmem:[%s3299_s28 + $0xe0] ss:$16 sps:$4 sm:$0xff]   ;;  %v2879_v32 = vld [vmem:[%s3299_s28 + $0xe8] ss:$16 sps:$4 sm:$0xff]   ;;  %v2880_v33 = vld [vmem:[%s3299_s28 + $0x104] ss:$16 sps:$4 sm:$0xff]  }
  0x21   : > { %1649 = vmatprep.subr.bf16.mxu0 %v2850_v13  ;;  %1813 = vmatprep.subr.bf16.mxu1 %v2852_v14  ;;  %v2882_v34 = vld [vmem:[%s3299_s28 + $0x10c] ss:$16 sps:$4 sm:$0xff]   ;;  %v2884_v35 = vld [vmem:[%s3299_s28 + $0x100] ss:$16 sps:$4 sm:$0xff]   ;;  %v2885_v36 = vld [vmem:[%s3299_s28 + $0x108] ss:$16 sps:$4 sm:$0xff]  }
  0x22   : > { %v3244_v37 = vmov 1966171168   ;;  %v2886_v40 = vld [vmem:[%s3299_s28 + $0x124] ss:$16 sps:$4 sm:$0xff]   ;;  %v2888_v41 = vld [vmem:[%s3299_s28 + $0x12c] ss:$16 sps:$4 sm:$0xff]  }
  0x23   : > { %v470_v38 = vunpack.c.l.s4 %v3244_v37  ;;  %v2890_v42 = vld [vmem:[%s3299_s28 + $0x120] ss:$16 sps:$4 sm:$0xff]   ;;  %v3341_v44 = vshrl.u32 %v472_v39, 7  ;;  %v2891_v45 = vld [vmem:[%s3299_s28 + $0x128] ss:$16 sps:$4 sm:$0xff]   ;;  %p2706_p6 = scmp.ne.s32.totalorder %s3284_s19, 3 }
  0x24   : > { %1650 = vmatpush1.bf16.msra.mxu0 %v2854_v15  ;;  %1814 = vmatpush1.bf16.msra.mxu1 %v2855_v16  ;;  %v2892_v46 = vld [vmem:[%s3299_s28 + $0x144] ss:$16 sps:$4 sm:$0xff]   ;;  %v2894_v47 = vld [vmem:[%s3299_s28 + $0x14c] ss:$16 sps:$4 sm:$0xff]   ;;  %v2896_v48 = vld [vmem:[%s3299_s28 + $0x140] ss:$16 sps:$4 sm:$0xff]  }
  0x25   : > { %1651 = vmatprep.subr.bf16.mxu0 %v2856_v17  ;;  %1815 = vmatprep.subr.bf16.mxu1 %v2858_v18  ;;  %v471_v43 = vunpack.c.0.s8 %v470_v38  ;;  %v2897_v49 = vld [vmem:[%s3299_s28 + $0x148] ss:$16 sps:$4 sm:$0xff]   ;;  %v2898_v51 = vld [vmem:[%s3299_s28 + $0x164] ss:$16 sps:$4 sm:$0xff]   ;;  %v2900_v52 = vld [vmem:[%s3299_s28 + $0x16c] ss:$16 sps:$4 sm:$0xff]  }
  0x26   : > { %v242_v53 = vld [vmem:[%s226_s24] sm:$0x7f]  ;;  %v2903_v56 = vld [vmem:[%s3299_s28 + $0x168] ss:$16 sps:$4 sm:$0xff]   ;;  %v2906_v58 = vld [vmem:[%s3299_s28 + $0x18c] ss:$16 sps:$4 sm:$0xff]  }
  0x27   : > { %v3349_v50 = vsub.s32 %v471_v43, %v3341_v44  ;;  %v2902_v54 = vld [vmem:[%s3299_s28 + $0x160] ss:$16 sps:$4 sm:$0xff]   ;;  %v2904_v57 = vld [vmem:[%s3299_s28 + $0x184] ss:$16 sps:$4 sm:$0xff]   ;;  %v2909_v62 = vld [vmem:[%s3299_s28 + $0x188] ss:$16 sps:$4 sm:$0xff]   ;;  %v468_v10 = vcombine.high %v242_v53, %v242_v53 }
  0x28   : > { %1652 = vmatpush1.bf16.msra.mxu0 %v2860_v19  ;;  %1816 = vmatpush1.bf16.msra.mxu1 %v2861_v20  ;;  %v2908_v60 = vld [vmem:[%s3299_s28 + $0x180] ss:$16 sps:$4 sm:$0xff]   ;;  %v2910_v63 = vld [vmem:[%s3299_s28 + $0x1a4] ss:$16 sps:$4 sm:$0xff]   ;;  %v2912_v0 = vld [vmem:[%s3299_s28 + $0x1ac] ss:$16 sps:$4 sm:$0xff]  }
  0x29   : > { %1653 = vmatprep.subr.bf16.mxu0 %v2862_v21  ;;  %1817 = vmatprep.subr.bf16.mxu1 %v2864_v22  ;;  %v475_v55 = vrot.slane %v242_v53, %v3349_v50  ;;  %v2914_v1 = vld [vmem:[%s3299_s28 + $0x1a0] ss:$16 sps:$4 sm:$0xff]   ;;  %v2915_v2 = vld [vmem:[%s3299_s28 + $0x1a8] ss:$16 sps:$4 sm:$0xff]   ;;  %v2916_v3 = vld [vmem:[%s3299_s28 + $0x1c4] ss:$16 sps:$4 sm:$0xff]   ;;  %v482_v14 = vrot.slane %v468_v10, %v3349_v50 }
  0x2a   : > { %v2918_v4 = vld [vmem:[%s3299_s28 + $0x1cc] ss:$16 sps:$4 sm:$0xff]   ;;  %v2920_v5 = vld [vmem:[%s3299_s28 + $0x1c0] ss:$16 sps:$4 sm:$0xff]   ;;  %v2921_v6 = vld [vmem:[%s3299_s28 + $0x1c8] ss:$16 sps:$4 sm:$0xff]  }
  0x2b   : > { %v483_v59 = vcombine.high %v475_v55, %v475_v55  ;;  %v2922_v7 = vld [vmem:[%s3299_s28 + $0x1e4] ss:$16 sps:$4 sm:$0xff]   ;;  %v2924_v8 = vld [vmem:[%s3299_s28 + $0x1ec] ss:$16 sps:$4 sm:$0xff]   ;;  %v2926_v9 = vld [vmem:[%s3299_s28 + $0x1e0] ss:$16 sps:$4 sm:$0xff]   ;;  %v3383_v16 = vrot.slane %v475_v55, %v3349_v50  ;;  %v484_v17 = vcombine.high %v482_v14, %v482_v14  ;;  %v3392_v22 = vrot.slane %v482_v14, %v3349_v50 }
  0x2c   : > { %1654 = vmatpush1.bf16.msra.mxu0 %v2866_v23  ;;  %1818 = vmatpush1.bf16.msra.mxu1 %v2867_v24  ;;  %v2927_v11 = vld [vmem:[%s3299_s28 + $0x1e8] ss:$16 sps:$4 sm:$0xff]   ;;  %v2930_v12 = vld [vmem:[%s3299_s28 + $0x204] ss:$16 sps:$4 sm:$0xff]   ;;  %v2933_v13 = vld [vmem:[%s3299_s28 + $0x20c] ss:$16 sps:$4 sm:$0xff]  }
  0x2d   : > { %1655 = vmatprep.subr.bf16.mxu0 %v2868_v25  ;;  %1819 = vmatprep.subr.bf16.mxu1 %v2870_v26  ;;  %v505_v61 = vrot.slane %v483_v59, %v3349_v50  ;;  %v2928_v15 = vld [vmem:[%s3299_s28 + $0x200] ss:$16 sps:$4 sm:$0xff]   ;;  %v2931_v18 = vld [vmem:[%s3299_s28 + $0x208] ss:$16 sps:$4 sm:$0xff]   ;;  %v2936_v19 = vld [vmem:[%s3299_s28 + $0x224] ss:$16 sps:$4 sm:$0xff]   ;;  %v3389_v21 = vrot.slane %v484_v17, %v3349_v50 }
  0x2e   : > { %v2939_v20 = vld [vmem:[%s3299_s28 + $0x22c] ss:$16 sps:$4 sm:$0xff]   ;;  %v2934_v24 = vld [vmem:[%s3299_s28 + $0x220] ss:$16 sps:$4 sm:$0xff]   ;;  %v2937_v25 = vld [vmem:[%s3299_s28 + $0x228] ss:$16 sps:$4 sm:$0xff]  }
  0x2f   : > { %1675 = vmatprep.mubr.bf16.mxu0 %v505_v61  ;;  %1839 = vmatprep.mubr.bf16.mxu1 %v505_v61  ;;  %v515_v23 = vcombine.high %v505_v61, %v505_v61  ;;  %v2942_v26 = vld [vmem:[%s3299_s28 + $0x244] ss:$16 sps:$4 sm:$0xff]   ;;  %v2955_v37 = vld [vmem:[%s3299_s28 + $0x288] ss:$16 sps:$4 sm:$0xff]   ;;  %v2963_v39 = vld [vmem:[%s3299_s28 + $0x2ac] ss:$16 sps:$4 sm:$0xff]  }
  0x30   : > { %1656 = vmatpush1.bf16.msra.mxu0 %v2872_v27  ;;  %1820 = vmatpush1.bf16.msra.mxu1 %v2873_v28  ;;  %v2945_v27 = vld [vmem:[%s3299_s28 + $0x24c] ss:$16 sps:$4 sm:$0xff]   ;;  %v2940_v28 = vld [vmem:[%s3299_s28 + $0x240] ss:$16 sps:$4 sm:$0xff]   ;;  %v2960_v38 = vld [vmem:[%s3299_s28 + $0x2a4] ss:$16 sps:$4 sm:$0xff]  }
  0x31   : > { %1657 = vmatprep.subr.bf16.mxu0 %v2874_v29  ;;  %1821 = vmatprep.subr.bf16.mxu1 %v2876_v30  ;;  %v2943_v29 = vld [vmem:[%s3299_s28 + $0x248] ss:$16 sps:$4 sm:$0xff]   ;;  %v2948_v30 = vld [vmem:[%s3299_s28 + $0x264] ss:$16 sps:$4 sm:$0xff]   ;;  %v2969_v43 = vld [vmem:[%s3299_s28 + $0x2cc] ss:$16 sps:$4 sm:$0xff]  }
  0x32   : > { %v2973_v50 = vld [vmem:[%s3299_s28 + $0x2e8] ss:$16 sps:$4 sm:$0xff]   ;;  %v2976_v53 = vld [vmem:[%s3299_s28 + $0x300] ss:$16 sps:$4 sm:$0xff]   ;;  %v2984_v55 = vld [vmem:[%s3299_s28 + $0x324] ss:$16 sps:$4 sm:$0xff]  }
  0x33   : > { %v2990_v59 = vld [vmem:[%s3299_s28 + $0x344] ss:$16 sps:$4 sm:$0xff]   ;;  %v2988_v61 = vld [vmem:[%s3299_s28 + $0x340] ss:$16 sps:$4 sm:$0xff]   ;;  %v3009_v10 = vld [vmem:[%s3299_s28 + $0x3a8] ss:$16 sps:$4 sm:$0xff]  }
  0x34   : > { %1658 = vmatpush1.bf16.msra.mxu0 %v2878_v31  ;;  %1822 = vmatpush1.bf16.msra.mxu1 %v2879_v32  ;;  %v2951_v31 = vld [vmem:[%s3299_s28 + $0x26c] ss:$16 sps:$4 sm:$0xff]   ;;  %v2946_v32 = vld [vmem:[%s3299_s28 + $0x260] ss:$16 sps:$4 sm:$0xff]   ;;  %v3015_v14 = vld [vmem:[%s3299_s28 + $0x3c8] ss:$16 sps:$4 sm:$0xff]  }
  0x35   : > { %1659 = vmatprep.subr.bf16.mxu0 %v2880_v33  ;;  %1823 = vmatprep.subr.bf16.mxu1 %v2882_v34  ;;  %v2949_v33 = vld [vmem:[%s3299_s28 + $0x268] ss:$16 sps:$4 sm:$0xff]   ;;  %v2954_v34 = vld [vmem:[%s3299_s28 + $0x284] ss:$16 sps:$4 sm:$0xff]   ;;  %v3023_v17 = vld [vmem:[%s3299_s28 + $0x3ec] ss:$16 sps:$4 sm:$0xff]  }
  0x36   : > { %vm2407_vm0 = vcmask (!%p2706_p6), 41984  }
  0x38   : > { %1660 = vmatpush1.bf16.msra.mxu0 %v2884_v35  ;;  %1824 = vmatpush1.bf16.msra.mxu1 %v2885_v36  ;;  %v2957_v35 = vld [vmem:[%s3299_s28 + $0x28c] ss:$16 sps:$4 sm:$0xff]   ;;  %v2952_v36 = vld [vmem:[%s3299_s28 + $0x280] ss:$16 sps:$4 sm:$0xff]  }
  0x39   : > { %1661 = vmatprep.subr.bf16.mxu0 %v2886_v40  ;;  %1825 = vmatprep.subr.bf16.mxu1 %v2888_v41  ;;  %v2958_v40 = vld [vmem:[%s3299_s28 + $0x2a0] ss:$16 sps:$4 sm:$0xff]   ;;  %v2961_v41 = vld [vmem:[%s3299_s28 + $0x2a8] ss:$16 sps:$4 sm:$0xff]  }
  0x3c   : > { %1662 = vmatpush1.bf16.msra.mxu0 %v2890_v42  ;;  %1826 = vmatpush1.bf16.msra.mxu1 %v2891_v45  ;;  %v2966_v42 = vld [vmem:[%s3299_s28 + $0x2c4] ss:$16 sps:$4 sm:$0xff]   ;;  %v2964_v45 = vld [vmem:[%s3299_s28 + $0x2c0] ss:$16 sps:$4 sm:$0xff]  }
  0x3d   : > { %1663 = vmatprep.subr.bf16.mxu0 %v2892_v46  ;;  %1827 = vmatprep.subr.bf16.mxu1 %v2894_v47  ;;  %v2967_v46 = vld [vmem:[%s3299_s28 + $0x2c8] ss:$16 sps:$4 sm:$0xff]   ;;  %v2972_v47 = vld [vmem:[%s3299_s28 + $0x2e4] ss:$16 sps:$4 sm:$0xff]  }
  0x40   : > { %1664 = vmatpush1.bf16.msra.mxu0 %v2896_v48  ;;  %1828 = vmatpush1.bf16.msra.mxu1 %v2897_v49  ;;  %v2975_v48 = vld [vmem:[%s3299_s28 + $0x2ec] ss:$16 sps:$4 sm:$0xff]   ;;  %v2970_v49 = vld [vmem:[%s3299_s28 + $0x2e0] ss:$16 sps:$4 sm:$0xff]  }
  0x41   : > { %1665 = vmatprep.subr.bf16.mxu0 %v2898_v51  ;;  %1829 = vmatprep.subr.bf16.mxu1 %v2900_v52  ;;  %v2978_v51 = vld [vmem:[%s3299_s28 + $0x304] ss:$16 sps:$4 sm:$0xff]   ;;  %v2981_v52 = vld [vmem:[%s3299_s28 + $0x30c] ss:$16 sps:$4 sm:$0xff]  }
  0x44   : > { %1666 = vmatpush1.bf16.msra.mxu0 %v2902_v54  ;;  %1830 = vmatpush1.bf16.msra.mxu1 %v2903_v56  ;;  %v2979_v54 = vld [vmem:[%s3299_s28 + $0x308] ss:$16 sps:$4 sm:$0xff]   ;;  %v2987_v56 = vld [vmem:[%s3299_s28 + $0x32c] ss:$16 sps:$4 sm:$0xff]  }
  0x45   : > { %1667 = vmatprep.subr.bf16.mxu0 %v2904_v57  ;;  %1831 = vmatprep.subr.bf16.mxu1 %v2906_v58  ;;  %v2982_v57 = vld [vmem:[%s3299_s28 + $0x320] ss:$16 sps:$4 sm:$0xff]   ;;  %v2985_v58 = vld [vmem:[%s3299_s28 + $0x328] ss:$16 sps:$4 sm:$0xff]  }
  0x48   : > { %1668 = vmatpush1.bf16.msra.mxu0 %v2908_v60  ;;  %1832 = vmatpush1.bf16.msra.mxu1 %v2909_v62  ;;  %v2993_v60 = vld [vmem:[%s3299_s28 + $0x34c] ss:$16 sps:$4 sm:$0xff]   ;;  %v2991_v62 = vld [vmem:[%s3299_s28 + $0x348] ss:$16 sps:$4 sm:$0xff]  }
  0x49   : > { %1669 = vmatprep.subr.bf16.mxu0 %v2910_v63  ;;  %1833 = vmatprep.subr.bf16.mxu1 %v2912_v0  ;;  %v2996_v63 = vld [vmem:[%s3299_s28 + $0x364] ss:$16 sps:$4 sm:$0xff]   ;;  %v2999_v0 = vld [vmem:[%s3299_s28 + $0x36c] ss:$16 sps:$4 sm:$0xff]  }
  0x4c   : > { %1670 = vmatpush1.bf16.msra.mxu0 %v2914_v1  ;;  %1834 = vmatpush1.bf16.msra.mxu1 %v2915_v2  ;;  %v2994_v1 = vld [vmem:[%s3299_s28 + $0x360] ss:$16 sps:$4 sm:$0xff]   ;;  %v2997_v2 = vld [vmem:[%s3299_s28 + $0x368] ss:$16 sps:$4 sm:$0xff]  }
  0x4d   : > { %1671 = vmatprep.subr.bf16.mxu0 %v2916_v3  ;;  %1835 = vmatprep.subr.bf16.mxu1 %v2918_v4  ;;  %v3002_v3 = vld [vmem:[%s3299_s28 + $0x384] ss:$16 sps:$4 sm:$0xff]   ;;  %v3005_v4 = vld [vmem:[%s3299_s28 + $0x38c] ss:$16 sps:$4 sm:$0xff]  }
  0x50   : > { %1672 = vmatpush1.bf16.msra.mxu0 %v2920_v5  ;;  %1836 = vmatpush1.bf16.msra.mxu1 %v2921_v6  ;;  %v3000_v5 = vld [vmem:[%s3299_s28 + $0x380] ss:$16 sps:$4 sm:$0xff]   ;;  %v3003_v6 = vld [vmem:[%s3299_s28 + $0x388] ss:$16 sps:$4 sm:$0xff]  }
  0x51   : > { %1673 = vmatprep.subr.bf16.mxu0 %v2922_v7  ;;  %1837 = vmatprep.subr.bf16.mxu1 %v2924_v8  ;;  %v3008_v7 = vld [vmem:[%s3299_s28 + $0x3a4] ss:$16 sps:$4 sm:$0xff]   ;;  %v3011_v8 = vld [vmem:[%s3299_s28 + $0x3ac] ss:$16 sps:$4 sm:$0xff]  }
  0x54   : > { %1674 = vmatpush1.bf16.msra.mxu0 %v2926_v9  ;;  %1838 = vmatpush1.bf16.msra.mxu1 %v2927_v11  ;;  %v3006_v9 = vld [vmem:[%s3299_s28 + $0x3a0] ss:$16 sps:$4 sm:$0xff]   ;;  %v3014_v11 = vld [vmem:[%s3299_s28 + $0x3c4] ss:$16 sps:$4 sm:$0xff]  }
  0x55   : > { %1684 = vmatprep.subr.bf16.mxu0 %v2930_v12  ;;  %1848 = vmatprep.subr.bf16.mxu1 %v2933_v13  ;;  %v3017_v12 = vld [vmem:[%s3299_s28 + $0x3cc] ss:$16 sps:$4 sm:$0xff]   ;;  %v3012_v13 = vld [vmem:[%s3299_s28 + $0x3c0] ss:$16 sps:$4 sm:$0xff]  }
  0x57   : > { %1676 = vmatmul.mubr.bf16.vlgmr.msra.gmra.mrb[0].mxu0 %v3383_v16  ;;  %1840 = vmatmul.mubr.bf16.vlgmr.msra.gmra.mrb[0].mxu1 %v3383_v16 }
  0x58   : > { %1685 = vmatpush1.bf16.msra.mxu0 %v2928_v15  ;;  %1849 = vmatpush1.bf16.msra.mxu1 %v2931_v18  ;;  %v3020_v15 = vld [vmem:[%s3299_s28 + $0x3e4] ss:$16 sps:$4 sm:$0xff]   ;;  %v3018_v18 = vld [vmem:[%s3299_s28 + $0x3e0] ss:$16 sps:$4 sm:$0xff]  }
  0x59   : > { %1686 = vmatprep.subr.bf16.mxu0 %v2936_v19  ;;  %1850 = vmatprep.subr.bf16.mxu1 %v2939_v20  ;;  %v3021_v19 = vld [vmem:[%s3299_s28 + $0x3e8] ss:$16 sps:$4 sm:$0xff]   ;;  %v3026_v20 = vld [vmem:[%s3299_s28 + $0x404] ss:$16 sps:$4 sm:$0xff]  }
  0x5a   : > { %1716 = vmatprep.mubr.bf16.mxu0 %v515_v23  ;;  %1880 = vmatprep.mubr.bf16.mxu1 %v515_v23  ;;  %v3029_v23 = vld [vmem:[%s3299_s28 + $0x40c] ss:$16 sps:$4 sm:$0xff]  }
  0x5c   : > { %1687 = vmatpush1.bf16.msra.mxu0 %v2934_v24  ;;  %1851 = vmatpush1.bf16.msra.mxu1 %v2937_v25  ;;  %v3024_v24 = vld [vmem:[%s3299_s28 + $0x400] ss:$16 sps:$4 sm:$0xff]   ;;  %v513_v25 = vcombine.high %v3383_v16, %v3383_v16  ;;  %v3033_v16 = vld [vmem:[%s3299_s28 + $0x428] ss:$16 sps:$4 sm:$0xff]  }
  0x5d   : > { %1688 = vmatprep.subr.bf16.mxu0 %v2942_v26  ;;  %1852 = vmatprep.subr.bf16.mxu1 %v2945_v27  ;;  %v3027_v26 = vld [vmem:[%s3299_s28 + $0x408] ss:$16 sps:$4 sm:$0xff]   ;;  %v3032_v27 = vld [vmem:[%s3299_s28 + $0x424] ss:$16 sps:$4 sm:$0xff]  }
  0x60   : > { %1689 = vmatpush1.bf16.msra.mxu0 %v2940_v28  ;;  %1853 = vmatpush1.bf16.msra.mxu1 %v2943_v29  ;;  %v3035_v28 = vld [vmem:[%s3299_s28 + $0x42c] ss:$16 sps:$4 sm:$0xff]   ;;  %v3030_v29 = vld [vmem:[%s3299_s28 + $0x420] ss:$16 sps:$4 sm:$0xff]  }
  0x61   : > { %1690 = vmatprep.subr.bf16.mxu0 %v2948_v30  ;;  %1854 = vmatprep.subr.bf16.mxu1 %v2951_v31  ;;  %v3038_v30 = vld [vmem:[%s3299_s28 + $0x444] ss:$16 sps:$4 sm:$0xff]   ;;  %v3041_v31 = vld [vmem:[%s3299_s28 + $0x44c] ss:$16 sps:$4 sm:$0xff]  }
  0x64   : > { %1691 = vmatpush1.bf16.msra.mxu0 %v2946_v32  ;;  %1855 = vmatpush1.bf16.msra.mxu1 %v2949_v33  ;;  %v3036_v32 = vld [vmem:[%s3299_s28 + $0x440] ss:$16 sps:$4 sm:$0xff]   ;;  %v3039_v33 = vld [vmem:[%s3299_s28 + $0x448] ss:$16 sps:$4 sm:$0xff]  }
  0x65   : > { %1692 = vmatprep.subr.bf16.mxu0 %v2954_v34  ;;  %1856 = vmatprep.subr.bf16.mxu1 %v2957_v35  ;;  %v3044_v34 = vld [vmem:[%s3299_s28 + $0x464] ss:$16 sps:$4 sm:$0xff]   ;;  %v3047_v35 = vld [vmem:[%s3299_s28 + $0x46c] ss:$16 sps:$4 sm:$0xff]  }
  0x68   : > { %1693 = vmatpush1.bf16.msra.mxu0 %v2952_v36  ;;  %1857 = vmatpush1.bf16.msra.mxu1 %v2955_v37  ;;  %v3042_v36 = vld [vmem:[%s3299_s28 + $0x460] ss:$16 sps:$4 sm:$0xff]   ;;  %v3045_v37 = vld [vmem:[%s3299_s28 + $0x468] ss:$16 sps:$4 sm:$0xff]  }
  0x69   : > { %1694 = vmatprep.subr.bf16.mxu0 %v2960_v38  ;;  %1858 = vmatprep.subr.bf16.mxu1 %v2963_v39  ;;  %v3053_v38 = vld [vmem:[%s3299_s28 + $0x48c] ss:$16 sps:$4 sm:$0xff]   ;;  %v3048_v39 = vld [vmem:[%s3299_s28 + $0x480] ss:$16 sps:$4 sm:$0xff]  }
  0x6c   : > { %1695 = vmatpush1.bf16.msra.mxu0 %v2958_v40  ;;  %1859 = vmatpush1.bf16.msra.mxu1 %v2961_v41  ;;  %v3051_v40 = vld [vmem:[%s3299_s28 + $0x488] ss:$16 sps:$4 sm:$0xff]   ;;  %v3056_v41 = vld [vmem:[%s3299_s28 + $0x4a4] ss:$16 sps:$4 sm:$0xff]  }
  0x6d   : > { %1696 = vmatprep.subr.bf16.mxu0 %v2966_v42  ;;  %1860 = vmatprep.subr.bf16.mxu1 %v2969_v43  ;;  %v3059_v42 = vld [vmem:[%s3299_s28 + $0x4ac] ss:$16 sps:$4 sm:$0xff]   ;;  %v3054_v43 = vld [vmem:[%s3299_s28 + $0x4a0] ss:$16 sps:$4 sm:$0xff]  }
  0x70   : > { %1697 = vmatpush1.bf16.msra.mxu0 %v2964_v45  ;;  %1861 = vmatpush1.bf16.msra.mxu1 %v2967_v46  ;;  %v3057_v45 = vld [vmem:[%s3299_s28 + $0x4a8] ss:$16 sps:$4 sm:$0xff]   ;;  %v3062_v46 = vld [vmem:[%s3299_s28 + $0x4c4] ss:$16 sps:$4 sm:$0xff]  }
  0x71   : > { %1698 = vmatprep.subr.bf16.mxu0 %v2972_v47  ;;  %1862 = vmatprep.subr.bf16.mxu1 %v2975_v48  ;;  %v3065_v47 = vld [vmem:[%s3299_s28 + $0x4cc] ss:$16 sps:$4 sm:$0xff]   ;;  %v3060_v48 = vld [vmem:[%s3299_s28 + $0x4c0] ss:$16 sps:$4 sm:$0xff]  }
  0x74   : > { %1699 = vmatpush1.bf16.msra.mxu0 %v2970_v49  ;;  %1863 = vmatpush1.bf16.msra.mxu1 %v2973_v50  ;;  %v3063_v49 = vld [vmem:[%s3299_s28 + $0x4c8] ss:$16 sps:$4 sm:$0xff]   ;;  %v3068_v50 = vld [vmem:[%s3299_s28 + $0x4e4] ss:$16 sps:$4 sm:$0xff]  }
  0x75   : > { %1700 = vmatprep.subr.bf16.mxu0 %v2978_v51  ;;  %1864 = vmatprep.subr.bf16.mxu1 %v2981_v52  ;;  %v3071_v51 = vld [vmem:[%s3299_s28 + $0x4ec] ss:$16 sps:$4 sm:$0xff]   ;;  %v3066_v52 = vld [vmem:[%s3299_s28 + $0x4e0] ss:$16 sps:$4 sm:$0xff]  }
  0x78   : > { %1701 = vmatpush1.bf16.msra.mxu0 %v2976_v53  ;;  %1865 = vmatpush1.bf16.msra.mxu1 %v2979_v54  ;;  %v3069_v53 = vld [vmem:[%s3299_s28 + $0x4e8] ss:$16 sps:$4 sm:$0xff]   ;;  %v3074_v54 = vld [vmem:[%s3299_s28 + $0x504] ss:$16 sps:$4 sm:$0xff]  }
  0x79   : > { %1702 = vmatprep.subr.bf16.mxu0 %v2984_v55  ;;  %1866 = vmatprep.subr.bf16.mxu1 %v2987_v56  ;;  %v3077_v55 = vld [vmem:[%s3299_s28 + $0x50c] ss:$16 sps:$4 sm:$0xff]   ;;  %v3072_v56 = vld [vmem:[%s3299_s28 + $0x500] ss:$16 sps:$4 sm:$0xff]  }
  0x7c   : > { %1703 = vmatpush1.bf16.msra.mxu0 %v2982_v57  ;;  %1867 = vmatpush1.bf16.msra.mxu1 %v2985_v58  ;;  %v3075_v57 = vld [vmem:[%s3299_s28 + $0x508] ss:$16 sps:$4 sm:$0xff]   ;;  %v3080_v58 = vld [vmem:[%s3299_s28 + $0x524] ss:$16 sps:$4 sm:$0xff]  }
  0x7d   : > { %1704 = vmatprep.subr.bf16.mxu0 %v2990_v59  ;;  %1868 = vmatprep.subr.bf16.mxu1 %v2993_v60  ;;  %v3083_v59 = vld [vmem:[%s3299_s28 + $0x52c] ss:$16 sps:$4 sm:$0xff]   ;;  %v3078_v60 = vld [vmem:[%s3299_s28 + $0x520] ss:$16 sps:$4 sm:$0xff]  }
  0x80   : > { %1705 = vmatpush1.bf16.msra.mxu0 %v2988_v61  ;;  %1869 = vmatpush1.bf16.msra.mxu1 %v2991_v62  ;;  %v3081_v61 = vld [vmem:[%s3299_s28 + $0x528] ss:$16 sps:$4 sm:$0xff]   ;;  %v3086_v62 = vld [vmem:[%s3299_s28 + $0x544] ss:$16 sps:$4 sm:$0xff]  }
  0x81   : > { %1706 = vmatprep.subr.bf16.mxu0 %v2996_v63  ;;  %1870 = vmatprep.subr.bf16.mxu1 %v2999_v0  ;;  %v3089_v63 = vld [vmem:[%s3299_s28 + $0x54c] ss:$16 sps:$4 sm:$0xff]   ;;  %v3084_v0 = vld [vmem:[%s3299_s28 + $0x540] ss:$16 sps:$4 sm:$0xff]  }
  0x84   : > { %1707 = vmatpush1.bf16.msra.mxu0 %v2994_v1  ;;  %1871 = vmatpush1.bf16.msra.mxu1 %v2997_v2  ;;  %v3087_v1 = vld [vmem:[%s3299_s28 + $0x548] ss:$16 sps:$4 sm:$0xff]   ;;  %v3092_v2 = vld [vmem:[%s3299_s28 + $0x564] ss:$16 sps:$4 sm:$0xff]  }
  0x85   : > { %1708 = vmatprep.subr.bf16.mxu0 %v3002_v3  ;;  %1872 = vmatprep.subr.bf16.mxu1 %v3005_v4  ;;  %v3095_v3 = vld [vmem:[%s3299_s28 + $0x56c] ss:$16 sps:$4 sm:$0xff]   ;;  %v3090_v4 = vld [vmem:[%s3299_s28 + $0x560] ss:$16 sps:$4 sm:$0xff]  }
  0x88   : > { %1709 = vmatpush1.bf16.msra.mxu0 %v3000_v5  ;;  %1873 = vmatpush1.bf16.msra.mxu1 %v3003_v6  ;;  %v3093_v5 = vld [vmem:[%s3299_s28 + $0x568] ss:$16 sps:$4 sm:$0xff]   ;;  %v3098_v6 = vld [vmem:[%s3299_s28 + $0x584] ss:$16 sps:$4 sm:$0xff]  }
  0x89   : > { %1710 = vmatprep.subr.bf16.mxu0 %v3008_v7  ;;  %1874 = vmatprep.subr.bf16.mxu1 %v3011_v8  ;;  %v3101_v7 = vld [vmem:[%s3299_s28 + $0x58c] ss:$16 sps:$4 sm:$0xff]   ;;  %v3096_v8 = vld [vmem:[%s3299_s28 + $0x580] ss:$16 sps:$4 sm:$0xff]  }
  0x8c   : > { %1711 = vmatpush1.bf16.msra.mxu0 %v3006_v9  ;;  %1875 = vmatpush1.bf16.msra.mxu1 %v3009_v10  ;;  %v3099_v9 = vld [vmem:[%s3299_s28 + $0x588] ss:$16 sps:$4 sm:$0xff]   ;;  %v3104_v10 = vld [vmem:[%s3299_s28 + $0x5a4] ss:$16 sps:$4 sm:$0xff]  }
  0x8d   : > { %1712 = vmatprep.subr.bf16.mxu0 %v3014_v11  ;;  %1876 = vmatprep.subr.bf16.mxu1 %v3017_v12  ;;  %v3107_v11 = vld [vmem:[%s3299_s28 + $0x5ac] ss:$16 sps:$4 sm:$0xff]   ;;  %v3102_v12 = vld [vmem:[%s3299_s28 + $0x5a0] ss:$16 sps:$4 sm:$0xff]  }
  0x90   : > { %1713 = vmatpush1.bf16.msra.mxu0 %v3012_v13  ;;  %1877 = vmatpush1.bf16.msra.mxu1 %v3015_v14  ;;  %v3105_v13 = vld [vmem:[%s3299_s28 + $0x5a8] ss:$16 sps:$4 sm:$0xff]   ;;  %v3110_v14 = vld [vmem:[%s3299_s28 + $0x5c4] ss:$16 sps:$4 sm:$0xff]  }
  0x91   : > { %1714 = vmatprep.subr.bf16.mxu0 %v3020_v15  ;;  %1878 = vmatprep.subr.bf16.mxu1 %v3023_v17  ;;  %v3113_v15 = vld [vmem:[%s3299_s28 + $0x5cc] ss:$16 sps:$4 sm:$0xff]   ;;  %v3108_v17 = vld [vmem:[%s3299_s28 + $0x5c0] ss:$16 sps:$4 sm:$0xff]  }
  0x94   : > { %1715 = vmatpush1.bf16.msra.mxu0 %v3018_v18  ;;  %1879 = vmatpush1.bf16.msra.mxu1 %v3021_v19  ;;  %v3111_v18 = vld [vmem:[%s3299_s28 + $0x5c8] ss:$16 sps:$4 sm:$0xff]   ;;  %v3116_v19 = vld [vmem:[%s3299_s28 + $0x5e4] ss:$16 sps:$4 sm:$0xff]  }
  0x95   : > { %1725 = vmatprep.subr.bf16.mxu0 %v3026_v20  ;;  %1889 = vmatprep.subr.bf16.mxu1 %v3029_v23  ;;  %v3119_v20 = vld [vmem:[%s3299_s28 + $0x5ec] ss:$16 sps:$4 sm:$0xff]   ;;  %v3114_v23 = vld [vmem:[%s3299_s28 + $0x5e0] ss:$16 sps:$4 sm:$0xff]  }
  0x97   : > { %1717 = vmatmul.mubr.bf16.vlgmr.msra.gmra.mrb[0].mxu0 %v513_v25  ;;  %1881 = vmatmul.mubr.bf16.vlgmr.msra.gmra.mrb[0].mxu1 %v513_v25  ;;  %v3123_v25 = vld [vmem:[%s3299_s28 + $0x604] ss:$16 sps:$4 sm:$0xff]  }
  0x98   : > { %1726 = vmatpush1.bf16.msra.mxu0 %v3024_v24  ;;  %1890 = vmatpush1.bf16.msra.mxu1 %v3027_v26  ;;  %v3117_v24 = vld [vmem:[%s3299_s28 + $0x5e8] ss:$16 sps:$4 sm:$0xff]   ;;  %v3126_v26 = vld [vmem:[%s3299_s28 + $0x60c] ss:$16 sps:$4 sm:$0xff]  }
  0x99   : > { %1727 = vmatprep.subr.bf16.mxu0 %v3032_v27  ;;  %1891 = vmatprep.subr.bf16.mxu1 %v3035_v28  ;;  %v3121_v27 = vld [vmem:[%s3299_s28 + $0x600] ss:$16 sps:$4 sm:$0xff]   ;;  %v3124_v28 = vld [vmem:[%s3299_s28 + $0x608] ss:$16 sps:$4 sm:$0xff]  }
  0x9a   : > { %1757 = vmatprep.mubr.bf16.mxu0 %v3389_v21  ;;  %1921 = vmatprep.mubr.bf16.mxu1 %v3389_v21  ;;  %v3050_v21 = vld [vmem:[%s3299_s28 + $0x484] ss:$16 sps:$4 sm:$0xff]  }
  0x9c   : > { %1728 = vmatpush1.bf16.msra.mxu0 %v3030_v29  ;;  %1892 = vmatpush1.bf16.msra.mxu1 %v3033_v16  ;;  %v3129_v29 = vld [vmem:[%s3299_s28 + $0x624] ss:$16 sps:$4 sm:$0xff]   ;;  %v3132_v16 = vld [vmem:[%s3299_s28 + $0x62c] ss:$16 sps:$4 sm:$0xff]  }
  0x9d   : > { %1729 = vmatprep.subr.bf16.mxu0 %v3038_v30  ;;  %1893 = vmatprep.subr.bf16.mxu1 %v3041_v31  ;;  %v3127_v30 = vld [vmem:[%s3299_s28 + $0x620] ss:$16 sps:$4 sm:$0xff]   ;;  %v3130_v31 = vld [vmem:[%s3299_s28 + $0x628] ss:$16 sps:$4 sm:$0xff]  }
  0xa0   : > { %1730 = vmatpush1.bf16.msra.mxu0 %v3036_v32  ;;  %1894 = vmatpush1.bf16.msra.mxu1 %v3039_v33  ;;  %v3135_v32 = vld [vmem:[%s3299_s28 + $0x644] ss:$16 sps:$4 sm:$0xff]   ;;  %v3138_v33 = vld [vmem:[%s3299_s28 + $0x64c] ss:$16 sps:$4 sm:$0xff]  }
  0xa1   : > { %1731 = vmatprep.subr.bf16.mxu0 %v3044_v34  ;;  %1895 = vmatprep.subr.bf16.mxu1 %v3047_v35  ;;  %v3245_v34 = vmov 0   ;;  %v3133_v35 = vld [vmem:[%s3299_s28 + $0x640] ss:$16 sps:$4 sm:$0xff]  }
  0xa4   : > { %1732 = vmatpush1.bf16.msra.mxu0 %v3042_v36  ;;  %1896 = vmatpush1.bf16.msra.mxu1 %v3045_v37  ;;  %v3136_v36 = vld [vmem:[%s3299_s28 + $0x648] ss:$16 sps:$4 sm:$0xff]   ;;  %v3141_v37 = vld [vmem:[%s3299_s28 + $0x664] ss:$16 sps:$4 sm:$0xff]  }
  0xa5   : > { %1733 = vmatprep.subr.bf16.mxu0 %v3050_v21  ;;  %1897 = vmatprep.subr.bf16.mxu1 %v3053_v38  ;;  %v3144_v21 = vld [vmem:[%s3299_s28 + $0x66c] ss:$16 sps:$4 sm:$0xff]   ;;  %v3139_v38 = vld [vmem:[%s3299_s28 + $0x660] ss:$16 sps:$4 sm:$0xff]  }
  0xa8   : > { %1734 = vmatpush1.bf16.msra.mxu0 %v3048_v39  ;;  %1898 = vmatpush1.bf16.msra.mxu1 %v3051_v40  ;;  %v3142_v39 = vld [vmem:[%s3299_s28 + $0x668] ss:$16 sps:$4 sm:$0xff]   ;;  %v3147_v40 = vld [vmem:[%s3299_s28 + $0x684] ss:$16 sps:$4 sm:$0xff]  }
  0xa9   : > { %1735 = vmatprep.subr.bf16.mxu0 %v3056_v41  ;;  %1899 = vmatprep.subr.bf16.mxu1 %v3059_v42  ;;  %v3150_v41 = vld [vmem:[%s3299_s28 + $0x68c] ss:$16 sps:$4 sm:$0xff]   ;;  %v3145_v42 = vld [vmem:[%s3299_s28 + $0x680] ss:$16 sps:$4 sm:$0xff]  }
  0xac   : > { %1736 = vmatpush1.bf16.msra.mxu0 %v3054_v43  ;;  %1900 = vmatpush1.bf16.msra.mxu1 %v3057_v45  ;;  %v3148_v43 = vld [vmem:[%s3299_s28 + $0x688] ss:$16 sps:$4 sm:$0xff]   ;;  %v3153_v45 = vld [vmem:[%s3299_s28 + $0x6a4] ss:$16 sps:$4 sm:$0xff]  }
  0xad   : > { %1737 = vmatprep.subr.bf16.mxu0 %v3062_v46  ;;  %1901 = vmatprep.subr.bf16.mxu1 %v3065_v47  ;;  %v3156_v46 = vld [vmem:[%s3299_s28 + $0x6ac] ss:$16 sps:$4 sm:$0xff]   ;;  %v3151_v47 = vld [vmem:[%s3299_s28 + $0x6a0] ss:$16 sps:$4 sm:$0xff]  }
  0xb0   : > { %1738 = vmatpush1.bf16.msra.mxu0 %v3060_v48  ;;  %1902 = vmatpush1.bf16.msra.mxu1 %v3063_v49  ;;  %v3154_v48 = vld [vmem:[%s3299_s28 + $0x6a8] ss:$16 sps:$4 sm:$0xff]   ;;  %v3159_v49 = vld [vmem:[%s3299_s28 + $0x6c4] ss:$16 sps:$4 sm:$0xff]  }
  0xb1   : > { %1739 = vmatprep.subr.bf16.mxu0 %v3068_v50  ;;  %1903 = vmatprep.subr.bf16.mxu1 %v3071_v51  ;;  %v3162_v50 = vld [vmem:[%s3299_s28 + $0x6cc] ss:$16 sps:$4 sm:$0xff]   ;;  %v3157_v51 = vld [vmem:[%s3299_s28 + $0x6c0] ss:$16 sps:$4 sm:$0xff]  }
  0xb4   : > { %1740 = vmatpush1.bf16.msra.mxu0 %v3066_v52  ;;  %1904 = vmatpush1.bf16.msra.mxu1 %v3069_v53  ;;  %v3160_v52 = vld [vmem:[%s3299_s28 + $0x6c8] ss:$16 sps:$4 sm:$0xff]   ;;  %v3165_v53 = vld [vmem:[%s3299_s28 + $0x6e4] ss:$16 sps:$4 sm:$0xff]  }
  0xb5   : > { %1741 = vmatprep.subr.bf16.mxu0 %v3074_v54  ;;  %1905 = vmatprep.subr.bf16.mxu1 %v3077_v55  ;;  %v3168_v54 = vld [vmem:[%s3299_s28 + $0x6ec] ss:$16 sps:$4 sm:$0xff]   ;;  %v3163_v55 = vld [vmem:[%s3299_s28 + $0x6e0] ss:$16 sps:$4 sm:$0xff]  }
  0xb8   : > { %1742 = vmatpush1.bf16.msra.mxu0 %v3072_v56  ;;  %1906 = vmatpush1.bf16.msra.mxu1 %v3075_v57  ;;  %v3166_v56 = vld [vmem:[%s3299_s28 + $0x6e8] ss:$16 sps:$4 sm:$0xff]   ;;  %v514_v57 = vcombine.high %v3392_v22, %v3392_v22 }
  0xb9   : > { %1743 = vmatprep.subr.bf16.mxu0 %v3080_v58  ;;  %1907 = vmatprep.subr.bf16.mxu1 %v3083_v59  ;;  %v3246_v58 = vmov 1983009808  }
  0xba   : > { %v1978_v59 = vunpack.c.l.s4 %v3246_v58 }
  0xbc   : > { %1744 = vmatpush1.bf16.msra.mxu0 %v3078_v60  ;;  %1908 = vmatpush1.bf16.msra.mxu1 %v3081_v61  ;;  %v1979_v60 = vunpack.c.0.s8 %v1978_v59 }
  0xbd   : > { %1745 = vmatprep.subr.bf16.mxu0 %v3086_v62  ;;  %1909 = vmatprep.subr.bf16.mxu1 %v3089_v63 }
  0xbe   : > { %v3559_v63 = vsub.s32 %v1979_v60, %v3341_v44 }
  0xc0   : > { %1746 = vmatpush1.bf16.msra.mxu0 %v3084_v0  ;;  %1910 = vmatpush1.bf16.msra.mxu1 %v3087_v1 }
  0xc1   : > { %1747 = vmatprep.subr.bf16.mxu0 %v3092_v2  ;;  %1911 = vmatprep.subr.bf16.mxu1 %v3095_v3 }
  0xc4   : > { %1748 = vmatpush1.bf16.msra.mxu0 %v3090_v4  ;;  %1912 = vmatpush1.bf16.msra.mxu1 %v3093_v5 }
  0xc5   : > { %1749 = vmatprep.subr.bf16.mxu0 %v3098_v6  ;;  %1913 = vmatprep.subr.bf16.mxu1 %v3101_v7 }
  0xc8   : > { %1750 = vmatpush1.bf16.msra.mxu0 %v3096_v8  ;;  %1914 = vmatpush1.bf16.msra.mxu1 %v3099_v9  ;;  %v241_v9 = vld [vmem:[#allocation2] sm:$0xff] }
  0xc9   : > { %1751 = vmatprep.subr.bf16.mxu0 %v3104_v10  ;;  %1915 = vmatprep.subr.bf16.mxu1 %v3107_v11 }
  0xcc   : > { %1752 = vmatpush1.bf16.msra.mxu0 %v3102_v12  ;;  %1916 = vmatpush1.bf16.msra.mxu1 %v3105_v13  ;;  %v3169_v12 = vld [vmem:[%s3703_s3 + $0x40] sm:$0xff] (!%p2706_p6)  }
  0xcd   : > { %1753 = vmatprep.subr.bf16.mxu0 %v3110_v14  ;;  %1917 = vmatprep.subr.bf16.mxu1 %v3113_v15  ;;  %v3170_v13 = vld [vmem:[%s3703_s3 + $0xc0] sm:$0xff] (!%p2706_p6)  }
  0xce   : > { %v3171_v14 = vld [vmem:[%s3703_s3] sm:$0xff] (!%p2706_p6)  }
  0xcf   : > { %v3172_v15 = vld [vmem:[%s3703_s3 + $0x80] sm:$0xff] (!%p2706_p6)  }
  0xd0   : > { %1754 = vmatpush1.bf16.msra.mxu0 %v3108_v17  ;;  %1918 = vmatpush1.bf16.msra.mxu1 %v3111_v18  ;;  %v3173_v17 = vld [vmem:[%s3703_s3 + $0x48] sm:$0xff] (!%p2706_p6)  }
  0xd1   : > { %1755 = vmatprep.subr.bf16.mxu0 %v3116_v19  ;;  %1919 = vmatprep.subr.bf16.mxu1 %v3119_v20  ;;  %v3174_v18 = vld [vmem:[%s3703_s3 + $0xc8] sm:$0xff] (!%p2706_p6)  }
  0xd2   : > { %v3175_v19 = vld [vmem:[%s3703_s3 + $0x8] sm:$0xff] (!%p2706_p6)  }
  0xd3   : > { %v3176_v20 = vld [vmem:[%s3703_s3 + $0x88] sm:$0xff] (!%p2706_p6)  }
  0xd4   : > { %1756 = vmatpush1.bf16.msra.mxu0 %v3114_v23  ;;  %1920 = vmatpush1.bf16.msra.mxu1 %v3117_v24  ;;  %v3177_v23 = vld [vmem:[%s3703_s3 + $0x50] sm:$0xff] (!%p2706_p6)  }
  0xd5   : > { %1766 = vmatprep.subr.bf16.mxu0 %v3123_v25  ;;  %1930 = vmatprep.subr.bf16.mxu1 %v3126_v26  ;;  %v3178_v24 = vld [vmem:[%s3703_s3 + $0xd0] sm:$0xff] (!%p2706_p6)  }
  0xd6   : > { %v3179_v25 = vld [vmem:[%s3703_s3 + $0x10] sm:$0xff] (!%p2706_p6)  }
  0xd7   : > { %1758 = vmatmul.mubr.bf16.vlgmr.msra.gmra.mrb[0].mxu0 %v3392_v22  ;;  %1922 = vmatmul.mubr.bf16.vlgmr.msra.gmra.mrb[0].mxu1 %v3392_v22  ;;  %v3180_v26 = vld [vmem:[%s3703_s3 + $0x90] sm:$0xff] (!%p2706_p6)  }
  0xd8   : > { %1767 = vmatpush1.bf16.msra.mxu0 %v3121_v27  ;;  %1931 = vmatpush1.bf16.msra.mxu1 %v3124_v28  ;;  %v3181_v27 = vld [vmem:[%s3703_s3 + $0x58] sm:$0xff] (!%p2706_p6)  }
  0xd9   : > { %1768 = vmatprep.subr.bf16.mxu0 %v3129_v29  ;;  %1932 = vmatprep.subr.bf16.mxu1 %v3132_v16  ;;  %v3182_v28 = vld [vmem:[%s3703_s3 + $0xd8] sm:$0xff] (!%p2706_p6)  }
  0xda   : > { %1798 = vmatprep.mubr.bf16.mxu0 %v3245_v34  ;;  %1962 = vmatprep.mubr.bf16.mxu1 %v3245_v34  ;;  %v3183_v29 = vld [vmem:[%s3703_s3 + $0x18] sm:$0xff] (!%p2706_p6)   ;;  %v3189_v34 = vld [vmem:[%s3703_s3 + $0x68] sm:$0xff] (!%p2706_p6)  }
  0xdb   : > { %v3184_v16 = vld [vmem:[%s3703_s3 + $0x98] sm:$0xff] (!%p2706_p6)  }
  0xdc   : > { %1769 = vmatpush1.bf16.msra.mxu0 %v3127_v30  ;;  %1933 = vmatpush1.bf16.msra.mxu1 %v3130_v31  ;;  %v3185_v30 = vld [vmem:[%s3703_s3 + $0x60] sm:$0xff] (!%p2706_p6)  }
  0xdd   : > { %1770 = vmatprep.subr.bf16.mxu0 %v3135_v32  ;;  %1934 = vmatprep.subr.bf16.mxu1 %v3138_v33  ;;  %v3186_v31 = vld [vmem:[%s3703_s3 + $0xe0] sm:$0xff] (!%p2706_p6)  }
  0xde   : > { %v3187_v32 = vld [vmem:[%s3703_s3 + $0x20] sm:$0xff] (!%p2706_p6)  }
  0xdf   : > { %v3188_v33 = vld [vmem:[%s3703_s3 + $0xa0] sm:$0xff] (!%p2706_p6)  }
  0xe0   : > { %1771 = vmatpush1.bf16.msra.mxu0 %v3133_v35  ;;  %1935 = vmatpush1.bf16.msra.mxu1 %v3136_v36  ;;  %v3190_v35 = vld [vmem:[%s3703_s3 + $0xe8] sm:$0xff] (!%p2706_p6)  }
  0xe1   : > { %1772 = vmatprep.subr.bf16.mxu0 %v3141_v37  ;;  %1936 = vmatprep.subr.bf16.mxu1 %v3144_v21  ;;  %v3191_v36 = vld [vmem:[%s3703_s3 + $0x28] sm:$0xff] (!%p2706_p6)   ;;  %v3193_v21 = vld [vmem:[%s3703_s3 + $0x70] sm:$0xff] (!%p2706_p6)  }
  0xe2   : > { %v3192_v37 = vld [vmem:[%s3703_s3 + $0xa8] sm:$0xff] (!%p2706_p6)  }
  0xe4   : > { %1773 = vmatpush1.bf16.msra.mxu0 %v3139_v38  ;;  %1937 = vmatpush1.bf16.msra.mxu1 %v3142_v39  ;;  %v3194_v38 = vld [vmem:[%s3703_s3 + $0xf0] sm:$0xff] (!%p2706_p6)  }
  0xe5   : > { %1774 = vmatprep.subr.bf16.mxu0 %v3147_v40  ;;  %1938 = vmatprep.subr.bf16.mxu1 %v3150_v41  ;;  %v3195_v39 = vld [vmem:[%s3703_s3 + $0x30] sm:$0xff] (!%p2706_p6)   ;;  %v2004_v40 = vsub.s32 (!%p2706_p6), 0, %v3341_v44 }
  0xe6   : > { %v3196_v41 = vld [vmem:[%s3703_s3 + $0xb0] sm:$0xff] (!%p2706_p6)  }
  0xe8   : > { %1775 = vmatpush1.bf16.msra.mxu0 %v3145_v42  ;;  %1939 = vmatpush1.bf16.msra.mxu1 %v3148_v43  ;;  %v2008_v42 = vsub.s32 (!%p2706_p6), 1, %v3341_v44  ;;  %v3197_v43 = vld [vmem:[%s3703_s3 + $0x78] sm:$0xff] (!%p2706_p6)  }
  0xe9   : > { %1776 = vmatprep.subr.bf16.mxu0 %v3153_v45  ;;  %1940 = vmatprep.subr.bf16.mxu1 %v3156_v46  ;;  %v2012_v45 = vsub.s32 (!%p2706_p6), 2, %v3341_v44  ;;  %v3198_v46 = vld [vmem:[%s3703_s3 + $0xf8] sm:$0xff] (!%p2706_p6)  }
  0xec   : > { %1777 = vmatpush1.bf16.msra.mxu0 %v3151_v47  ;;  %1941 = vmatpush1.bf16.msra.mxu1 %v3154_v48  ;;  %v2016_v47 = vsub.s32 (!%p2706_p6), 3, %v3341_v44  ;;  %v3199_v48 = vld [vmem:[%s3703_s3 + $0x38] sm:$0xff] (!%p2706_p6)  }
  0xed   : > { %1778 = vmatprep.subr.bf16.mxu0 %v3159_v49  ;;  %1942 = vmatprep.subr.bf16.mxu1 %v3162_v50  ;;  %v3200_v49 = vld [vmem:[%s3703_s3 + $0xb8] sm:$0xff] (!%p2706_p6)   ;;  %v2000_v50 = vld [vmem:[%s3702_s2] sm:$0xf] (!%p2706_p6) }
  0xee   : > { %v2017_v44 = vrot.slane (!%p2706_p6), %v2000_v50, %v2016_v47 }
  0xf0   : > { %1779 = vmatpush1.bf16.msra.mxu0 %v3157_v51  ;;  %1943 = vmatpush1.bf16.msra.mxu1 %v3160_v52  ;;  %v2005_v51 = vrot.slane (!%p2706_p6), %v2000_v50, %v2004_v40  ;;  %v2009_v52 = vrot.slane (!%p2706_p6), %v2000_v50, %v2008_v42 }
  0xf1   : > { %1780 = vmatprep.subr.bf16.mxu0 %v3165_v53  ;;  %1944 = vmatprep.subr.bf16.mxu1 %v3168_v54  ;;  %v2013_v53 = vrot.slane (!%p2706_p6), %v2000_v50, %v2012_v45 }
  0xf2   : > { %v2018_v54 = vcombine.low (!%p2706_p6), %v2005_v51, %v2009_v52 }
  0xf4   : > { %1781 = vmatpush1.bf16.msra.mxu0 %v3163_v55  ;;  %1945 = vmatpush1.bf16.msra.mxu1 %v3166_v56  ;;  %v2019_v55 = vcombine.low (!%p2706_p6), %v2013_v53, %v2017_v44  ;;  %v2026_v56 = vrot.slane (!%p2706_p6), %v2018_v54, %v3559_v63 }
  0xf5   : > { %2745 = vmatprep.subr.bf16.mxu0 (!%p2706_p6), %v3169_v12  ;;  %2767 = vmatprep.subr.bf16.mxu1 (!%p2706_p6), %v3170_v13 }
  0xf7   : > { %1799 = vmatmul.mubr.bf16.vlgmr.msra.gmra.mrb[0].mxu0 %v514_v57  ;;  %1963 = vmatmul.mubr.bf16.vlgmr.msra.gmra.mrb[0].mxu1 %v514_v57  ;;  %v2033_v57 = vrot.slane (!%p2706_p6), %v2019_v55, %v3559_v63 }
  0xf8   : > { %2746 = vmatpush3.bf16.msra.mxu0 (!%p2706_p6), %v3171_v14  ;;  %2768 = vmatpush3.bf16.msra.mxu1 (!%p2706_p6), %v3172_v15 }
  0xf9   : > { %2747 = vmatprep.subr.bf16.mxu0 (!%p2706_p6), %v3173_v17  ;;  %2769 = vmatprep.subr.bf16.mxu1 (!%p2706_p6), %v3174_v18  ;;  %v2034_v59 = vcombine.low (!%p2706_p6), %v2026_v56, %v2033_v57 }
  0xfc   : > { %2748 = vmatpush3.bf16.msra.mxu0 (!%p2706_p6), %v3175_v19  ;;  %2770 = vmatpush3.bf16.msra.mxu1 (!%p2706_p6), %v3176_v20 }
  0xfd   : > { %2749 = vmatprep.subr.bf16.mxu0 (!%p2706_p6), %v3177_v23  ;;  %2771 = vmatprep.subr.bf16.mxu1 (!%p2706_p6), %v3178_v24 }
 0x100   : > { %2750 = vmatpush3.bf16.msra.mxu0 (!%p2706_p6), %v3179_v25  ;;  %2772 = vmatpush3.bf16.msra.mxu1 (!%p2706_p6), %v3180_v26 }
 0x101   : > { %2751 = vmatprep.subr.bf16.mxu0 (!%p2706_p6), %v3181_v27  ;;  %2773 = vmatprep.subr.bf16.mxu1 (!%p2706_p6), %v3182_v28 }
 0x104   : > { %2752 = vmatpush3.bf16.msra.mxu0 (!%p2706_p6), %v3183_v29  ;;  %2774 = vmatpush3.bf16.msra.mxu1 (!%p2706_p6), %v3184_v16 }
 0x105   : > { %2753 = vmatprep.subr.bf16.mxu0 (!%p2706_p6), %v3185_v30  ;;  %2775 = vmatprep.subr.bf16.mxu1 (!%p2706_p6), %v3186_v31 }
 0x108   : > { %2754 = vmatpush3.bf16.msra.mxu0 (!%p2706_p6), %v3187_v32  ;;  %2776 = vmatpush3.bf16.msra.mxu1 (!%p2706_p6), %v3188_v33 }
 0x109   : > { %2755 = vmatprep.subr.bf16.mxu0 (!%p2706_p6), %v3189_v34  ;;  %2777 = vmatprep.subr.bf16.mxu1 (!%p2706_p6), %v3190_v35 }
 0x10c   : > { %2756 = vmatpush3.bf16.msra.mxu0 (!%p2706_p6), %v3191_v36  ;;  %2778 = vmatpush3.bf16.msra.mxu1 (!%p2706_p6), %v3192_v37 }
 0x10d   : > { %2757 = vmatprep.subr.bf16.mxu0 (!%p2706_p6), %v3193_v21  ;;  %2779 = vmatprep.subr.bf16.mxu1 (!%p2706_p6), %v3194_v38 }
 0x110   : > { %2758 = vmatpush3.bf16.msra.mxu0 (!%p2706_p6), %v3195_v39  ;;  %2780 = vmatpush3.bf16.msra.mxu1 (!%p2706_p6), %v3196_v41 }
 0x111   : > { %2759 = vmatprep.subr.bf16.mxu0 (!%p2706_p6), %v3197_v43  ;;  %2781 = vmatprep.subr.bf16.mxu1 (!%p2706_p6), %v3198_v46 }
 0x114   : > { %2760 = vmatpush3.bf16.msra.mxu0 (!%p2706_p6), %v3199_v48  ;;  %2782 = vmatpush3.bf16.msra.mxu1 (!%p2706_p6), %v3200_v49 }
 0x1ca   : > { %v1800_v61 = vpop.f32.mrb[0].mxu0  ;;  %v1964_v62 = vpop.f32.mrb[0].mxu1 }
 0x1cb   : > { %v1802_v0 = vpop.f32.mrb[1].mxu0  ;;  %v1966_v1 = vpop.f32.mrb[1].mxu1 }
 0x1cc   : > { %v1975_v2 = vcombine.low %v1800_v61, %v1802_v0  ;;  %v1976_v3 = vcombine.low %v1964_v62, %v1966_v1  ;;  %v1804_v4 = vpop.f32.mrb[2].mxu0  ;;  %v1968_v5 = vpop.f32.mrb[2].mxu1 }
 0x1cd   : > { %v1805_v6 = vpop.f32.mrb[3].mxu0  ;;  %v1969_v22 = vpop.f32.mrb[3].mxu1 }
 0x1ce   : > { %v1983_v7 = vrot.slane %v1975_v2, %v3559_v63  ;;  %v1990_v8 = vrot.slane %v1976_v3, %v3559_v63  ;;  %1998 = sbr.rel (%p2706_p6) target bundleno = 1021 (0x3fd), region = 48 }
 0x1d0   : > { %v1991_v10 = vcombine.low %v1983_v7, %v1990_v8  ;;  %v2707_v8 = vld [vmem:[%s3704_s4] ss:$0 sm:$0xff] (!%p2706_p6) }
 0x1d2   : > { %v1993_v11 = vadd.f32 %v1991_v10, %v241_v9 }
 0x1d4   : > { %1994 = vst [vmem:[#allocation2] sm:$0xff] %v1993_v11 }
 0x1db   : > { %v1999_v58 = vld [vmem:[#allocation2] sm:$0xff] }
 0x1dc   : > { %v2036_v60 = vadd.f32 %v2034_v59, %v1999_v58 }
 0x1de   : > { %v2037_v61 = vmax.f32 %v2036_v60, 0.0 }
 0x1e0   : > { %v2046_v62 = vrot.slane %v2037_v61, %v3559_v63  ;;  %v2039_v0 = vcombine.high %v2037_v61, %v2037_v61 }
 0x1e2   : > { %v2054_v1 = vcombine.high %v2046_v62, %v2046_v62  ;;  %v2053_v2 = vrot.slane %v2039_v0, %v3559_v63  ;;  %v2060_v3 = vpack.c.bf16 %v2046_v62, %v2046_v62 }
 0x1e4   : > { %v2061_v4 = vpack.c.bf16 %v2054_v1, %v2054_v1  ;;  %v2055_v5 = vcombine.high %v2053_v2, %v2053_v2  ;;  %v2062_v6 = vpack.c.bf16 %v2053_v2, %v2053_v2 }
 0x1e6   : > { %2359 = vmatprep.mubr.bf16.mxu0 %v2061_v4  ;;  %v2063_v22 = vpack.c.bf16 %v2055_v5, %v2055_v5 }
 0x1e7   : > { %2360 = vmatmul.mubr.bf16.vlgmr.msra.gmra.mrb[0].mxu0 %v2060_v3 }
 0x1e8   : > { %2399 = vmatprep.mubr.bf16.mxu1 %v2063_v22 }
 0x1e9   : > { %2400 = vmatmul.mubr.bf16.vlgmr.msra.gmra.mrb[0].mxu1 %v2062_v6 }
 0x2ba   : > { %v2761_v7 = vpop.f32.mrb[0].mxu0 }
 0x2bb   : > { %v2762_v9 = vpop.f32.mrb[1].mxu0 }
 0x2bc   : > { %v2783_v10 = vpop.f32.mrb[0].mxu1  ;;  %v2763_v11 = vadd.f32 %v2762_v9, %v2761_v7  ;;  %v2764_v12 = vpop.f32.mrb[2].mxu0 }
 0x2bd   : > { %v2784_v13 = vpop.f32.mrb[1].mxu1  ;;  %v2765_v63 = vpop.f32.mrb[3].mxu0 }
 0x2be   : > { %v2362_v14 = vadd.f32 %v2763_v11, %v2707_v8  ;;  %v2785_v15 = vadd.f32 %v2784_v13, %v2783_v10  ;;  %v2786_v17 = vpop.f32.mrb[2].mxu1 }
 0x2bf   : > { %v2787_v18 = vpop.f32.mrb[3].mxu1 }
 0x2c0   : > { %v2402_v19 = vadd.f32 %v2785_v15, %v2362_v14 }
 0x2c2   : > { %v2408_v20 = vsel %vm2407_vm0, %v2402_v19, -inf }
 0x2c3   : > { %2409 = vmax.xlane.f32.xlu0 %v2408_v20 }
 0x350   : > { %v2410_v23 = vpop.xlane.xlu0 %2409 }
 0x351   : > { %v2411_v24 = vsub.f32 %v2402_v19, %v2410_v23 }
 0x353   : > { %v2412_v25 = vmul.f32 1.442695, %v2411_v24 }
 0x355   : > { %3201 = vpow2.f32 %v2412_v25 }
 0x35f   : > { %v3202_v26 = vpop.eup %3201 }
 0x360   : > { %v2414_v27 = vsel %vm2407_vm0, %v3202_v26, 0.0 }
 0x361   : > { %2415 = vadd.xlane.f32.xlu0 %v2414_v27 }
 0x3ee   : > { %v2416_v28 = vpop.xlane.xlu0 %2415 }
 0x3ef   : > { %3203 = vrcp.f32 %v2416_v28 }
 0x3f9   : > { %v3204_v29 = vpop.eup %3203 }
 0x3fa   : > { %v2418_v16 = vmul.f32 %v3204_v29, %v3202_v26 }
 0x3fc   : > { %2419 = vst.msk [vmem:[#allocation3] sm:$0x3] %vm2407_vm0, %v2418_v16 }
 0x3fd PF: > { %p2817_p7 = scmp.eq.s32.totalorder %s3284_s19, 3  ;;  %s3247_s30 = smov [#allocation3]  }
 0x3fe   : > { %s2427_s6 = sshll.u32 %s3247_s30, 4  ;;  %s2428_s6 = int_to_ptr.vmem [resolvable:$true] %s2427_s6 }
 0x3ff   : > { %s3205_s7 = scalar_lea.vmem %s2428_s6, 32  ;;  %p3212_p11 = scmp.lt.s32.totalorder %s2428_s6, %s2428_s6 }
 0x400   : > { %p3206_p8 = scmp.ne.s32.totalorder %s2428_s6, %s3205_s7  ;;  %p3213_p12 = scmp.lt.s32.totalorder %s3205_s7, %s3205_s7 }
 0x402   : > { %p3207_p9 = pnand %p3206_p8, %p2817_p7  ;;  %p3214_p13 = por %p3213_p12, %p3212_p11 }
 0x404   : > { %p3208_p10 = pneg %p3207_p9 }
 0x406   : > { %p3215_p0 = pnand %p3214_p13, %p3208_p10 }
 0x408   : > { %3218 = shalt.err (!%p3215_p0)
}
 0x409   : > { %s3219_s10 = scalar_lea.hbm %s3705_s5, 32 }
 0x40a   : > { %p3220_p1 = scmp.ne.s32.totalorder %s3705_s5, %s3219_s10  ;;  %p3225_p4 = scmp.lt.u32.totalorder %s3219_s10, %s3705_s5 }
 0x40c   : > { %p3221_p2 = pnand %p3220_p1, %p2817_p7 }
 0x40e   : > { %p3222_p3 = pneg %p3221_p2 }
 0x410   : > { %p3227_p5 = pnand %p3225_p4, %p3222_p3 }
 0x412   : > { %3230 = shalt.err (!%p3227_p5)
}
 0x413   : > { %2814 = dma.vmem_to_hbm [thread:$0]  (%p2817_p7), %s2428_s6, 32, %s3705_s5, [#allocation4]  }
 0x414   : > { %3236 = dma.done.wait (%p2817_p7), [#allocation4], 32  }
 0x415   : > { %3238 = vsyncadd (%p2817_p7), [#allocation4], 4294967264 }
 0x416 PF: > { %s16_s18 = sadd.s32 1, %s3241_s18  }
 0x417   : > { %p13_p6 = scmp.ge.s32.totalorder %s16_s18, 6  }
 0x419   :  { %15 = sbr.rel (!%p13_p6) target bundleno = 1 (0x1), region = 78 }
 0x420   :  { %2440 = vsyncpa [#allocation4], 1 }
 0x421   :  { %2442 = vsyncpa [#allocation4 + $0x1], 1 }

</bundles_post_ra>
